<compile_context>
chip_gen: v5e
topology: v5e:2x2
jax: 0.10.0
libtpu: 0.0.40
codegen_flags: <defaults>
</compile_context>

<pallas_src>
import functools

import numpy as np
import jax
import jax.numpy as jnp
from jax.experimental import pallas as pl
from jax.experimental.pallas import tpu as pltpu  # noqa: F401  (TPU backend assumed)

# ----------------------------------------------------------------------------
# Miniature darknet cfg (same block grammar as yolov3.cfg)
# ----------------------------------------------------------------------------
CFG = """
[net]
height=16
width=16
channels=3

[convolutional]
batch_normalize=1
filters=8
size=3
stride=1
pad=1
activation=leaky

[convolutional]
batch_normalize=1
filters=16
size=3
stride=2
pad=1
activation=leaky

[convolutional]
batch_normalize=1
filters=8
size=1
stride=1
pad=1
activation=leaky

[convolutional]
batch_normalize=1
filters=16
size=3
stride=1
pad=1
activation=leaky

[shortcut]
from=-3
activation=linear

[convolutional]
batch_normalize=1
filters=16
size=3
stride=2
pad=1
activation=leaky

[convolutional]
size=1
stride=1
pad=1
filters=21
activation=linear

[yolo]
mask=0,1,2
anchors=10,13, 16,30, 33,23, 30,61, 62,45, 59,119
classes=2
num=6

[route]
layers=-3

[convolutional]
batch_normalize=1
filters=8
size=1
stride=1
pad=1
activation=leaky

[upsample]
stride=2

[route]
layers=-1,-7

[convolutional]
size=1
stride=1
pad=1
filters=21
activation=linear

[yolo]
mask=3,4,5
anchors=10,13, 16,30, 33,23, 30,61, 62,45, 59,119
classes=2
num=6
"""

LANE = 128


def _ceil_mult(v, m):
    return ((v + m - 1) // m) * m


def parse_cfg_string(cfg_str):
    lines = [l.strip() for l in cfg_str.split("\n")]
    lines = [l for l in lines if len(l) > 0 and l[0] != "#"]
    block, blocks = {}, []
    for line in lines:
        if line[0] == "[":
            if block:
                blocks.append(block)
                block = {}
            block["type"] = line[1:-1].rstrip()
        else:
            key, value = line.split("=")
            block[key.rstrip()] = value.lstrip()
    blocks.append(block)
    return blocks


# ----------------------------------------------------------------------------
# Pallas kernels
# ----------------------------------------------------------------------------
def _yolo_epilogue(p, add, mul, wh):
    # YOLO head on a lane-dense (M, 128) tile:
    #   xy  -> (sigmoid + grid_offset) * stride
    #   wh  -> exp * anchor
    #   obj/cls -> sigmoid
    # Encoded as (select(exp, sigmoid) + add) * mul with precomputed tables.
    is_wh = (wh * jnp.ones_like(p)) > 0.5
    # Only exponentiate the selected (w, h) lanes; clamp others to 0 to avoid
    # overflow on large obj/cls logits.
    base = jnp.where(is_wh, jnp.exp(jnp.where(is_wh, p, 0.0)), jax.nn.sigmoid(p))
    return (base + add) * mul


def _conv_bn_leaky_kernel(a_ref, b_ref, g_ref, bt_ref, o_ref, *, leaky, eps):
    # [M, Kp](bf16) @ [Kp, Np](bf16) on the MXU -> f32 accumulator, then fused
    # training-mode BatchNorm (batch statistics over the M = N*Ho*Wo rows) and
    # optional LeakyReLU(0.1), all in f32 on the VPU.  M holds only real rows
    # (no padding), so the statistics are exact.  Padded output lanes stay zero.
    acc = jnp.dot(a_ref[...], b_ref[...], preferred_element_type=jnp.float32)
    mean = jnp.mean(acc, axis=0, keepdims=True)
    var = jnp.mean(jnp.square(acc - mean), axis=0, keepdims=True)
    y = (acc - mean) * jax.lax.rsqrt(var + eps) * g_ref[...] + bt_ref[...]
    if leaky:
        y = jnp.where(y > 0, y, 0.1 * y)
    o_ref[...] = y


def _conv_bias_kernel(a_ref, b_ref, bias_ref, o_ref, *, leaky):
    # bf16 MXU matmul + fused bias (+ optional LeakyReLU) epilogue in f32.
    acc = jnp.dot(a_ref[...], b_ref[...], preferred_element_type=jnp.float32)
    y = acc + bias_ref[...]
    if leaky:
        y = jnp.where(y > 0, y, 0.1 * y)
    o_ref[...] = y


def _conv_bias_yolo_kernel(a_ref, b_ref, bias_ref, add_ref, mul_ref, wh_ref,
                           o_ref, *, leaky):
    # Detection-head conv + YOLO transform fused in one kernel: the (M, 128)
    # f32 logits never leave VMEM between the matmul and the head transform.
    acc = jnp.dot(a_ref[...], b_ref[...], preferred_element_type=jnp.float32)
    y = acc + bias_ref[...]
    if leaky:
        y = jnp.where(y > 0, y, 0.1 * y)
    o_ref[...] = _yolo_epilogue(y, add_ref[...], mul_ref[...], wh_ref[...])


def _add_kernel(a_ref, b_ref, o_ref):
    o_ref[...] = a_ref[...] + b_ref[...]


def _yolo_kernel(p_ref, add_ref, mul_ref, wh_ref, o_ref):
    o_ref[...] = _yolo_epilogue(p_ref[...], add_ref[...], mul_ref[...], wh_ref[...])


# ----------------------------------------------------------------------------
# Layer wrappers
# ----------------------------------------------------------------------------
def _im2col(x_nhwc, p):
    """NHWC im2col in bf16, K padded to the lane-aligned Kp."""
    N, H, W, C = x_nhwc.shape
    k, s, pad = p["size"], p["stride"], p["pad"]
    Ho = (H + 2 * pad - k) // s + 1
    Wo = (W + 2 * pad - k) // s + 1
    K = k * k * C
    M = N * Ho * Wo

    xb = x_nhwc.astype(jnp.bfloat16)                     # bf16 operands for the MXU
    if pad:
        xb = jnp.pad(xb, ((0, 0), (pad, pad), (pad, pad), (0, 0)))
    cols = [xb[:, kh:kh + s * (Ho - 1) + 1:s, kw:kw + s * (Wo - 1) + 1:s, :]
            for kh in range(k) for kw in range(k)]
    A = jnp.stack(cols, axis=3).reshape(M, K)            # (M, k*k*Cin), NHWC tap order
    Kp = p["Kp"]
    if Kp > K:
        A = jnp.pad(A, ((0, 0), (0, Kp - K)))            # align K to 128 (tiny, bf16)
    return A, N, Ho, Wo, M


def conv_forward(x_nhwc, p):
    """NHWC conv as one fused Pallas kernel (bf16 im2col matmul + BN/bias/leaky).

    Returns (x_nhwc_out, padded_2d) where padded_2d is the lane-padded
    (M = N*Ho*Wo, Np = ceil128(Cout)) f32 matmul output (reused by YOLO heads).
    """
    A, N, Ho, Wo, M = _im2col(x_nhwc, p)
    Kp, Np, Cout = p["Kp"], p["Np"], p["filters"]

    cost = pl.CostEstimate(flops=2 * M * Kp * Np, transcendentals=0,
                           bytes_accessed=M * Kp * 2 + Kp * Np * 2 + M * Np * 4)

    if p["bn"]:
        out = pl.pallas_call(
            functools.partial(_conv_bn_leaky_kernel, leaky=p["leaky"], eps=1e-5),
            out_shape=jax.ShapeDtypeStruct((M, Np), jnp.float32),
            cost_estimate=cost,
        )(A, p["B"], p["gamma"], p["beta"])
    else:
        out = pl.pallas_call(
            functools.partial(_conv_bias_kernel, leaky=p["leaky"]),
            out_shape=jax.ShapeDtypeStruct((M, Np), jnp.float32),
            cost_estimate=cost,
        )(A, p["B"], p["bias"])

    x_out = out[:, :Cout].reshape(N, Ho, Wo, Cout)
    return x_out, out


def _yolo_tables(batch, grid, Np, stride, anchors, bbox):
    """Precomputed (add, mul, wh-mask) tables for the lane-dense YOLO epilogue."""
    na = len(anchors)
    gx = np.tile(np.arange(grid, dtype=np.float32), grid)      # cell x (fast axis)
    gy = np.repeat(np.arange(grid, dtype=np.float32), grid)    # cell y (slow axis)
    add_cell = np.zeros((grid * grid, Np), np.float32)
    mul_row = np.zeros((1, Np), np.float32)
    wh_row = np.zeros((1, Np), np.float32)
    for a in range(na):
        base = a * bbox
        add_cell[:, base + 0] = gx
        add_cell[:, base + 1] = gy
        mul_row[0, base + 0] = float(stride)
        mul_row[0, base + 1] = float(stride)
        mul_row[0, base + 2] = float(anchors[a][0])   # (anchor/stride) * stride
        mul_row[0, base + 3] = float(anchors[a][1])
        mul_row[0, base + 4:base + bbox] = 1.0
        wh_row[0, base + 2] = 1.0
        wh_row[0, base + 3] = 1.0
    add = jnp.asarray(np.tile(add_cell, (batch, 1)))
    return add, jnp.asarray(mul_row), jnp.asarray(wh_row)


def conv_yolo_forward(x_nhwc, p, anchors, num_classes, inp_dim):
    """Fused detection-head conv + YOLO transform (single Pallas kernel).

    Returns detections of shape (batch, grid*grid*na, 5 + num_classes).
    """
    A, N, Ho, Wo, M = _im2col(x_nhwc, p)
    Kp, Np = p["Kp"], p["Np"]
    grid = Ho                                   # square feature map (Ho == Wo)
    stride = inp_dim // grid
    na = len(anchors)
    bbox = 5 + num_classes
    add, mul, wh = _yolo_tables(N, grid, Np, stride, anchors, bbox)

    cost = pl.CostEstimate(
        flops=2 * M * Kp * Np, transcendentals=M * Np,
        bytes_accessed=M * Kp * 2 + Kp * Np * 2 + M * Np * 4 * 2)

    out = pl.pallas_call(
        functools.partial(_conv_bias_yolo_kernel, leaky=p["leaky"]),
        out_shape=jax.ShapeDtypeStruct((M, Np), jnp.float32),
        cost_estimate=cost,
    )(A, p["B"], p["bias"], add, mul, wh)
    return out[:, :na * bbox].reshape(N, grid * grid * na, bbox)


def shortcut_add(a, b):
    """Residual add on a lane-dense (rows, 128) flattened view."""
    shape = a.shape
    total = int(np.prod(shape))
    if total % LANE == 0:
        rows = total // LANE
        out = pl.pallas_call(
            _add_kernel, out_shape=jax.ShapeDtypeStruct((rows, LANE), a.dtype)
        )(a.reshape(rows, LANE), b.reshape(rows, LANE))
        return out.reshape(shape)
    return pl.pallas_call(
        _add_kernel, out_shape=jax.ShapeDtypeStruct(shape, a.dtype)
    )(a, b)


def predict_transform(p2d, batch, grid, Np, inp_dim, anchors, num_classes):
    """YOLO transform on a lane-padded conv output (non-fused fallback path).

    p2d: (batch*grid*grid, Np) f32; rows ordered (batch, gy, gx) and the first
    na*bbox lanes hold the conv channels in (anchor, attr) order.
    Returns detections of shape (batch, grid*grid*na, bbox).
    """
    stride = inp_dim // grid
    na = len(anchors)
    bbox = 5 + num_classes
    M = batch * grid * grid
    add, mul, wh = _yolo_tables(batch, grid, Np, stride, anchors, bbox)

    out = pl.pallas_call(
        _yolo_kernel, out_shape=jax.ShapeDtypeStruct((M, Np), jnp.float32)
    )(p2d, add, mul, wh)
    return out[:, :na * bbox].reshape(batch, grid * grid * na, bbox)


def _interp_matrix(out_size, in_size):
    Wm = np.zeros((out_size, in_size), np.float32)
    if in_size == 1 or out_size == 1:
        Wm[:, 0] = 1.0
        return Wm
    pos = np.arange(out_size, dtype=np.float64) * (in_size - 1) / (out_size - 1)
    lo = np.floor(pos).astype(np.int64)
    hi = np.minimum(lo + 1, in_size - 1)
    frac = (pos - lo).astype(np.float32)
    Wm[np.arange(out_size), lo] += 1.0 - frac
    Wm[np.arange(out_size), hi] += frac
    return Wm


def upsample_bilinear_nhwc(x, scale):
    # nn.UpsamplingBilinear2d(scale_factor) == align_corners=True bilinear,
    # expressed as two tiny dense interpolation matmuls (no fancy-index gathers).
    # TODO(synk): kept in plain JAX; not a Pallas hot path at these sizes.
    N, H, W, C = x.shape
    Wy = jnp.asarray(_interp_matrix(H * scale, H))
    Wx = jnp.asarray(_interp_matrix(W * scale, W))
    x = jnp.einsum("oh,nhwc->nowc", Wy, x)
    x = jnp.einsum("pw,nowc->nopc", Wx, x)
    return x


# ----------------------------------------------------------------------------
# Darknet (params + forward mirroring the PyTorch module)
# ----------------------------------------------------------------------------
def create_params(blocks, key):
    net_info = blocks[0]
    prev_filters = int(net_info.get("channels", 3))
    filters = prev_filters
    output_filters = []
    params = []
    cnt = 0

    def nkey():
        nonlocal cnt
        cnt += 1
        return jax.random.fold_in(key, cnt)

    for index, blk in enumerate(blocks[1:]):
        p = {"type": blk["type"]}
        if blk["type"] == "convolutional":
            bn = int(blk.get("batch_normalize", 0))
            filters = int(blk["filters"])
            ksize = int(blk["size"])
            stride = int(blk["stride"])
            pad = (ksize - 1) // 2 if int(blk["pad"]) else 0
            w = 0.1 * jax.random.normal(
                nkey(), (filters, prev_filters, ksize, ksize), jnp.float32)
            K = ksize * ksize * prev_filters
            Kp = _ceil_mult(K, LANE)
            Np = _ceil_mult(filters, LANE)
            # (Cout, Cin, k, k) -> (k, k, Cin, Cout) -> (K, Cout), zero-padded to
            # (Kp, Np), stored in bf16 for the MXU.
            Bm = jnp.transpose(w, (2, 3, 1, 0)).reshape(K, filters)
            p["B"] = jnp.pad(Bm, ((0, Kp - K), (0, Np - filters))).astype(jnp.bfloat16)
            if bn:
                gamma = 1.0 + 0.05 * jax.random.normal(nkey(), (filters,), jnp.float32)
                beta = 0.05 * jax.random.normal(nkey(), (filters,), jnp.float32)
                p["gamma"] = jnp.pad(gamma, (0, Np - filters),
                                     constant_values=1.0).reshape(1, Np)
                p["beta"] = jnp.pad(beta, (0, Np - filters)).reshape(1, Np)
            else:
                bias = 0.1 * jax.random.normal(nkey(), (filters,), jnp.float32)
                p["bias"] = jnp.pad(bias, (0, Np - filters)).reshape(1, Np)
            p.update(filters=filters, size=ksize, stride=stride, pad=pad,
                     bn=bool(bn), leaky=(blk["activation"] == "leaky"),
                     Kp=Kp, Np=Np)
        elif blk["type"] == "route":
            layers = [int(a) for a in blk["layers"].split(",")]
            start = layers[0]
            end = layers[1] if len(layers) > 1 else 0
            if start > 0:
                start -= index
            if end > 0:
                end -= index
            if end < 0:
                filters = output_filters[index + start] + output_filters[index + end]
            else:
                filters = output_filters[index + start]
            p["layers"] = layers
        elif blk["type"] == "yolo":
            mask = [int(m) for m in blk["mask"].split(",")]
            anch = [int(a) for a in blk["anchors"].split(",")]
            anch = [(anch[j], anch[j + 1]) for j in range(0, len(anch), 2)]
            p["anchors"] = [anch[m] for m in mask]
        # shortcut / upsample: no params; channel count unchanged
        params.append(p)
        prev_filters = filters
        output_filters.append(filters)
    return params


def _compute_consumed(modules):
    """Static set of layer indices whose outputs are read by route/shortcut."""
    consumed = set()
    for i, m in enumerate(modules):
        if m["type"] == "route":
            layers = [int(a) for a in m["layers"].split(",")]
            if layers[0] > 0:
                layers[0] -= i
            consumed.add(i + layers[0])
            if len(layers) > 1:
                if layers[1] > 0:
                    layers[1] -= i
                consumed.add(i + layers[1])
        elif m["type"] == "shortcut":
            consumed.add(i - 1)
            consumed.add(i + int(m["from"]))
    return consumed


class DarknetPallas:
    def __init__(self, cfg_str, key):
        self.blocks = parse_cfg_string(cfg_str)
        self.net_info = self.blocks[0]
        self.params = create_params(self.blocks, key)
        self.consumed = _compute_consumed(self.blocks[1:])

    def forward(self, x_nchw):
        # Public interface is NCHW like PyTorch; internally everything is NHWC
        # (channels in the lane dimension).
        x = jnp.transpose(x_nchw.astype(jnp.float32), (0, 2, 3, 1))
        modules = self.blocks[1:]
        outputs = {}
        write = 0
        detections = None
        conv_padded = None   # lane-padded (M, Np) output of the most recent conv
        pending_det = None   # detections produced by a fused conv+yolo kernel
        for i, module in enumerate(modules):
            mtype = module["type"]
            if mtype == "convolutional":
                p = self.params[i]
                fuse_yolo = (i + 1 < len(modules)
                             and modules[i + 1]["type"] == "yolo"
                             and not p["bn"]
                             and i not in self.consumed)
                if fuse_yolo:
                    # Detection head: the conv output is only consumed by the
                    # following [yolo] block, so fuse conv + YOLO transform into
                    # one kernel and never materialize the logits in HBM.
                    pending_det = conv_yolo_forward(
                        x, p, self.params[i + 1]["anchors"],
                        int(modules[i + 1]["classes"]),
                        int(self.net_info["height"]))
                    x = None
                    conv_padded = None
                else:
                    pending_det = None
                    x, conv_padded = conv_forward(x, p)
            elif mtype == "upsample":
                x = upsample_bilinear_nhwc(x, int(module["stride"]))
            elif mtype == "route":
                layers = list(self.params[i]["layers"])
                if layers[0] > 0:
                    layers[0] -= i
                if len(layers) == 1:
                    x = outputs[i + layers[0]]
                else:
                    if layers[1] > 0:
                        layers[1] -= i
                    x = jnp.concatenate(
                        (outputs[i + layers[0]], outputs[i + layers[1]]), axis=-1)
            elif mtype == "shortcut":
                from_ = int(module["from"])
                x = shortcut_add(outputs[i - 1], outputs[i + from_])
            elif mtype == "yolo":
                if pending_det is not None:
                    x = pending_det          # fused conv+yolo already produced it
                    pending_det = None
                else:
                    anchors = self.params[i]["anchors"]
                    inp_dim = int(self.net_info["height"])
                    num_classes = int(module["classes"])
                    batch, grid = x.shape[0], x.shape[1]
                    na, bbox = len(anchors), 5 + num_classes
                    if modules[i - 1]["type"] == "convolutional" and conv_padded is not None:
                        p2d, Np = conv_padded, conv_padded.shape[1]
                    else:
                        Np = _ceil_mult(na * bbox, LANE)
                        p2d = jnp.pad(x.reshape(batch * grid * grid, na * bbox),
                                      ((0, 0), (0, Np - na * bbox)))
                    x = predict_transform(p2d, batch, grid, Np, inp_dim, anchors,
                                          num_classes)
                if not write:
                    detections = x
                    write = 1
                else:
                    detections = jnp.concatenate((detections, x), axis=1)
            outputs[i] = x
        return detections


# ----------------------------------------------------------------------------
if __name__ == "__main__":
    key = jax.random.PRNGKey(0)
    net = DarknetPallas(CFG, key)
    x = jax.random.normal(jax.random.fold_in(key, 12345), (2, 3, 16, 16),
                          dtype=jnp.float32)

    fwd = jax.jit(net.forward)
    detections = jax.block_until_ready(fwd(x))

    # two yolo heads: 4*4*3 + 8*8*3 = 240 boxes, 5 + 2 classes = 7 attrs
    assert detections.shape == (2, 240, 7), detections.shape
    assert bool(jnp.all(jnp.isfinite(detections)))
    print("KERNEL_OK")
</pallas_src>

<mosaic_0001>
module attributes {stable_mosaic.version = 11 : i64} {
  func.func @_conv_bn_leaky_kernel(%arg0: memref<512x128xbf16, #tpu.memory_space<vmem>>, %arg1: memref<128x128xbf16, #tpu.memory_space<vmem>>, %arg2: memref<1x128xf32, #tpu.memory_space<vmem>>, %arg3: memref<1x128xf32, #tpu.memory_space<vmem>>, %arg4: memref<512x128xf32, #tpu.memory_space<vmem>>) attributes {dimension_semantics = [], scalar_prefetch = 0 : i64, scratch_operands = 0 : i64, tpu.core_type = #tpu.core_type<tc>} {
    %c0 = arith.constant 0 : index
    %c0_0 = arith.constant 0 : index
    %0 = vector.load %arg0[%c0, %c0_0] : memref<512x128xbf16, #tpu.memory_space<vmem>>, vector<512x128xbf16>
    %c0_1 = arith.constant 0 : index
    %c0_2 = arith.constant 0 : index
    %1 = vector.load %arg1[%c0_1, %c0_2] : memref<128x128xbf16, #tpu.memory_space<vmem>>, vector<128x128xbf16>
    %cst = arith.constant dense<0.000000e+00> : vector<512x128xf32>
    %2 = tpu.matmul %0, %1, %cst {dimension_numbers = #tpu.dot_dimension_numbers<[1], [0], [0], [1], [0, 0, 1, 1], [], []>} : vector<512x128xbf16>, vector<128x128xbf16>, vector<512x128xf32> -> vector<512x128xf32>
    %cst_3 = arith.constant dense<0.000000e+00> : vector<128xf32>
    %3 = vector.multi_reduction <add>, %2, %cst_3 [0] : vector<512x128xf32> to vector<128xf32>
    %4 = vector.shape_cast %3 : vector<128xf32> to vector<1x128xf32>
    %cst_4 = arith.constant 5.120000e+02 : f32
    %5 = vector.broadcast %cst_4 : f32 to vector<1x128xf32>
    %6 = arith.divf %4, %5 : vector<1x128xf32>
    %7 = vector.broadcast %6 : vector<1x128xf32> to vector<512x128xf32>
    %8 = arith.subf %2, %7 : vector<512x128xf32>
    %9 = arith.mulf %8, %8 : vector<512x128xf32>
    %cst_5 = arith.constant dense<0.000000e+00> : vector<128xf32>
    %10 = vector.multi_reduction <add>, %9, %cst_5 [0] : vector<512x128xf32> to vector<128xf32>
    %11 = vector.shape_cast %10 : vector<128xf32> to vector<1x128xf32>
    %cst_6 = arith.constant 5.120000e+02 : f32
    %12 = vector.broadcast %cst_6 : f32 to vector<1x128xf32>
    %13 = arith.divf %11, %12 : vector<1x128xf32>
    %14 = vector.broadcast %6 : vector<1x128xf32> to vector<512x128xf32>
    %15 = arith.subf %2, %14 : vector<512x128xf32>
    %cst_7 = arith.constant 9.99999974E-6 : f32
    %16 = vector.broadcast %cst_7 : f32 to vector<1x128xf32>
    %17 = arith.addf %13, %16 : vector<1x128xf32>
    %18 = math.rsqrt %17 : vector<1x128xf32>
    %19 = vector.broadcast %18 : vector<1x128xf32> to vector<512x128xf32>
    %20 = arith.mulf %15, %19 : vector<512x128xf32>
    %c0_8 = arith.constant 0 : index
    %c0_9 = arith.constant 0 : index
    %21 = vector.load %arg2[%c0_8, %c0_9] : memref<1x128xf32, #tpu.memory_space<vmem>>, vector<1x128xf32>
    %22 = vector.broadcast %21 : vector<1x128xf32> to vector<512x128xf32>
    %23 = arith.mulf %20, %22 : vector<512x128xf32>
    %c0_10 = arith.constant 0 : index
    %c0_11 = arith.constant 0 : index
    %24 = vector.load %arg3[%c0_10, %c0_11] : memref<1x128xf32, #tpu.memory_space<vmem>>, vector<1x128xf32>
    %25 = vector.broadcast %24 : vector<1x128xf32> to vector<512x128xf32>
    %26 = arith.addf %23, %25 : vector<512x128xf32>
    %cst_12 = arith.constant 0.000000e+00 : f32
    %27 = vector.broadcast %cst_12 : f32 to vector<512x128xf32>
    %28 = arith.cmpf ogt, %26, %27 : vector<512x128xf32>
    %cst_13 = arith.constant 1.000000e-01 : f32
    %29 = vector.broadcast %cst_13 : f32 to vector<512x128xf32>
    %30 = arith.mulf %29, %26 : vector<512x128xf32>
    %31 = arith.select %28, %26, %30 : vector<512x128xi1>, vector<512x128xf32>
    %c0_14 = arith.constant 0 : index
    %c0_15 = arith.constant 0 : index
    %32 = vector.load %arg4[%c0_14, %c0_15] : memref<512x128xf32, #tpu.memory_space<vmem>>, vector<512x128xf32>
    tpu.vector_store %arg4[%c0_14, %c0_15], %31 {strides = array<i32>} : memref<512x128xf32, #tpu.memory_space<vmem>>, vector<512x128xf32>,
    return
  }
}

module attributes {stable_mosaic.version = 11 : i64} {
  func.func @_conv_bn_leaky_kernel(%arg0: memref<128x128xbf16, #tpu.memory_space<vmem>>, %arg1: memref<128x128xbf16, #tpu.memory_space<vmem>>, %arg2: memref<1x128xf32, #tpu.memory_space<vmem>>, %arg3: memref<1x128xf32, #tpu.memory_space<vmem>>, %arg4: memref<128x128xf32, #tpu.memory_space<vmem>>) attributes {dimension_semantics = [], scalar_prefetch = 0 : i64, scratch_operands = 0 : i64, tpu.core_type = #tpu.core_type<tc>} {
    %c0 = arith.constant 0 : index
    %c0_0 = arith.constant 0 : index
    %0 = vector.load %arg0[%c0, %c0_0] : memref<128x128xbf16, #tpu.memory_space<vmem>>, vector<128x128xbf16>
    %c0_1 = arith.constant 0 : index
    %c0_2 = arith.constant 0 : index
    %1 = vector.load %arg1[%c0_1, %c0_2] : memref<128x128xbf16, #tpu.memory_space<vmem>>, vector<128x128xbf16>
    %cst = arith.constant dense<0.000000e+00> : vector<128x128xf32>
    %2 = tpu.matmul %0, %1, %cst {dimension_numbers = #tpu.dot_dimension_numbers<[1], [0], [0], [1], [0, 0, 1, 1], [], []>} : vector<128x128xbf16>, vector<128x128xbf16>, vector<128x128xf32> -> vector<128x128xf32>
    %cst_3 = arith.constant dense<0.000000e+00> : vector<128xf32>
    %3 = vector.multi_reduction <add>, %2, %cst_3 [0] : vector<128x128xf32> to vector<128xf32>
    %4 = vector.shape_cast %3 : vector<128xf32> to vector<1x128xf32>
    %cst_4 = arith.constant 1.280000e+02 : f32
    %5 = vector.broadcast %cst_4 : f32 to vector<1x128xf32>
    %6 = arith.divf %4, %5 : vector<1x128xf32>
    %7 = vector.broadcast %6 : vector<1x128xf32> to vector<128x128xf32>
    %8 = arith.subf %2, %7 : vector<128x128xf32>
    %9 = arith.mulf %8, %8 : vector<128x128xf32>
    %cst_5 = arith.constant dense<0.000000e+00> : vector<128xf32>
    %10 = vector.multi_reduction <add>, %9, %cst_5 [0] : vector<128x128xf32> to vector<128xf32>
    %11 = vector.shape_cast %10 : vector<128xf32> to vector<1x128xf32>
    %cst_6 = arith.constant 1.280000e+02 : f32
    %12 = vector.broadcast %cst_6 : f32 to vector<1x128xf32>
    %13 = arith.divf %11, %12 : vector<1x128xf32>
    %14 = vector.broadcast %6 : vector<1x128xf32> to vector<128x128xf32>
    %15 = arith.subf %2, %14 : vector<128x128xf32>
    %cst_7 = arith.constant 9.99999974E-6 : f32
    %16 = vector.broadcast %cst_7 : f32 to vector<1x128xf32>
    %17 = arith.addf %13, %16 : vector<1x128xf32>
    %18 = math.rsqrt %17 : vector<1x128xf32>
    %19 = vector.broadcast %18 : vector<1x128xf32> to vector<128x128xf32>
    %20 = arith.mulf %15, %19 : vector<128x128xf32>
    %c0_8 = arith.constant 0 : index
    %c0_9 = arith.constant 0 : index
    %21 = vector.load %arg2[%c0_8, %c0_9] : memref<1x128xf32, #tpu.memory_space<vmem>>, vector<1x128xf32>
    %22 = vector.broadcast %21 : vector<1x128xf32> to vector<128x128xf32>
    %23 = arith.mulf %20, %22 : vector<128x128xf32>
    %c0_10 = arith.constant 0 : index
    %c0_11 = arith.constant 0 : index
    %24 = vector.load %arg3[%c0_10, %c0_11] : memref<1x128xf32, #tpu.memory_space<vmem>>, vector<1x128xf32>
    %25 = vector.broadcast %24 : vector<1x128xf32> to vector<128x128xf32>
    %26 = arith.addf %23, %25 : vector<128x128xf32>
    %cst_12 = arith.constant 0.000000e+00 : f32
    %27 = vector.broadcast %cst_12 : f32 to vector<128x128xf32>
    %28 = arith.cmpf ogt, %26, %27 : vector<128x128xf32>
    %cst_13 = arith.constant 1.000000e-01 : f32
    %29 = vector.broadcast %cst_13 : f32 to vector<128x128xf32>
    %30 = arith.mulf %29, %26 : vector<128x128xf32>
    %31 = arith.select %28, %26, %30 : vector<128x128xi1>, vector<128x128xf32>
    %c0_14 = arith.constant 0 : index
    %c0_15 = arith.constant 0 : index
    %32 = vector.load %arg4[%c0_14, %c0_15] : memref<128x128xf32, #tpu.memory_space<vmem>>, vector<128x128xf32>
    tpu.vector_store %arg4[%c0_14, %c0_15], %31 {strides = array<i32>} : memref<128x128xf32, #tpu.memory_space<vmem>>, vector<128x128xf32>,
    return
  }
}

module attributes {stable_mosaic.version = 11 : i64} {
  func.func @_add_kernel(%arg0: memref<16x128xf32, #tpu.memory_space<vmem>>, %arg1: memref<16x128xf32, #tpu.memory_space<vmem>>, %arg2: memref<16x128xf32, #tpu.memory_space<vmem>>) attributes {dimension_semantics = [], scalar_prefetch = 0 : i64, scratch_operands = 0 : i64, tpu.core_type = #tpu.core_type<tc>} {
    %c0 = arith.constant 0 : index
    %c0_0 = arith.constant 0 : index
    %0 = vector.load %arg0[%c0, %c0_0] : memref<16x128xf32, #tpu.memory_space<vmem>>, vector<16x128xf32>
    %c0_1 = arith.constant 0 : index
    %c0_2 = arith.constant 0 : index
    %1 = vector.load %arg1[%c0_1, %c0_2] : memref<16x128xf32, #tpu.memory_space<vmem>>, vector<16x128xf32>
    %2 = arith.addf %0, %1 : vector<16x128xf32>
    %c0_3 = arith.constant 0 : index
    %c0_4 = arith.constant 0 : index
    %3 = vector.load %arg2[%c0_3, %c0_4] : memref<16x128xf32, #tpu.memory_space<vmem>>, vector<16x128xf32>
    tpu.vector_store %arg2[%c0_3, %c0_4], %2 {strides = array<i32>} : memref<16x128xf32, #tpu.memory_space<vmem>>, vector<16x128xf32>,
    return
  }
}

module attributes {stable_mosaic.version = 11 : i64} {
  func.func @_conv_bn_leaky_kernel(%arg0: memref<32x256xbf16, #tpu.memory_space<vmem>>, %arg1: memref<256x128xbf16, #tpu.memory_space<vmem>>, %arg2: memref<1x128xf32, #tpu.memory_space<vmem>>, %arg3: memref<1x128xf32, #tpu.memory_space<vmem>>, %arg4: memref<32x128xf32, #tpu.memory_space<vmem>>) attributes {dimension_semantics = [], scalar_prefetch = 0 : i64, scratch_operands = 0 : i64, tpu.core_type = #tpu.core_type<tc>} {
    %c0 = arith.constant 0 : index
    %c0_0 = arith.constant 0 : index
    %0 = vector.load %arg0[%c0, %c0_0] : memref<32x256xbf16, #tpu.memory_space<vmem>>, vector<32x256xbf16>
    %c0_1 = arith.constant 0 : index
    %c0_2 = arith.constant 0 : index
    %1 = vector.load %arg1[%c0_1, %c0_2] : memref<256x128xbf16, #tpu.memory_space<vmem>>, vector<256x128xbf16>
    %cst = arith.constant dense<0.000000e+00> : vector<32x128xf32>
    %2 = tpu.matmul %0, %1, %cst {dimension_numbers = #tpu.dot_dimension_numbers<[1], [0], [0], [1], [0, 0, 1, 1], [], []>} : vector<32x256xbf16>, vector<256x128xbf16>, vector<32x128xf32> -> vector<32x128xf32>
    %cst_3 = arith.constant dense<0.000000e+00> : vector<128xf32>
    %3 = vector.multi_reduction <add>, %2, %cst_3 [0] : vector<32x128xf32> to vector<128xf32>
    %4 = vector.shape_cast %3 : vector<128xf32> to vector<1x128xf32>
    %cst_4 = arith.constant 3.200000e+01 : f32
    %5 = vector.broadcast %cst_4 : f32 to vector<1x128xf32>
    %6 = arith.divf %4, %5 : vector<1x128xf32>
    %7 = vector.broadcast %6 : vector<1x128xf32> to vector<32x128xf32>
    %8 = arith.subf %2, %7 : vector<32x128xf32>
    %9 = arith.mulf %8, %8 : vector<32x128xf32>
    %cst_5 = arith.constant dense<0.000000e+00> : vector<128xf32>
    %10 = vector.multi_reduction <add>, %9, %cst_5 [0] : vector<32x128xf32> to vector<128xf32>
    %11 = vector.shape_cast %10 : vector<128xf32> to vector<1x128xf32>
    %cst_6 = arith.constant 3.200000e+01 : f32
    %12 = vector.broadcast %cst_6 : f32 to vector<1x128xf32>
    %13 = arith.divf %11, %12 : vector<1x128xf32>
    %14 = vector.broadcast %6 : vector<1x128xf32> to vector<32x128xf32>
    %15 = arith.subf %2, %14 : vector<32x128xf32>
    %cst_7 = arith.constant 9.99999974E-6 : f32
    %16 = vector.broadcast %cst_7 : f32 to vector<1x128xf32>
    %17 = arith.addf %13, %16 : vector<1x128xf32>
    %18 = math.rsqrt %17 : vector<1x128xf32>
    %19 = vector.broadcast %18 : vector<1x128xf32> to vector<32x128xf32>
    %20 = arith.mulf %15, %19 : vector<32x128xf32>
    %c0_8 = arith.constant 0 : index
    %c0_9 = arith.constant 0 : index
    %21 = vector.load %arg2[%c0_8, %c0_9] : memref<1x128xf32, #tpu.memory_space<vmem>>, vector<1x128xf32>
    %22 = vector.broadcast %21 : vector<1x128xf32> to vector<32x128xf32>
    %23 = arith.mulf %20, %22 : vector<32x128xf32>
    %c0_10 = arith.constant 0 : index
    %c0_11 = arith.constant 0 : index
    %24 = vector.load %arg3[%c0_10, %c0_11] : memref<1x128xf32, #tpu.memory_space<vmem>>, vector<1x128xf32>
    %25 = vector.broadcast %24 : vector<1x128xf32> to vector<32x128xf32>
    %26 = arith.addf %23, %25 : vector<32x128xf32>
    %cst_12 = arith.constant 0.000000e+00 : f32
    %27 = vector.broadcast %cst_12 : f32 to vector<32x128xf32>
    %28 = arith.cmpf ogt, %26, %27 : vector<32x128xf32>
    %cst_13 = arith.constant 1.000000e-01 : f32
    %29 = vector.broadcast %cst_13 : f32 to vector<32x128xf32>
    %30 = arith.mulf %29, %26 : vector<32x128xf32>
    %31 = arith.select %28, %26, %30 : vector<32x128xi1>, vector<32x128xf32>
    %c0_14 = arith.constant 0 : index
    %c0_15 = arith.constant 0 : index
    %32 = vector.load %arg4[%c0_14, %c0_15] : memref<32x128xf32, #tpu.memory_space<vmem>>, vector<32x128xf32>
    tpu.vector_store %arg4[%c0_14, %c0_15], %31 {strides = array<i32>} : memref<32x128xf32, #tpu.memory_space<vmem>>, vector<32x128xf32>,
    return
  }
}

module attributes {stable_mosaic.version = 11 : i64} {
  func.func @_conv_bn_leaky_kernel(%arg0: memref<32x128xbf16, #tpu.memory_space<vmem>>, %arg1: memref<128x128xbf16, #tpu.memory_space<vmem>>, %arg2: memref<1x128xf32, #tpu.memory_space<vmem>>, %arg3: memref<1x128xf32, #tpu.memory_space<vmem>>, %arg4: memref<32x128xf32, #tpu.memory_space<vmem>>) attributes {dimension_semantics = [], scalar_prefetch = 0 : i64, scratch_operands = 0 : i64, tpu.core_type = #tpu.core_type<tc>} {
    %c0 = arith.constant 0 : index
    %c0_0 = arith.constant 0 : index
    %0 = vector.load %arg0[%c0, %c0_0] : memref<32x128xbf16, #tpu.memory_space<vmem>>, vector<32x128xbf16>
    %c0_1 = arith.constant 0 : index
    %c0_2 = arith.constant 0 : index
    %1 = vector.load %arg1[%c0_1, %c0_2] : memref<128x128xbf16, #tpu.memory_space<vmem>>, vector<128x128xbf16>
    %cst = arith.constant dense<0.000000e+00> : vector<32x128xf32>
    %2 = tpu.matmul %0, %1, %cst {dimension_numbers = #tpu.dot_dimension_numbers<[1], [0], [0], [1], [0, 0, 1, 1], [], []>} : vector<32x128xbf16>, vector<128x128xbf16>, vector<32x128xf32> -> vector<32x128xf32>
    %cst_3 = arith.constant dense<0.000000e+00> : vector<128xf32>
    %3 = vector.multi_reduction <add>, %2, %cst_3 [0] : vector<32x128xf32> to vector<128xf32>
    %4 = vector.shape_cast %3 : vector<128xf32> to vector<1x128xf32>
    %cst_4 = arith.constant 3.200000e+01 : f32
    %5 = vector.broadcast %cst_4 : f32 to vector<1x128xf32>
    %6 = arith.divf %4, %5 : vector<1x128xf32>
    %7 = vector.broadcast %6 : vector<1x128xf32> to vector<32x128xf32>
    %8 = arith.subf %2, %7 : vector<32x128xf32>
    %9 = arith.mulf %8, %8 : vector<32x128xf32>
    %cst_5 = arith.constant dense<0.000000e+00> : vector<128xf32>
    %10 = vector.multi_reduction <add>, %9, %cst_5 [0] : vector<32x128xf32> to vector<128xf32>
    %11 = vector.shape_cast %10 : vector<128xf32> to vector<1x128xf32>
    %cst_6 = arith.constant 3.200000e+01 : f32
    %12 = vector.broadcast %cst_6 : f32 to vector<1x128xf32>
    %13 = arith.divf %11, %12 : vector<1x128xf32>
    %14 = vector.broadcast %6 : vector<1x128xf32> to vector<32x128xf32>
    %15 = arith.subf %2, %14 : vector<32x128xf32>
    %cst_7 = arith.constant 9.99999974E-6 : f32
    %16 = vector.broadcast %cst_7 : f32 to vector<1x128xf32>
    %17 = arith.addf %13, %16 : vector<1x128xf32>
    %18 = math.rsqrt %17 : vector<1x128xf32>
    %19 = vector.broadcast %18 : vector<1x128xf32> to vector<32x128xf32>
    %20 = arith.mulf %15, %19 : vector<32x128xf32>
    %c0_8 = arith.constant 0 : index
    %c0_9 = arith.constant 0 : index
    %21 = vector.load %arg2[%c0_8, %c0_9] : memref<1x128xf32, #tpu.memory_space<vmem>>, vector<1x128xf32>
    %22 = vector.broadcast %21 : vector<1x128xf32> to vector<32x128xf32>
    %23 = arith.mulf %20, %22 : vector<32x128xf32>
    %c0_10 = arith.constant 0 : index
    %c0_11 = arith.constant 0 : index
    %24 = vector.load %arg3[%c0_10, %c0_11] : memref<1x128xf32, #tpu.memory_space<vmem>>, vector<1x128xf32>
    %25 = vector.broadcast %24 : vector<1x128xf32> to vector<32x128xf32>
    %26 = arith.addf %23, %25 : vector<32x128xf32>
    %cst_12 = arith.constant 0.000000e+00 : f32
    %27 = vector.broadcast %cst_12 : f32 to vector<32x128xf32>
    %28 = arith.cmpf ogt, %26, %27 : vector<32x128xf32>
    %cst_13 = arith.constant 1.000000e-01 : f32
    %29 = vector.broadcast %cst_13 : f32 to vector<32x128xf32>
    %30 = arith.mulf %29, %26 : vector<32x128xf32>
    %31 = arith.select %28, %26, %30 : vector<32x128xi1>, vector<32x128xf32>
    %c0_14 = arith.constant 0 : index
    %c0_15 = arith.constant 0 : index
    %32 = vector.load %arg4[%c0_14, %c0_15] : memref<32x128xf32, #tpu.memory_space<vmem>>, vector<32x128xf32>
    tpu.vector_store %arg4[%c0_14, %c0_15], %31 {strides = array<i32>} : memref<32x128xf32, #tpu.memory_space<vmem>>, vector<32x128xf32>,
    return
  }
}

module attributes {stable_mosaic.version = 11 : i64} {
  func.func @_conv_bias_yolo_kernel(%arg0: memref<128x128xbf16, #tpu.memory_space<vmem>>, %arg1: memref<128x128xbf16, #tpu.memory_space<vmem>>, %arg2: memref<1x128xf32, #tpu.memory_space<vmem>>, %arg3: memref<128x128xf32, #tpu.memory_space<vmem>>, %arg4: memref<1x128xf32, #tpu.memory_space<vmem>>, %arg5: memref<1x128xf32, #tpu.memory_space<vmem>>, %arg6: memref<128x128xf32, #tpu.memory_space<vmem>>) attributes {dimension_semantics = [], scalar_prefetch = 0 : i64, scratch_operands = 0 : i64, tpu.core_type = #tpu.core_type<tc>} {
    %c0 = arith.constant 0 : index
    %c0_0 = arith.constant 0 : index
    %0 = vector.load %arg0[%c0, %c0_0] : memref<128x128xbf16, #tpu.memory_space<vmem>>, vector<128x128xbf16>
    %c0_1 = arith.constant 0 : index
    %c0_2 = arith.constant 0 : index
    %1 = vector.load %arg1[%c0_1, %c0_2] : memref<128x128xbf16, #tpu.memory_space<vmem>>, vector<128x128xbf16>
    %cst = arith.constant dense<0.000000e+00> : vector<128x128xf32>
    %2 = tpu.matmul %0, %1, %cst {dimension_numbers = #tpu.dot_dimension_numbers<[1], [0], [0], [1], [0, 0, 1, 1], [], []>} : vector<128x128xbf16>, vector<128x128xbf16>, vector<128x128xf32> -> vector<128x128xf32>
    %c0_3 = arith.constant 0 : index
    %c0_4 = arith.constant 0 : index
    %3 = vector.load %arg2[%c0_3, %c0_4] : memref<1x128xf32, #tpu.memory_space<vmem>>, vector<1x128xf32>
    %4 = vector.broadcast %3 : vector<1x128xf32> to vector<128x128xf32>
    %5 = arith.addf %2, %4 : vector<128x128xf32>
    %c0_5 = arith.constant 0 : index
    %c0_6 = arith.constant 0 : index
    %6 = vector.load %arg3[%c0_5, %c0_6] : memref<128x128xf32, #tpu.memory_space<vmem>>, vector<128x128xf32>
    %c0_7 = arith.constant 0 : index
    %c0_8 = arith.constant 0 : index
    %7 = vector.load %arg4[%c0_7, %c0_8] : memref<1x128xf32, #tpu.memory_space<vmem>>, vector<1x128xf32>
    %c0_9 = arith.constant 0 : index
    %c0_10 = arith.constant 0 : index
    %8 = vector.load %arg5[%c0_9, %c0_10] : memref<1x128xf32, #tpu.memory_space<vmem>>, vector<1x128xf32>
    %cst_11 = arith.constant 1.000000e+00 : f32
    %9 = vector.broadcast %cst_11 : f32 to vector<128x128xf32>
    %10 = vector.broadcast %8 : vector<1x128xf32> to vector<128x128xf32>
    %11 = arith.mulf %10, %9 : vector<128x128xf32>
    %cst_12 = arith.constant 5.000000e-01 : f32
    %12 = vector.broadcast %cst_12 : f32 to vector<128x128xf32>
    %13 = arith.cmpf ogt, %11, %12 : vector<128x128xf32>
    %cst_13 = arith.constant 0.000000e+00 : f32
    %14 = vector.broadcast %cst_13 : f32 to vector<128x128xf32>
    %15 = arith.select %13, %5, %14 : vector<128x128xi1>, vector<128x128xf32>
    %16 = math.exp %15 : vector<128x128xf32>
    %17 = arith.negf %5 : vector<128x128xf32>
    %18 = math.exp %17 : vector<128x128xf32>
    %cst_14 = arith.constant 1.000000e+00 : f32
    %19 = vector.broadcast %cst_14 : f32 to vector<128x128xf32>
    %20 = arith.addf %19, %18 : vector<128x128xf32>
    %21 = arith.divf %19, %20 : vector<128x128xf32>
    %22 = arith.select %13, %16, %21 : vector<128x128xi1>, vector<128x128xf32>
    %23 = arith.addf %22, %6 : vector<128x128xf32>
    %24 = vector.broadcast %7 : vector<1x128xf32> to vector<128x128xf32>
    %25 = arith.mulf %23, %24 : vector<128x128xf32>
    %c0_15 = arith.constant 0 : index
    %c0_16 = arith.constant 0 : index
    %26 = vector.load %arg6[%c0_15, %c0_16] : memref<128x128xf32, #tpu.memory_space<vmem>>, vector<128x128xf32>
    tpu.vector_store %arg6[%c0_15, %c0_16], %25 {strides = array<i32>} : memref<128x128xf32, #tpu.memory_space<vmem>>, vector<128x128xf32>,
    return
  }
}

module attributes {stable_mosaic.version = 11 : i64} {
  func.func @_conv_bias_yolo_kernel(%arg0: memref<32x128xbf16, #tpu.memory_space<vmem>>, %arg1: memref<128x128xbf16, #tpu.memory_space<vmem>>, %arg2: memref<1x128xf32, #tpu.memory_space<vmem>>, %arg3: memref<32x128xf32, #tpu.memory_space<vmem>>, %arg4: memref<1x128xf32, #tpu.memory_space<vmem>>, %arg5: memref<1x128xf32, #tpu.memory_space<vmem>>, %arg6: memref<32x128xf32, #tpu.memory_space<vmem>>) attributes {dimension_semantics = [], scalar_prefetch = 0 : i64, scratch_operands = 0 : i64, tpu.core_type = #tpu.core_type<tc>} {
    %c0 = arith.constant 0 : index
    %c0_0 = arith.constant 0 : index
    %0 = vector.load %arg0[%c0, %c0_0] : memref<32x128xbf16, #tpu.memory_space<vmem>>, vector<32x128xbf16>
    %c0_1 = arith.constant 0 : index
    %c0_2 = arith.constant 0 : index
    %1 = vector.load %arg1[%c0_1, %c0_2] : memref<128x128xbf16, #tpu.memory_space<vmem>>, vector<128x128xbf16>
    %cst = arith.constant dense<0.000000e+00> : vector<32x128xf32>
    %2 = tpu.matmul %0, %1, %cst {dimension_numbers = #tpu.dot_dimension_numbers<[1], [0], [0], [1], [0, 0, 1, 1], [], []>} : vector<32x128xbf16>, vector<128x128xbf16>, vector<32x128xf32> -> vector<32x128xf32>
    %c0_3 = arith.constant 0 : index
    %c0_4 = arith.constant 0 : index
    %3 = vector.load %arg2[%c0_3, %c0_4] : memref<1x128xf32, #tpu.memory_space<vmem>>, vector<1x128xf32>
    %4 = vector.broadcast %3 : vector<1x128xf32> to vector<32x128xf32>
    %5 = arith.addf %2, %4 : vector<32x128xf32>
    %c0_5 = arith.constant 0 : index
    %c0_6 = arith.constant 0 : index
    %6 = vector.load %arg3[%c0_5, %c0_6] : memref<32x128xf32, #tpu.memory_space<vmem>>, vector<32x128xf32>
    %c0_7 = arith.constant 0 : index
    %c0_8 = arith.constant 0 : index
    %7 = vector.load %arg4[%c0_7, %c0_8] : memref<1x128xf32, #tpu.memory_space<vmem>>, vector<1x128xf32>
    %c0_9 = arith.constant 0 : index
    %c0_10 = arith.constant 0 : index
    %8 = vector.load %arg5[%c0_9, %c0_10] : memref<1x128xf32, #tpu.memory_space<vmem>>, vector<1x128xf32>
    %cst_11 = arith.constant 1.000000e+00 : f32
    %9 = vector.broadcast %cst_11 : f32 to vector<32x128xf32>
    %10 = vector.broadcast %8 : vector<1x128xf32> to vector<32x128xf32>
    %11 = arith.mulf %10, %9 : vector<32x128xf32>
    %cst_12 = arith.constant 5.000000e-01 : f32
    %12 = vector.broadcast %cst_12 : f32 to vector<32x128xf32>
    %13 = arith.cmpf ogt, %11, %12 : vector<32x128xf32>
    %cst_13 = arith.constant 0.000000e+00 : f32
    %14 = vector.broadcast %cst_13 : f32 to vector<32x128xf32>
    %15 = arith.select %13, %5, %14 : vector<32x128xi1>, vector<32x128xf32>
    %16 = math.exp %15 : vector<32x128xf32>
    %17 = arith.negf %5 : vector<32x128xf32>
    %18 = math.exp %17 : vector<32x128xf32>
    %cst_14 = arith.constant 1.000000e+00 : f32
    %19 = vector.broadcast %cst_14 : f32 to vector<32x128xf32>
    %20 = arith.addf %19, %18 : vector<32x128xf32>
    %21 = arith.divf %19, %20 : vector<32x128xf32>
    %22 = arith.select %13, %16, %21 : vector<32x128xi1>, vector<32x128xf32>
    %23 = arith.addf %22, %6 : vector<32x128xf32>
    %24 = vector.broadcast %7 : vector<1x128xf32> to vector<32x128xf32>
    %25 = arith.mulf %23, %24 : vector<32x128xf32>
    %c0_15 = arith.constant 0 : index
    %c0_16 = arith.constant 0 : index
    %26 = vector.load %arg6[%c0_15, %c0_16] : memref<32x128xf32, #tpu.memory_space<vmem>>, vector<32x128xf32>
    tpu.vector_store %arg6[%c0_15, %c0_16], %25 {strides = array<i32>} : memref<32x128xf32, #tpu.memory_space<vmem>>, vector<32x128xf32>,
    return
  }
}

</mosaic_0001>

<bundles_post_ra>
// kernel: forward.9
= control target key start
LH: loop header
LB: loop body
LE: loop exit
PB: predicated region body
PF: predicated region fallthrough
CT: control target
= control target key end

     0   :  { %s2840_s1 = inlined_call_operand.vmem [shape: bf16[128,128], index: 1, kind: input, shape index: {}]   ;;  %s2841_s0 = inlined_call_operand.vmem [shape: bf16[512,128], index: 0, kind: input, shape index: {}]   ;;  %s2842_s2 = inlined_call_operand.vmem [shape: f32[1,128], index: 2, kind: input, shape index: {}]   ;;  %s2843_s3 = inlined_call_operand.vmem [shape: f32[1,128], index: 3, kind: input, shape index: {}]   ;;  %s2844_s4 = inlined_call_operand.vmem [shape: f32[512,128], index: 4, kind: output, shape index: {}]  }
   0x1   :  { %v1451_v0 = vld [vmem:[%s2840_s1 + $0x38] sm:$0xff]  ;;  %v1450_v1 = vld [vmem:[%s2840_s1 + $0x30] sm:$0xff]  ;;  %v1449_v2 = vld [vmem:[%s2840_s1 + $0x28] sm:$0xff] }
   0x2   :  { %337 = vmatpush.bf16.msra.mxu0 %v1451_v0  ;;  %1452 = vmatpush.bf16.msra.mxu1 %v1451_v0  ;;  %v1448_v3 = vld [vmem:[%s2840_s1 + $0x20] sm:$0xff]  ;;  %v1447_v4 = vld [vmem:[%s2840_s1 + $0x18] sm:$0xff]  ;;  %v1446_v5 = vld [vmem:[%s2840_s1 + $0x10] sm:$0xff] }
   0x3   :  { %1453 = vmatpush.bf16.msra.mxu2 %v1451_v0  ;;  %1454 = vmatpush.bf16.msra.mxu3 %v1451_v0  ;;  %v1445_v6 = vld [vmem:[%s2840_s1 + $0x8] sm:$0xff]  ;;  %v1444_v7 = vld [vmem:[%s2840_s1] sm:$0xff]  ;;  %v1414_v13 = vld [vmem:[%s2841_s0 + $0x10] sm:$0xff] }
   0x4   :  { %v1412_v8 = vld [vmem:[%s2841_s0] sm:$0xff]  ;;  %v1413_v10 = vld [vmem:[%s2841_s0 + $0x8] sm:$0xff]  ;;  %v1422_v14 = vld [vmem:[%s2841_s0 + $0x50] sm:$0xff] }
   0x5   :  { %v1420_v9 = vld [vmem:[%s2841_s0 + $0x40] sm:$0xff]  ;;  %v1421_v11 = vld [vmem:[%s2841_s0 + $0x48] sm:$0xff]  ;;  %v1415_v16 = vld [vmem:[%s2841_s0 + $0x18] sm:$0xff] }
   0x6   :  { %338 = vmatpush.bf16.msra.mxu0 %v1450_v1  ;;  %1455 = vmatpush.bf16.msra.mxu1 %v1450_v1  ;;  %v1428_v12 = vld [vmem:[%s2841_s0 + $0x80] sm:$0xff]  ;;  %v1429_v15 = vld [vmem:[%s2841_s0 + $0x88] sm:$0xff]  ;;  %v1423_v17 = vld [vmem:[%s2841_s0 + $0x58] sm:$0xff] }
   0x7   :  { %1456 = vmatpush.bf16.msra.mxu2 %v1450_v1  ;;  %1457 = vmatpush.bf16.msra.mxu3 %v1450_v1  ;;  %v1430_v18 = vld [vmem:[%s2841_s0 + $0x90] sm:$0xff]  ;;  %v1436_v19 = vld [vmem:[%s2841_s0 + $0xc0] sm:$0xff]  ;;  %v1431_v22 = vld [vmem:[%s2841_s0 + $0x98] sm:$0xff] }
   0x8   :  { %v1416_v20 = vld [vmem:[%s2841_s0 + $0x20] sm:$0xff]  ;;  %v1437_v23 = vld [vmem:[%s2841_s0 + $0xc8] sm:$0xff]  ;;  %v1438_v27 = vld [vmem:[%s2841_s0 + $0xd0] sm:$0xff] }
   0x9   :  { %v1424_v21 = vld [vmem:[%s2841_s0 + $0x60] sm:$0xff]  ;;  %v1417_v24 = vld [vmem:[%s2841_s0 + $0x28] sm:$0xff]  ;;  %v1418_v28 = vld [vmem:[%s2841_s0 + $0x30] sm:$0xff] }
   0xa   :  { %339 = vmatpush.bf16.msra.mxu0 %v1449_v2  ;;  %1458 = vmatpush.bf16.msra.mxu1 %v1449_v2  ;;  %v1425_v25 = vld [vmem:[%s2841_s0 + $0x68] sm:$0xff]  ;;  %v1432_v26 = vld [vmem:[%s2841_s0 + $0xa0] sm:$0xff]  ;;  %v1426_v29 = vld [vmem:[%s2841_s0 + $0x70] sm:$0xff] }
   0xb   :  { %1459 = vmatpush.bf16.msra.mxu2 %v1449_v2  ;;  %1460 = vmatpush.bf16.msra.mxu3 %v1449_v2  ;;  %v1433_v30 = vld [vmem:[%s2841_s0 + $0xa8] sm:$0xff]  ;;  %v1439_v31 = vld [vmem:[%s2841_s0 + $0xd8] sm:$0xff]  ;;  %v1434_v34 = vld [vmem:[%s2841_s0 + $0xb0] sm:$0xff] }
   0xc   :  { %v1419_v32 = vld [vmem:[%s2841_s0 + $0x38] sm:$0xff]  ;;  %v1440_v35 = vld [vmem:[%s2841_s0 + $0xe0] sm:$0xff]  ;;  %v1441_v38 = vld [vmem:[%s2841_s0 + $0xe8] sm:$0xff] }
   0xd   :  { %v1427_v33 = vld [vmem:[%s2841_s0 + $0x78] sm:$0xff]  ;;  %v1442_v43 = vld [vmem:[%s2841_s0 + $0xf0] sm:$0xff] }
   0xe   :  { %340 = vmatpush.bf16.msra.mxu0 %v1448_v3  ;;  %1461 = vmatpush.bf16.msra.mxu1 %v1448_v3  ;;  %v1435_v37 = vld [vmem:[%s2841_s0 + $0xb8] sm:$0xff] }
   0xf   :  { %1462 = vmatpush.bf16.msra.mxu2 %v1448_v3  ;;  %1463 = vmatpush.bf16.msra.mxu3 %v1448_v3  ;;  %v1443_v48 = vld [vmem:[%s2841_s0 + $0xf8] sm:$0xff] }
  0x12   :  { %341 = vmatpush.bf16.msra.mxu0 %v1447_v4  ;;  %1464 = vmatpush.bf16.msra.mxu1 %v1447_v4 }
  0x13   :  { %1465 = vmatpush.bf16.msra.mxu2 %v1447_v4  ;;  %1466 = vmatpush.bf16.msra.mxu3 %v1447_v4 }
  0x16   :  { %342 = vmatpush.bf16.msra.mxu0 %v1446_v5  ;;  %1467 = vmatpush.bf16.msra.mxu1 %v1446_v5 }
  0x17   :  { %1468 = vmatpush.bf16.msra.mxu2 %v1446_v5  ;;  %1469 = vmatpush.bf16.msra.mxu3 %v1446_v5 }
  0x1a   :  { %343 = vmatpush.bf16.msra.mxu0 %v1445_v6  ;;  %1470 = vmatpush.bf16.msra.mxu1 %v1445_v6 }
  0x1b   :  { %1471 = vmatpush.bf16.msra.mxu2 %v1445_v6  ;;  %1472 = vmatpush.bf16.msra.mxu3 %v1445_v6 }
  0x1e   :  { %344 = vmatpush.bf16.msra.mxu0 %v1444_v7  ;;  %1473 = vmatpush.bf16.msra.mxu1 %v1444_v7 }
  0x1f   :  { %1474 = vmatpush.bf16.msra.mxu2 %v1444_v7  ;;  %1475 = vmatpush.bf16.msra.mxu3 %v1444_v7 }
  0x21   :  { %345 = vmatmul.bf16.vlgmr.msra.gmra.mxu0 %v1412_v8  ;;  %385 = vmatmul.bf16.vlgmr.msra.gmra.mxu1 %v1420_v9 }
  0x22   :  { %425 = vmatmul.bf16.vlgmr.msra.gmra.mxu2 %v1428_v12  ;;  %465 = vmatmul.bf16.vlgmr.msra.gmra.mxu3 %v1436_v19 }
  0x31   :  { %350 = vmatmul.bf16.gmra.mxu0 %v1413_v10  ;;  %390 = vmatmul.bf16.gmra.mxu1 %v1421_v11 }
  0x32   :  { %430 = vmatmul.bf16.gmra.mxu2 %v1429_v15  ;;  %470 = vmatmul.bf16.gmra.mxu3 %v1437_v23 }
  0x41   :  { %355 = vmatmul.bf16.gmra.mxu0 %v1414_v13  ;;  %395 = vmatmul.bf16.gmra.mxu1 %v1422_v14 }
  0x42   :  { %435 = vmatmul.bf16.gmra.mxu2 %v1430_v18  ;;  %475 = vmatmul.bf16.gmra.mxu3 %v1438_v27 }
  0x51   :  { %360 = vmatmul.bf16.gmra.mxu0 %v1415_v16  ;;  %400 = vmatmul.bf16.gmra.mxu1 %v1423_v17 }
  0x52   :  { %440 = vmatmul.bf16.gmra.mxu2 %v1431_v22  ;;  %480 = vmatmul.bf16.gmra.mxu3 %v1439_v31 }
  0x61   :  { %365 = vmatmul.bf16.gmra.mxu0 %v1416_v20  ;;  %405 = vmatmul.bf16.gmra.mxu1 %v1424_v21 }
  0x62   :  { %445 = vmatmul.bf16.gmra.mxu2 %v1432_v26  ;;  %485 = vmatmul.bf16.gmra.mxu3 %v1440_v35 }
  0x71   :  { %370 = vmatmul.bf16.gmra.mxu0 %v1417_v24  ;;  %410 = vmatmul.bf16.gmra.mxu1 %v1425_v25 }
  0x72   :  { %450 = vmatmul.bf16.gmra.mxu2 %v1433_v30  ;;  %490 = vmatmul.bf16.gmra.mxu3 %v1441_v38 }
  0x81   :  { %375 = vmatmul.bf16.gmra.mxu0 %v1418_v28  ;;  %415 = vmatmul.bf16.gmra.mxu1 %v1426_v29 }
  0x82   :  { %455 = vmatmul.bf16.gmra.mxu2 %v1434_v34  ;;  %495 = vmatmul.bf16.gmra.mxu3 %v1442_v43 }
  0x91   :  { %380 = vmatmul.bf16.gmra.mxu0 %v1419_v32  ;;  %420 = vmatmul.bf16.gmra.mxu1 %v1427_v33 }
  0x92   :  { %460 = vmatmul.bf16.gmra.mxu2 %v1435_v37  ;;  %500 = vmatmul.bf16.gmra.mxu3 %v1443_v48 }
  0x9e   :  { %v1617_v36 = vpop.f32.mrf.mxu0  ;;  %v1625_v39 = vpop.f32.mrf.mxu1 }
  0xa5   :  { %v1647_v49 = vpop.f32.mrf.mxu2  ;;  %v1669_v60 = vpop.f32.mrf.mxu3 }
  0xa6   :  { %v1627_v40 = vpop.f32.mrf.mxu0  ;;  %v1629_v41 = vpop.f32.mrf.mxu1  ;;  %2899 = vst [vmem:[#allocation2_spill] sm:$0xff] %v1647_v49 }
  0xa7   :  { %2901 = vst [vmem:[#allocation4_spill] sm:$0xff] %v1669_v60  ;;  %v506_v7 = vadd.f32 %v1627_v40, %v1617_v36 }
  0xad   :  { %v1653_v52 = vpop.f32.mrf.mxu2  ;;  %v1677_v0 = vpop.f32.mrf.mxu3 }
  0xae   :  { %v1631_v42 = vpop.f32.mrf.mxu0  ;;  %v1636_v44 = vpop.f32.mrf.mxu1  ;;  %2900 = vst [vmem:[#allocation3_spill] sm:$0xff] %v1653_v52 }
  0xaf   :  { %v507_v9 = vadd.f32 %v506_v7, %v1631_v42 }
  0xb5   :  { %v1659_v55 = vpop.f32.mrf.mxu2  ;;  %v1685_v4 = vpop.f32.mrf.mxu3 }
  0xb6   :  { %v1638_v45 = vpop.f32.mrf.mxu0  ;;  %v1642_v47 = vpop.f32.mrf.mxu1 }
  0xb7   :  { %v508_v12 = vadd.f32 %v507_v9, %v1638_v45 }
  0xbd   :  { %v1667_v59 = vpop.f32.mrf.mxu2  ;;  %v1698_v11 = vpop.f32.mrf.mxu3 }
  0xbe   :  { %v1640_v46 = vpop.f32.mrf.mxu0  ;;  %v1651_v51 = vpop.f32.mrf.mxu1 }
  0xbf   :  { %v509_v13 = vadd.f32 %v508_v12, %v1640_v46 }
  0xc5   :  { %v1675_v63 = vpop.f32.mrf.mxu2  ;;  %v1711_v20 = vpop.f32.mrf.mxu3 }
  0xc6   :  { %v1649_v50 = vpop.f32.mrf.mxu0  ;;  %v1657_v54 = vpop.f32.mrf.mxu1  ;;  %2905 = vst [vmem:[#allocation8_spill] sm:$0xff] %v1711_v20 }
  0xc7   :  { %v510_v14 = vadd.f32 %v509_v13, %v1649_v50 }
  0xcd   :  { %v1683_v3 = vpop.f32.mrf.mxu2  ;;  %v1724_v29 = vpop.f32.mrf.mxu3 }
  0xce   :  { %v1655_v53 = vpop.f32.mrf.mxu0  ;;  %v1663_v57 = vpop.f32.mrf.mxu1  ;;  %2902 = vst [vmem:[#allocation5_spill] sm:$0xff] %v1683_v3 }
  0xcf   :  { %v511_v16 = vadd.f32 %v510_v14, %v1655_v53  ;;  %2906 = vst [vmem:[#allocation9_spill] sm:$0xff] %v1724_v29 }
  0xd5   :  { %v1693_v8 = vpop.f32.mrf.mxu2  ;;  %v1737_v43 = vpop.f32.mrf.mxu3 }
  0xd6   :  { %v1661_v56 = vpop.f32.mrf.mxu0  ;;  %v1673_v62 = vpop.f32.mrf.mxu1  ;;  %2903 = vst [vmem:[#allocation6_spill] sm:$0xff] %v1693_v8 }
  0xd7   :  { %v512_v19 = vadd.f32 %v511_v16, %v1661_v56  ;;  %2907 = vst [vmem:[#allocation10_spill] sm:$0xff] %v1737_v43 }
  0xdd   :  { %v1708_v18 = vpop.f32.mrf.mxu2 }
  0xde   :  { %v1665_v58 = vpop.f32.mrf.mxu0  ;;  %v1681_v2 = vpop.f32.mrf.mxu1  ;;  %2904 = vst [vmem:[#allocation7_spill] sm:$0xff] %v1708_v18 }
  0xdf   :  { %v513_v21 = vadd.f32 %v512_v19, %v1665_v58  ;;  %v1748_v19 = vpop.f32.mrf.mxu3 }
  0xe0   :  { %2909 = vst [vmem:[#allocation12_spill] sm:$0xff] %v1748_v19 }
  0xe5   :  { %v1721_v27 = vpop.f32.mrf.mxu2 }
  0xe6   :  { %v1671_v61 = vpop.f32.mrf.mxu0  ;;  %v1689_v6 = vpop.f32.mrf.mxu1 }
  0xe7   :  { %v514_v22 = vadd.f32 %v513_v21, %v1671_v61 }
  0xed   :  { %v1734_v37 = vpop.f32.mrf.mxu2 }
  0xee   :  { %v1679_v1 = vpop.f32.mrf.mxu0  ;;  %v1703_v15 = vpop.f32.mrf.mxu1 }
  0xef   :  { %v515_v23 = vadd.f32 %v514_v22, %v1679_v1 }
  0xf5   :  { %v1745_v14 = vpop.f32.mrf.mxu2 }
  0xf6   :  { %v1687_v5 = vpop.f32.mrf.mxu0  ;;  %v1718_v25 = vpop.f32.mrf.mxu1  ;;  %2908 = vst [vmem:[#allocation11_spill] sm:$0xff] %v1745_v14 }
  0xf7   :  { %v516_v26 = vadd.f32 %v515_v23, %v1687_v5 }
  0xfe   :  { %v1696_v10 = vpop.f32.mrf.mxu0  ;;  %v1731_v34 = vpop.f32.mrf.mxu1 }
  0xff   :  { %v517_v28 = vadd.f32 %v516_v26, %v1696_v10 }
 0x106   :  { %v1706_v17 = vpop.f32.mrf.mxu0  ;;  %v1742_v12 = vpop.f32.mrf.mxu1 }
 0x107   :  { %v518_v30 = vadd.f32 %v517_v28, %v1706_v17 }
 0x10e   :  { %v1716_v24 = vpop.f32.mrf.mxu0  ;;  %v1753_v26 = vpop.f32.mrf.mxu1 }
 0x10f   :  { %v519_v31 = vadd.f32 %v518_v30, %v1716_v24  ;;  %2910 = vst [vmem:[#allocation13_spill] sm:$0xff] %v1753_v26  ;;  %v1756_v30 = vpop.f32.mrf.mxu2 }
 0x110   :  { %2911 = vst [vmem:[#allocation14_spill] sm:$0xff] %v1756_v30 }
 0x116   :  { %v1728_v32 = vpop.f32.mrf.mxu0 }
 0x117   :  { %v520_v33 = vadd.f32 %v519_v31, %v1728_v32 }
 0x119   :  { %v521_v35 = vadd.f32 %v520_v33, %v1625_v39  ;;  %v1759_v33 = vpop.f32.mrf.mxu3 }
 0x11a   :  { %2912 = vst [vmem:[#allocation15_spill] sm:$0xff] %v1759_v33 }
 0x11b   :  { %v522_v38 = vadd.f32 %v521_v35, %v1629_v41 }
 0x11d   :  { %v523_v48 = vadd.f32 %v522_v38, %v1636_v44 }
 0x11f   :  { %v524_v7 = vadd.f32 %v523_v48, %v1642_v47 }
 0x121   :  { %v525_v9 = vadd.f32 %v524_v7, %v1651_v51  ;;  %v1764_v7 = vpop.f32.mrf.mxu1 }
 0x123   :  { %v526_v13 = vadd.f32 %v525_v9, %v1657_v54 }
 0x125   :  { %v527_v16 = vadd.f32 %v526_v13, %v1663_v57  ;;  %v1767_v13 = vpop.f32.mrf.mxu2 }
 0x127   :  { %v528_v21 = vadd.f32 %v527_v16, %v1673_v62 }
 0x129   :  { %v529_v22 = vadd.f32 %v528_v21, %v1681_v2  ;;  %v1770_v21 = vpop.f32.mrf.mxu3 }
 0x12a   :  { %2913 = vst [vmem:[#allocation16_spill] sm:$0xff] %v1770_v21 }
 0x12b   :  { %v530_v23 = vadd.f32 %v529_v22, %v1689_v6 }
 0x12d   :  { %v531_v28 = vadd.f32 %v530_v23, %v1703_v15 }
 0x12f   :  { %v532_v31 = vadd.f32 %v531_v28, %v1718_v25 }
 0x131   :  { %v533_v35 = vadd.f32 %v532_v31, %v1731_v34 }
 0x133   :  { %v534_v38 = vadd.f32 %v533_v35, %v1742_v12  ;;  %v1776_v35 = vpop.f32.mrf.mxu2 }
 0x135   :  { %v535_v48 = vadd.f32 %v534_v38, %v1753_v26  ;;  %v1779_v26 = vpop.f32.mrf.mxu3 }
 0x136   :  { %2914 = vst [vmem:[#allocation17_spill] sm:$0xff] %v1779_v26 }
 0x137   :  { %v536_v9 = vadd.f32 %v535_v48, %v1764_v7 }
 0x139   :  { %v537_v16 = vadd.f32 %v536_v9, %v1647_v49 }
 0x13b   :  { %v538_v22 = vadd.f32 %v537_v16, %v1653_v52  ;;  %v1785_v52 = vpop.f32.mrf.mxu2 }
 0x13d   :  { %v539_v23 = vadd.f32 %v538_v22, %v1659_v55 }
 0x13f   :  { %v540_v28 = vadd.f32 %v539_v23, %v1667_v59  ;;  %v1788_v23 = vpop.f32.mrf.mxu3 }
 0x141   :  { %v541_v31 = vadd.f32 %v540_v28, %v1675_v63 }
 0x143   :  { %v542_v38 = vadd.f32 %v541_v31, %v1683_v3 }
 0x145   :  { %v543_v48 = vadd.f32 %v542_v38, %v1693_v8  ;;  %v463_v8 = vpop.f32.mrf.mxu2 }
 0x147   :  { %v544_v9 = vadd.f32 %v543_v48, %v1708_v18  ;;  %v1794_v18 = vpop.f32.mrf.mxu3 }
 0x148   :  { %2915 = vst [vmem:[#allocation18_spill] sm:$0xff] %v1794_v18 }
 0x149   :  { %v545_v49 = vadd.f32 %v544_v9, %v1721_v27 }
 0x14b   :  { %v546_v16 = vadd.f32 %v545_v49, %v1734_v37 }
 0x14d   :  { %v547_v22 = vadd.f32 %v546_v16, %v1745_v14 }
 0x14f   :  { %v548_v28 = vadd.f32 %v547_v22, %v1756_v30  ;;  %v1801_v30 = vpop.f32.mrf.mxu3 }
 0x151   :  { %v549_v31 = vadd.f32 %v548_v28, %v1767_v13 }
 0x153   :  { %v550_v3 = vadd.f32 %v549_v31, %v1776_v35 }
 0x155   :  { %v551_v38 = vadd.f32 %v550_v3, %v1785_v52 }
 0x157   :  { %v552_v48 = vadd.f32 %v551_v38, %v463_v8 }
 0x159   :  { %v553_v49 = vadd.f32 %v552_v48, %v1669_v60  ;;  %v1808_v60 = vpop.f32.mrf.mxu3 }
 0x15b   :  { %v554_v9 = vadd.f32 %v553_v49, %v1677_v0 }
 0x15d   :  { %v555_v16 = vadd.f32 %v554_v9, %v1685_v4 }
 0x15f   :  { %v556_v14 = vadd.f32 %v555_v16, %v1698_v11  ;;  %v1483_v16 = vmov 512.0  }
 0x160   :  { %1479 = vrcp.f32 %v1483_v16 }
 0x161   :  { %v557_v22 = vadd.f32 %v556_v14, %v1711_v20 }
 0x163   :  { %v558_v28 = vadd.f32 %v557_v22, %v1724_v29 }
 0x165   :  { %v559_v3 = vadd.f32 %v558_v28, %v1737_v43  ;;  %v503_v43 = vpop.f32.mrf.mxu3 }
 0x167   :  { %v560_v31 = vadd.f32 %v559_v3, %v1748_v19  ;;  %v1480_v19 = vpop.eup %1479 }
 0x168   :  { %vm580_vm0 = vweird.f32 %v1480_v19 }
 0x169   :  { %v561_v38 = vadd.f32 %v560_v31, %v1759_v33 }
 0x16b   :  { %v562_v48 = vadd.f32 %v561_v38, %v1770_v21  ;;  %v576_v38 = vmul.f32 512.0, %v1480_v19 }
 0x16d   :  { %v563_v49 = vadd.f32 %v562_v48, %v1779_v26  ;;  %v577_v29 = vsub.f32 1.0, %v576_v38 }
 0x16f   :  { %v564_v9 = vadd.f32 %v563_v49, %v1788_v23  ;;  %v578_v48 = vmul.f32 %v1480_v19, %v577_v29 }
 0x171   :  { %v565_v14 = vadd.f32 %v564_v9, %v1794_v18  ;;  %v579_v49 = vadd.f32 %v1480_v19, %v578_v48 }
 0x173   :  { %v566_v22 = vadd.f32 %v565_v14, %v1801_v30  ;;  %v1815_v18 = vsel %vm580_vm0, %v1480_v19, %v579_v49 }
 0x175   :  { %v567_v28 = vadd.f32 %v566_v22, %v1808_v60 }
 0x177   :  { %v568_v3 = vadd.f32 %v567_v28, %v503_v43 }
 0x179   :  { %v569_v31 = vrot.slane %v568_v3, 4 }
 0x17b   :  { %v570_v33 = vadd.f32 %v569_v31, %v568_v3 }
 0x17d   :  { %v571_v21 = vrot.slane %v570_v33, 2 }
 0x17f   :  { %v572_v20 = vadd.f32 %v571_v21, %v570_v33 }
 0x181   :  { %v573_v26 = vrot.slane %v572_v20, 1 }
 0x183   :  { %v574_v9 = vadd.f32 %v573_v26, %v572_v20 }
 0x185   :  { %v1818_v14 = vmul.f32 %v1815_v18, %v574_v9 }
 0x187   :  { %v1821_v16 = vsub.f32 %v463_v8, %v1818_v14  ;;  %v1824_v22 = vsub.f32 %v503_v43, %v1818_v14  ;;  %v1828_v28 = vsub.f32 %v1617_v36, %v1818_v14  ;;  %v1832_v29 = vsub.f32 %v1627_v40, %v1818_v14 }
 0x188   :  { %v1836_v20 = vsub.f32 %v1631_v42, %v1818_v14  ;;  %v1844_v43 = vsub.f32 %v1638_v45, %v1818_v14  ;;  %v1848_v36 = vsub.f32 %v1640_v46, %v1818_v14  ;;  %v1854_v42 = vsub.f32 %v1649_v50, %v1818_v14 }
 0x189   :  { %v647_v19 = vmul.f32 %v1828_v28, %v1828_v28  ;;  %v648_v8 = vmul.f32 %v1832_v29, %v1832_v29  ;;  %v1860_v45 = vsub.f32 %v1655_v53, %v1818_v14  ;;  %v1866_v31 = vsub.f32 %v1661_v56, %v1818_v14 }
 0x18a   :  { %v649_v40 = vmul.f32 %v1836_v20, %v1836_v20  ;;  %v650_v33 = vmul.f32 %v1844_v43, %v1844_v43  ;;  %v651_v46 = vmul.f32 %v1848_v36, %v1848_v36  ;;  %v652_v50 = vmul.f32 %v1854_v42, %v1854_v42 }
 0x18b   :  { %v711_v26 = vadd.f32 %v648_v8, %v647_v19  ;;  %v1872_v48 = vsub.f32 %v1665_v58, %v1818_v14  ;;  %v653_v53 = vmul.f32 %v1860_v45, %v1860_v45  ;;  %v1878_v9 = vsub.f32 %v1671_v61, %v1818_v14 }
 0x18c   :  { %v654_v56 = vmul.f32 %v1866_v31, %v1866_v31  ;;  %v1884_v8 = vsub.f32 %v1679_v1, %v1818_v14 }
 0x18d   :  { %v712_v21 = vadd.f32 %v711_v26, %v649_v40  ;;  %v655_v58 = vmul.f32 %v1872_v48, %v1872_v48  ;;  %v1890_v26 = vsub.f32 %v1687_v5, %v1818_v14  ;;  %v656_v61 = vmul.f32 %v1878_v9, %v1878_v9 }
 0x18e   :  { %v657_v1 = vmul.f32 %v1884_v8, %v1884_v8 }
 0x18f   :  { %v713_v3 = vadd.f32 %v712_v21, %v650_v33  ;;  %v1896_v21 = vsub.f32 %v1696_v10, %v1818_v14  ;;  %v658_v5 = vmul.f32 %v1890_v26, %v1890_v26 }
 0x191   :  { %v714_v38 = vadd.f32 %v713_v3, %v651_v46  ;;  %v1902_v3 = vsub.f32 %v1706_v17, %v1818_v14  ;;  %v659_v10 = vmul.f32 %v1896_v21, %v1896_v21 }
 0x193   :  { %v715_v49 = vadd.f32 %v714_v38, %v652_v50  ;;  %v1908_v38 = vsub.f32 %v1716_v24, %v1818_v14  ;;  %v660_v17 = vmul.f32 %v1902_v3, %v1902_v3 }
 0x195   :  { %v716_v19 = vadd.f32 %v715_v49, %v653_v53  ;;  %v1914_v49 = vsub.f32 %v1728_v32, %v1818_v14  ;;  %v661_v24 = vmul.f32 %v1908_v38, %v1908_v38 }
 0x197   :  { %v717_v40 = vadd.f32 %v716_v19, %v654_v56  ;;  %v1920_v19 = vsub.f32 %v1625_v39, %v1818_v14  ;;  %v662_v32 = vmul.f32 %v1914_v49, %v1914_v49 }
 0x199   :  { %v718_v33 = vadd.f32 %v717_v40, %v655_v58  ;;  %v1926_v40 = vsub.f32 %v1629_v41, %v1818_v14  ;;  %v663_v39 = vmul.f32 %v1920_v19, %v1920_v19 }
 0x19b   :  { %v719_v46 = vadd.f32 %v718_v33, %v656_v61  ;;  %v1932_v33 = vsub.f32 %v1636_v44, %v1818_v14  ;;  %v664_v41 = vmul.f32 %v1926_v40, %v1926_v40 }
 0x19d   :  { %v720_v50 = vadd.f32 %v719_v46, %v657_v1  ;;  %v1938_v46 = vsub.f32 %v1642_v47, %v1818_v14  ;;  %v665_v44 = vmul.f32 %v1932_v33, %v1932_v33 }
 0x19f   :  { %v721_v53 = vadd.f32 %v720_v50, %v658_v5  ;;  %v1944_v50 = vsub.f32 %v1651_v51, %v1818_v14  ;;  %v666_v47 = vmul.f32 %v1938_v46, %v1938_v46 }
 0x1a1   :  { %v722_v56 = vadd.f32 %v721_v53, %v659_v10  ;;  %v1950_v53 = vsub.f32 %v1657_v54, %v1818_v14  ;;  %v667_v51 = vmul.f32 %v1944_v50, %v1944_v50 }
 0x1a3   :  { %v723_v58 = vadd.f32 %v722_v56, %v660_v17  ;;  %v1956_v56 = vsub.f32 %v1663_v57, %v1818_v14  ;;  %v668_v54 = vmul.f32 %v1950_v53, %v1950_v53 }
 0x1a5   :  { %v724_v61 = vadd.f32 %v723_v58, %v661_v24  ;;  %v1962_v58 = vsub.f32 %v1673_v62, %v1818_v14  ;;  %v669_v57 = vmul.f32 %v1956_v56, %v1956_v56 }
 0x1a7   :  { %v725_v1 = vadd.f32 %v724_v61, %v662_v32  ;;  %v1968_v61 = vsub.f32 %v1681_v2, %v1818_v14  ;;  %v670_v62 = vmul.f32 %v1962_v58, %v1962_v58 }
 0x1a9   :  { %v726_v5 = vadd.f32 %v725_v1, %v663_v39  ;;  %v1974_v1 = vsub.f32 %v1689_v6, %v1818_v14  ;;  %v671_v2 = vmul.f32 %v1968_v61, %v1968_v61 }
 0x1ab   :  { %v727_v10 = vadd.f32 %v726_v5, %v664_v41  ;;  %2916 = vst [vmem:[#allocation19_spill] sm:$0xff] %v1974_v1  ;;  %v1980_v5 = vsub.f32 %v1703_v15, %v1818_v14  ;;  %v672_v6 = vmul.f32 %v1974_v1, %v1974_v1 }
 0x1ad   :  { %v728_v17 = vadd.f32 %v727_v10, %v665_v44  ;;  %2917 = vst [vmem:[#allocation20_spill] sm:$0xff] %v1980_v5  ;;  %v1986_v10 = vsub.f32 %v1718_v25, %v1818_v14  ;;  %v673_v15 = vmul.f32 %v1980_v5, %v1980_v5 }
 0x1af   :  { %v729_v24 = vadd.f32 %v728_v17, %v666_v47  ;;  %2918 = vst [vmem:[#allocation21_spill] sm:$0xff] %v1986_v10  ;;  %v1992_v17 = vsub.f32 %v1731_v34, %v1818_v14  ;;  %v674_v25 = vmul.f32 %v1986_v10, %v1986_v10 }
 0x1b1   :  { %v730_v32 = vadd.f32 %v729_v24, %v667_v51  ;;  %2919 = vst [vmem:[#allocation22_spill] sm:$0xff] %v1992_v17  ;;  %v1998_v24 = vsub.f32 %v1742_v12, %v1818_v14  ;;  %v675_v34 = vmul.f32 %v1992_v17, %v1992_v17 }
 0x1b3   :  { %v731_v39 = vadd.f32 %v730_v32, %v668_v54  ;;  %2920 = vst [vmem:[#allocation23_spill] sm:$0xff] %v1998_v24  ;;  %v2921_v32 = vld [vmem:[#allocation13_spill] sm:$0xff]  ;;  %v676_v12 = vmul.f32 %v1998_v24, %v1998_v24 }
 0x1b5   :  { %v732_v41 = vadd.f32 %v731_v39, %v669_v57  ;;  %v2004_v57 = vsub.f32 %v2921_v32, %v1818_v14 }
 0x1b7   :  { %v733_v44 = vadd.f32 %v732_v41, %v670_v62  ;;  %2922 = vst [vmem:[#allocation13_spill] sm:$0xff] %v2004_v57  ;;  %v2010_v62 = vsub.f32 %v1764_v7, %v1818_v14 }
 0x1b9   :  { %v734_v47 = vadd.f32 %v733_v44, %v671_v2  ;;  %2923 = vst [vmem:[#allocation24_spill] sm:$0xff] %v2010_v62  ;;  %v2924_v2 = vld [vmem:[#allocation2_spill] sm:$0xff]  ;;  %v678_v7 = vmul.f32 %v2010_v62, %v2010_v62 }
 0x1ba   :  { %v2016_v44 = vsub.f32 %v2924_v2, %v1818_v14  ;;  %v2040_v2 = vsub.f32 %v1675_v63, %v1818_v14 }
 0x1bb   :  { %v735_v51 = vadd.f32 %v734_v47, %v672_v6  ;;  %v677_v6 = vmul.f32 %v2004_v57, %v2004_v57 }
 0x1bc   :  { %2925 = vst [vmem:[#allocation2_spill] sm:$0xff] %v2016_v44  ;;  %v679_v32 = vmul.f32 %v2016_v44, %v2016_v44  ;;  %v683_v63 = vmul.f32 %v2040_v2, %v2040_v2  ;;  %v2952_v44 = vld [vmem:[#allocation17_spill] sm:$0xff] }
 0x1bd   :  { %v736_v54 = vadd.f32 %v735_v51, %v673_v15  ;;  %v2926_v15 = vld [vmem:[#allocation3_spill] sm:$0xff]  ;;  %2930 = vst [vmem:[#allocation27_spill] sm:$0xff] %v2040_v2 }
 0x1be   :  { %v2022_v51 = vsub.f32 %v2926_v15, %v1818_v14 }
 0x1bf   :  { %v737_v39 = vadd.f32 %v736_v54, %v674_v25  ;;  %v2028_v54 = vsub.f32 %v1659_v55, %v1818_v14 }
 0x1c0   :  { %2927 = vst [vmem:[#allocation3_spill] sm:$0xff] %v2022_v51 }
 0x1c1   :  { %v738_v41 = vadd.f32 %v737_v39, %v675_v34  ;;  %2928 = vst [vmem:[#allocation25_spill] sm:$0xff] %v2028_v54  ;;  %v2034_v39 = vsub.f32 %v1667_v59, %v1818_v14  ;;  %v681_v55 = vmul.f32 %v2028_v54, %v2028_v54 }
 0x1c3   :  { %v739_v47 = vadd.f32 %v738_v41, %v676_v12  ;;  %2929 = vst [vmem:[#allocation26_spill] sm:$0xff] %v2034_v39  ;;  %v680_v12 = vmul.f32 %v2022_v51, %v2022_v51  ;;  %v682_v59 = vmul.f32 %v2034_v39, %v2034_v39 }
 0x1c5   :  { %v740_v25 = vadd.f32 %v739_v47, %v677_v6  ;;  %v2931_v47 = vld [vmem:[#allocation5_spill] sm:$0xff] }
 0x1c6   :  { %v2046_v15 = vsub.f32 %v2931_v47, %v1818_v14  ;;  %v2064_v47 = vsub.f32 %v1721_v27, %v1818_v14 }
 0x1c7   :  { %v741_v34 = vadd.f32 %v740_v25, %v678_v7  ;;  %v2933_v25 = vld [vmem:[#allocation6_spill] sm:$0xff] }
 0x1c8   :  { %2932 = vst [vmem:[#allocation5_spill] sm:$0xff] %v2046_v15  ;;  %v2052_v51 = vsub.f32 %v2933_v25, %v1818_v14  ;;  %v2070_v25 = vsub.f32 %v1734_v37, %v1818_v14  ;;  %v687_v27 = vmul.f32 %v2064_v47, %v2064_v47 }
 0x1c9   :  { %v742_v41 = vadd.f32 %v741_v34, %v679_v32  ;;  %v2935_v34 = vld [vmem:[#allocation7_spill] sm:$0xff]  ;;  %2937 = vst [vmem:[#allocation28_spill] sm:$0xff] %v2064_v47 }
 0x1ca   :  { %2934 = vst [vmem:[#allocation6_spill] sm:$0xff] %v2052_v51  ;;  %v2058_v54 = vsub.f32 %v2935_v34, %v1818_v14  ;;  %v2939_v34 = vld [vmem:[#allocation11_spill] sm:$0xff]  ;;  %v688_v37 = vmul.f32 %v2070_v25, %v2070_v25 }
 0x1cb   :  { %v743_v6 = vadd.f32 %v742_v41, %v680_v12  ;;  %v684_v12 = vmul.f32 %v2046_v15, %v2046_v15  ;;  %2938 = vst [vmem:[#allocation29_spill] sm:$0xff] %v2070_v25  ;;  %v2076_v15 = vsub.f32 %v2939_v34, %v1818_v14  ;;  %v2094_v34 = vsub.f32 %v1776_v35, %v1818_v14 }
 0x1cc   :  { %2936 = vst [vmem:[#allocation7_spill] sm:$0xff] %v2058_v54 }
 0x1cd   :  { %v744_v7 = vadd.f32 %v743_v6, %v681_v55  ;;  %v685_v55 = vmul.f32 %v2052_v51, %v2052_v51  ;;  %2940 = vst [vmem:[#allocation11_spill] sm:$0xff] %v2076_v15 }
 0x1ce   :  { %2944 = vst [vmem:[#allocation31_spill] sm:$0xff] %v2094_v34 }
 0x1cf   :  { %v745_v32 = vadd.f32 %v744_v7, %v682_v59  ;;  %v686_v59 = vmul.f32 %v2058_v54, %v2058_v54 }
 0x1d1   :  { %v746_v41 = vadd.f32 %v745_v32, %v683_v63  ;;  %v2941_v32 = vld [vmem:[#allocation14_spill] sm:$0xff] }
 0x1d2   :  { %v2082_v51 = vsub.f32 %v2941_v32, %v1818_v14  ;;  %v2100_v32 = vsub.f32 %v1785_v52, %v1818_v14  ;;  %v2114_v52 = vsub.f32 %v1677_v0, %v1818_v14 }
 0x1d3   :  { %v747_v6 = vadd.f32 %v746_v41, %v684_v12  ;;  %v2088_v41 = vsub.f32 %v1767_v13, %v1818_v14 }
 0x1d4   :  { %2942 = vst [vmem:[#allocation14_spill] sm:$0xff] %v2082_v51  ;;  %v696_v0 = vmul.f32 %v2114_v52, %v2114_v52 }
 0x1d5   :  { %v748_v7 = vadd.f32 %v747_v6, %v685_v55  ;;  %2943 = vst [vmem:[#allocation30_spill] sm:$0xff] %v2088_v41  ;;  %v689_v55 = vmul.f32 %v2076_v15, %v2076_v15  ;;  %v691_v13 = vmul.f32 %v2088_v41, %v2088_v41 }
 0x1d7   :  { %v749_v63 = vadd.f32 %v748_v7, %v686_v59  ;;  %v690_v59 = vmul.f32 %v2082_v51, %v2082_v51  ;;  %v693_v51 = vmul.f32 %v2100_v32, %v2100_v32 }
 0x1d9   :  { %v750_v12 = vadd.f32 %v749_v63, %v687_v27  ;;  %v692_v63 = vmul.f32 %v2094_v34, %v2094_v34 }
 0x1db   :  { %v751_v6 = vadd.f32 %v750_v12, %v688_v37  ;;  %v2945_v12 = vld [vmem:[#allocation4_spill] sm:$0xff] }
 0x1dc   :  { %v2108_v35 = vsub.f32 %v2945_v12, %v1818_v14  ;;  %v2126_v12 = vsub.f32 %v1698_v11, %v1818_v14 }
 0x1dd   :  { %v752_v7 = vadd.f32 %v751_v6, %v689_v55  ;;  %v694_v6 = vmul.f32 %v1821_v16, %v1821_v16 }
 0x1de   :  { %v698_v11 = vmul.f32 %v2126_v12, %v2126_v12 }
 0x1df   :  { %v753_v27 = vadd.f32 %v752_v7, %v690_v59  ;;  %v2120_v7 = vsub.f32 %v1685_v4, %v1818_v14 }
 0x1e1   :  { %v754_v37 = vadd.f32 %v753_v27, %v691_v13  ;;  %v695_v13 = vmul.f32 %v2108_v35, %v2108_v35  ;;  %v697_v4 = vmul.f32 %v2120_v7, %v2120_v7 }
 0x1e3   :  { %v755_v55 = vadd.f32 %v754_v37, %v692_v63  ;;  %v2946_v37 = vld [vmem:[#allocation8_spill] sm:$0xff] }
 0x1e4   :  { %v2132_v34 = vsub.f32 %v2946_v37, %v1818_v14  ;;  %v2949_v37 = vld [vmem:[#allocation12_spill] sm:$0xff] }
 0x1e5   :  { %v756_v59 = vadd.f32 %v755_v55, %v693_v51  ;;  %v2947_v55 = vld [vmem:[#allocation9_spill] sm:$0xff]  ;;  %v638_v25 = vsub.f32 %v2949_v37, %v1818_v14  ;;  %v642_v37 = vsub.f32 %v1788_v23, %v1818_v14 }
 0x1e6   :  { %v2138_v41 = vsub.f32 %v2947_v55, %v1818_v14  ;;  %v2950_v55 = vld [vmem:[#allocation15_spill] sm:$0xff] }
 0x1e7   :  { %v757_v27 = vadd.f32 %v756_v59, %v694_v6  ;;  %v2948_v59 = vld [vmem:[#allocation10_spill] sm:$0xff]  ;;  %v639_v47 = vsub.f32 %v2950_v55, %v1818_v14 }
 0x1e8   :  { %v637_v15 = vsub.f32 %v2948_v59, %v1818_v14  ;;  %v702_v59 = vmul.f32 %v638_v25, %v638_v25 }
 0x1e9   :  { %v758_v63 = vadd.f32 %v757_v27, %v695_v13  ;;  %v699_v13 = vmul.f32 %v2132_v34, %v2132_v34 }
 0x1ea   :  { %v701_v54 = vmul.f32 %v637_v15, %v637_v15 }
 0x1eb   :  { %v759_v51 = vadd.f32 %v758_v63, %v696_v0  ;;  %v700_v0 = vmul.f32 %v2138_v41, %v2138_v41 }
 0x1ed   :  { %v760_v6 = vadd.f32 %v759_v51, %v697_v4  ;;  %v2951_v4 = vld [vmem:[#allocation16_spill] sm:$0xff] }
 0x1ee   :  { %v640_v51 = vsub.f32 %v2951_v4, %v1818_v14  ;;  %v706_v4 = vmul.f32 %v642_v37, %v642_v37 }
 0x1ef   :  { %v761_v27 = vadd.f32 %v760_v6, %v698_v11  ;;  %v641_v11 = vsub.f32 %v2952_v44, %v1818_v14  ;;  %v703_v6 = vmul.f32 %v639_v47, %v639_v47  ;;  %v645_v44 = vsub.f32 %v1808_v60, %v1818_v14 }
 0x1f0   :  { %v704_v57 = vmul.f32 %v640_v51, %v640_v51 }
 0x1f1   :  { %v762_v63 = vadd.f32 %v761_v27, %v699_v13  ;;  %v2953_v27 = vld [vmem:[#allocation18_spill] sm:$0xff]  ;;  %v705_v24 = vmul.f32 %v641_v11, %v641_v11  ;;  %v709_v23 = vmul.f32 %v645_v44, %v645_v44 }
 0x1f2   :  { %v643_v55 = vsub.f32 %v2953_v27, %v1818_v14 }
 0x1f3   :  { %v763_v2 = vadd.f32 %v762_v63, %v700_v0  ;;  %v644_v63 = vsub.f32 %v1801_v30, %v1818_v14 }
 0x1f5   :  { %v764_v39 = vadd.f32 %v763_v2, %v701_v54  ;;  %v707_v2 = vmul.f32 %v643_v55, %v643_v55 }
 0x1f7   :  { %v765_v62 = vadd.f32 %v764_v39, %v702_v59  ;;  %v708_v59 = vmul.f32 %v644_v63, %v644_v63 }
 0x1f9   :  { %v766_v13 = vadd.f32 %v765_v62, %v703_v6  ;;  %v710_v62 = vmul.f32 %v1824_v22, %v1824_v22 }
 0x1fb   :  { %v767_v0 = vadd.f32 %v766_v13, %v704_v57 }
 0x1fd   :  { %v768_v54 = vadd.f32 %v767_v0, %v705_v24 }
 0x1ff   :  { %v769_v39 = vadd.f32 %v768_v54, %v706_v4 }
 0x201   :  { %v770_v17 = vadd.f32 %v769_v39, %v707_v2 }
 0x203   :  { %v771_v10 = vadd.f32 %v770_v17, %v708_v59 }
 0x205   :  { %v772_v6 = vadd.f32 %v771_v10, %v709_v23 }
 0x207   :  { %v773_v27 = vadd.f32 %v772_v6, %v710_v62 }
 0x209   :  { %v774_v57 = vrot.slane %v773_v27, 4 }
 0x20b   :  { %v775_v13 = vadd.f32 %v774_v57, %v773_v27 }
 0x20d   :  { %v776_v5 = vrot.slane %v775_v13, 2 }
 0x20f   :  { %v777_v30 = vadd.f32 %v776_v5, %v775_v13 }
 0x211   :  { %v778_v1 = vrot.slane %v777_v30, 1 }
 0x213   :  { %v779_v24 = vadd.f32 %v778_v1, %v777_v30 }
 0x215   :  { %v780_v0 = vmul.f32 %v779_v24, %v1815_v18  ;;  %v2176_v18 = vld [vmem:[%s2842_s2] ss:$0 sm:$0xff] }
 0x217   :  { %v781_v60 = vadd.f32 1e-05, %v780_v0 }
 0x219   :  { %1481 = vrsqrt.f32 %v781_v60  ;;  %vm788_vm2 = vweird.f32 %v781_v60 }
 0x21f   :  { %v1482_v14 = vpop.eup %1481 }
 0x220   :  { %v783_v4 = vmul.f32 %v1482_v14, %v781_v60  ;;  %vm789_vm1 = vweird.f32 %v1482_v14 }
 0x221   :  { %vm790_vm3 = vmor %vm788_vm2, %vm789_vm1 }
 0x222   :  { %v784_v54 = vmul.f32 %v1482_v14, %v783_v4 }
 0x224   :  { %v785_v2 = vmul.f32 0.5, %v784_v54 }
 0x226   :  { %v786_v17 = vsub.f32 1.5, %v785_v2 }
 0x228   :  { %v787_v39 = vmul.f32 %v1482_v14, %v786_v17 }
 0x22a   :  { %v2167_v10 = vsel %vm790_vm3, %v1482_v14, %v787_v39 }
 0x22b   :  { %v839_v5 = vmul.f32 %v2167_v10, %v1821_v16  ;;  %v840_v1 = vmul.f32 %v2167_v10, %v2108_v35  ;;  %v841_v59 = vmul.f32 %v2167_v10, %v2114_v52  ;;  %v842_v23 = vmul.f32 %v2167_v10, %v2120_v7 }
 0x22c   :  { %v843_v62 = vmul.f32 %v2167_v10, %v2126_v12  ;;  %v844_v16 = vmul.f32 %v2167_v10, %v2132_v34  ;;  %v845_v35 = vmul.f32 %v2167_v10, %v2138_v41  ;;  %v846_v6 = vmul.f32 %v2167_v10, %v637_v15 }
 0x22d   :  { %v847_v27 = vmul.f32 %v2167_v10, %v638_v25  ;;  %v848_v57 = vmul.f32 %v2167_v10, %v639_v47  ;;  %v849_v52 = vmul.f32 %v2167_v10, %v640_v51  ;;  %v850_v13 = vmul.f32 %v2167_v10, %v641_v11 }
 0x22e   :  { %v851_v7 = vmul.f32 %v2167_v10, %v642_v37  ;;  %v852_v12 = vmul.f32 %v2167_v10, %v643_v55  ;;  %v853_v30 = vmul.f32 %v2167_v10, %v644_v63  ;;  %v854_v34 = vmul.f32 %v2167_v10, %v645_v44 }
 0x22f   :  { %v855_v41 = vmul.f32 %v2167_v10, %v1824_v22  ;;  %v907_v15 = vmul.f32 %v2176_v18, %v839_v5  ;;  %v908_v25 = vmul.f32 %v2176_v18, %v840_v1  ;;  %v909_v47 = vmul.f32 %v2176_v18, %v841_v59  ;;  %v2222_v5 = vld [vmem:[%s2843_s3] ss:$0 sm:$0xff] }
 0x230   :  { %v910_v51 = vmul.f32 %v2176_v18, %v842_v23  ;;  %v911_v11 = vmul.f32 %v2176_v18, %v843_v62  ;;  %v912_v37 = vmul.f32 %v2176_v18, %v844_v16  ;;  %v913_v55 = vmul.f32 %v2176_v18, %v845_v35 }
 0x231   :  { %v914_v63 = vmul.f32 %v2176_v18, %v846_v6  ;;  %v915_v44 = vmul.f32 %v2176_v18, %v847_v27  ;;  %v916_v22 = vmul.f32 %v2176_v18, %v848_v57  ;;  %v917_v24 = vmul.f32 %v2176_v18, %v849_v52 }
 0x232   :  { %v918_v0 = vmul.f32 %v2176_v18, %v850_v13  ;;  %v919_v60 = vmul.f32 %v2176_v18, %v851_v7  ;;  %v920_v14 = vmul.f32 %v2176_v18, %v852_v12  ;;  %v921_v4 = vmul.f32 %v2176_v18, %v853_v30 }
 0x233   :  { %v922_v54 = vmul.f32 %v2176_v18, %v854_v34  ;;  %v923_v2 = vmul.f32 %v2176_v18, %v855_v41  ;;  %v838_v17 = vmul.f32 %v2167_v10, %v2100_v32  ;;  %v2228_v59 = vadd.f32 %v2222_v5, %v907_v15 }
 0x234   :  { %v2231_v23 = vadd.f32 %v2222_v5, %v908_v25  ;;  %v2234_v62 = vadd.f32 %v2222_v5, %v909_v47  ;;  %v2237_v32 = vadd.f32 %v2222_v5, %v910_v51  ;;  %v2240_v16 = vadd.f32 %v2222_v5, %v911_v11 }
 0x235   :  { %v906_v39 = vmul.f32 %v2176_v18, %v838_v17  ;;  %v2243_v35 = vadd.f32 %v2222_v5, %v912_v37  ;;  %v2246_v6 = vadd.f32 %v2222_v5, %v913_v55  ;;  %v2249_v27 = vadd.f32 %v2222_v5, %v914_v63  ;;  %v2977_v17 = vld [vmem:[#allocation2_spill] sm:$0xff] }
 0x236   :  { %2954 = vst [vmem:[#allocation4_spill] sm:$0xff] %v2231_v23  ;;  %v2252_v57 = vadd.f32 %v2222_v5, %v915_v44  ;;  %v2255_v52 = vadd.f32 %v2222_v5, %v916_v22  ;;  %v2258_v13 = vadd.f32 %v2222_v5, %v917_v24  ;;  %v2261_v7 = vadd.f32 %v2222_v5, %v918_v0  ;;  %v2970_v22 = vld [vmem:[#allocation19_spill] sm:$0xff]  ;;  %v2971_v24 = vld [vmem:[#allocation20_spill] sm:$0xff]  ;;  %v2972_v0 = vld [vmem:[#allocation21_spill] sm:$0xff] }
 0x237   :  { %v2225_v1 = vadd.f32 %v2222_v5, %v906_v39  ;;  %2955 = vst [vmem:[#allocation8_spill] sm:$0xff] %v2234_v62  ;;  %v2264_v12 = vadd.f32 %v2222_v5, %v919_v60  ;;  %v2267_v30 = vadd.f32 %v2222_v5, %v920_v14  ;;  %v2270_v34 = vadd.f32 %v2222_v5, %v921_v4  ;;  %v2973_v14 = vld [vmem:[#allocation22_spill] sm:$0xff]  ;;  %v2974_v4 = vld [vmem:[#allocation23_spill] sm:$0xff] }
 0x238   :  { %2956 = vst [vmem:[#allocation9_spill] sm:$0xff] %v2237_v32  ;;  %v2273_v41 = vadd.f32 %v2222_v5, %v922_v54  ;;  %v2276_v15 = vadd.f32 %v2222_v5, %v923_v2  ;;  %v792_v25 = vmul.f32 %v2167_v10, %v1828_v28  ;;  %v793_v47 = vmul.f32 %v2167_v10, %v1832_v29  ;;  %v2975_v54 = vld [vmem:[#allocation13_spill] sm:$0xff]  ;;  %v2976_v2 = vld [vmem:[#allocation24_spill] sm:$0xff] }
 0x239   :  { %2957 = vst [vmem:[#allocation10_spill] sm:$0xff] %v2240_v16  ;;  %v794_v51 = vmul.f32 %v2167_v10, %v1836_v20  ;;  %v795_v11 = vmul.f32 %v2167_v10, %v1844_v43  ;;  %v796_v37 = vmul.f32 %v2167_v10, %v1848_v36  ;;  %v797_v55 = vmul.f32 %v2167_v10, %v1854_v42 }
 0x23a   :  { %2958 = vst [vmem:[#allocation12_spill] sm:$0xff] %v2243_v35  ;;  %v860_v63 = vmul.f32 %v2176_v18, %v792_v25  ;;  %v798_v28 = vmul.f32 %v2167_v10, %v1860_v45  ;;  %v799_v29 = vmul.f32 %v2167_v10, %v1866_v31  ;;  %v800_v20 = vmul.f32 %v2167_v10, %v1872_v48  ;;  %v2978_v25 = vld [vmem:[#allocation3_spill] sm:$0xff] }
 0x23b   :  { %2959 = vst [vmem:[#allocation15_spill] sm:$0xff] %v2246_v6  ;;  %v801_v43 = vmul.f32 %v2167_v10, %v1878_v9  ;;  %v802_v36 = vmul.f32 %v2167_v10, %v1884_v8  ;;  %v803_v42 = vmul.f32 %v2167_v10, %v1890_v26  ;;  %v804_v44 = vmul.f32 %v2167_v10, %v1896_v21 }
 0x23c   :  { %2960 = vst [vmem:[#allocation16_spill] sm:$0xff] %v2249_v27  ;;  %v805_v45 = vmul.f32 %v2167_v10, %v1902_v3  ;;  %v806_v31 = vmul.f32 %v2167_v10, %v1908_v38  ;;  %v807_v48 = vmul.f32 %v2167_v10, %v1914_v49  ;;  %v808_v9 = vmul.f32 %v2167_v10, %v1920_v19 }
 0x23d   :  { %2961 = vst [vmem:[#allocation17_spill] sm:$0xff] %v2252_v57  ;;  %v809_v8 = vmul.f32 %v2167_v10, %v1926_v40  ;;  %v810_v26 = vmul.f32 %v2167_v10, %v1932_v33  ;;  %v811_v21 = vmul.f32 %v2167_v10, %v1938_v46  ;;  %v812_v3 = vmul.f32 %v2167_v10, %v1944_v50 }
 0x23e   :  { %2962 = vst [vmem:[#allocation18_spill] sm:$0xff] %v2255_v52  ;;  %v928_v38 = vadd.f32 %v2222_v5, %v860_v63  ;;  %v813_v49 = vmul.f32 %v2167_v10, %v1950_v53  ;;  %v814_v19 = vmul.f32 %v2167_v10, %v1956_v56  ;;  %v815_v40 = vmul.f32 %v2167_v10, %v1962_v58 }
 0x23f   :  { %2963 = vst [vmem:[#allocation32_spill] sm:$0xff] %v2258_v13  ;;  %v816_v33 = vmul.f32 %v2167_v10, %v1968_v61  ;;  %v817_v46 = vmul.f32 %v2167_v10, %v2970_v22  ;;  %v818_v50 = vmul.f32 %v2167_v10, %v2971_v24  ;;  %v819_v60 = vmul.f32 %v2167_v10, %v2972_v0  ;;  %v2979_v22 = vld [vmem:[#allocation25_spill] sm:$0xff]  ;;  %v2980_v0 = vld [vmem:[#allocation26_spill] sm:$0xff]  ;;  %v2987_v13 = vld [vmem:[#allocation11_spill] sm:$0xff] }
 0x240   :  { %2964 = vst [vmem:[#allocation33_spill] sm:$0xff] %v2261_v7  ;;  %v820_v53 = vmul.f32 %v2167_v10, %v2973_v14  ;;  %v821_v56 = vmul.f32 %v2167_v10, %v2974_v4  ;;  %v822_v58 = vmul.f32 %v2167_v10, %v2975_v54  ;;  %v823_v61 = vmul.f32 %v2167_v10, %v2976_v2  ;;  %v2981_v4 = vld [vmem:[#allocation27_spill] sm:$0xff]  ;;  %v2982_v54 = vld [vmem:[#allocation5_spill] sm:$0xff]  ;;  %v2983_v2 = vld [vmem:[#allocation6_spill] sm:$0xff] }
 0x241   :  { %2965 = vst [vmem:[#allocation34_spill] sm:$0xff] %v2264_v12  ;;  %v824_v39 = vmul.f32 %v2167_v10, %v2977_v17  ;;  %v825_v63 = vmul.f32 %v2167_v10, %v2978_v25  ;;  %v826_v24 = vmul.f32 %v2167_v10, %v2979_v22  ;;  %v827_v14 = vmul.f32 %v2167_v10, %v2980_v0  ;;  %v2985_v12 = vld [vmem:[#allocation28_spill] sm:$0xff]  ;;  %v2986_v7 = vld [vmem:[#allocation29_spill] sm:$0xff] }
 0x242   :  { %2966 = vst [vmem:[#allocation35_spill] sm:$0xff] %v2267_v30  ;;  %vm992_vm4 = vcmp.gt.f32.partialorder %v928_v38, 0.0  ;;  %v1056_v17 = vmul.f32 0.1, %v928_v38  ;;  %v2984_v30 = vld [vmem:[#allocation7_spill] sm:$0xff]  ;;  %v832_v22 = vmul.f32 %v2167_v10, %v2985_v12  ;;  %v833_v0 = vmul.f32 %v2167_v10, %v2986_v7 }
 0x243   :  { %2967 = vst [vmem:[#allocation36_spill] sm:$0xff] %v2270_v34  ;;  %v830_v34 = vmul.f32 %v2167_v10, %v2983_v2  ;;  %v831_v25 = vmul.f32 %v2167_v10, %v2984_v30  ;;  %v834_v52 = vmul.f32 %v2167_v10, %v2987_v13  ;;  %v2990_v2 = vld [vmem:[#allocation31_spill] sm:$0xff]  ;;  %v861_v30 = vmul.f32 %v2176_v18, %v793_v47 }
 0x244   :  { %2968 = vst [vmem:[#allocation37_spill] sm:$0xff] %v2273_v41  ;;  %v829_v41 = vmul.f32 %v2167_v10, %v2982_v54  ;;  %v2989_v54 = vld [vmem:[#allocation30_spill] sm:$0xff]  ;;  %v837_v6 = vmul.f32 %v2167_v10, %v2990_v2  ;;  %v1120_v35 = vsel %vm992_vm4, %v928_v38, %v1056_v17  ;;  %v862_v12 = vmul.f32 %v2176_v18, %v794_v51 }
 0x245   :  { %2969 = vst [vmem:[#allocation38_spill] sm:$0xff] %v2276_v15  ;;  %v828_v15 = vmul.f32 %v2167_v10, %v2981_v4  ;;  %v2988_v4 = vld [vmem:[#allocation14_spill] sm:$0xff]  ;;  %v836_v27 = vmul.f32 %v2167_v10, %v2989_v54  ;;  %v863_v16 = vmul.f32 %v2176_v18, %v795_v11  ;;  %v864_v7 = vmul.f32 %v2176_v18, %v796_v37 }
 0x246   :  { %v835_v57 = vmul.f32 %v2167_v10, %v2988_v4  ;;  %1184 = vst [vmem:[%s2844_s4] sm:$0xff] %v1120_v35  ;;  %v865_v13 = vmul.f32 %v2176_v18, %v797_v55  ;;  %v866_v4 = vmul.f32 %v2176_v18, %v798_v28  ;;  %v867_v54 = vmul.f32 %v2176_v18, %v799_v29 }
 0x247   :  { %v868_v10 = vmul.f32 %v2176_v18, %v800_v20  ;;  %v869_v47 = vmul.f32 %v2176_v18, %v801_v43  ;;  %v870_v51 = vmul.f32 %v2176_v18, %v802_v36  ;;  %v871_v11 = vmul.f32 %v2176_v18, %v803_v42 }
 0x248   :  { %v872_v37 = vmul.f32 %v2176_v18, %v804_v44  ;;  %v2388_v38 = vmul.f32 %v2176_v18, %v805_v45  ;;  %v2391_v35 = vmul.f32 %v2176_v18, %v806_v31  ;;  %v2394_v55 = vmul.f32 %v2176_v18, %v807_v48 }
 0x249   :  { %v2397_v28 = vmul.f32 %v2176_v18, %v808_v9  ;;  %v2400_v29 = vmul.f32 %v2176_v18, %v809_v8  ;;  %v2403_v20 = vmul.f32 %v2176_v18, %v810_v26  ;;  %v2406_v43 = vmul.f32 %v2176_v18, %v811_v21 }
 0x24a   :  { %v2409_v36 = vmul.f32 %v2176_v18, %v812_v3  ;;  %v2412_v42 = vmul.f32 %v2176_v18, %v813_v49  ;;  %v2415_v44 = vmul.f32 %v2176_v18, %v814_v19  ;;  %v2418_v45 = vmul.f32 %v2176_v18, %v815_v40 }
 0x24b   :  { %v2421_v31 = vmul.f32 %v2176_v18, %v816_v33  ;;  %v2424_v48 = vmul.f32 %v2176_v18, %v817_v46  ;;  %v2427_v9 = vmul.f32 %v2176_v18, %v818_v50  ;;  %v2430_v8 = vmul.f32 %v2176_v18, %v819_v60 }
 0x24c   :  { %v2433_v26 = vmul.f32 %v2176_v18, %v820_v53  ;;  %v2436_v21 = vmul.f32 %v2176_v18, %v821_v56  ;;  %v2439_v3 = vmul.f32 %v2176_v18, %v822_v58  ;;  %v2442_v49 = vmul.f32 %v2176_v18, %v823_v61 }
 0x24d   :  { %v929_v19 = vadd.f32 %v2222_v5, %v861_v30  ;;  %v2446_v40 = vmul.f32 %v2176_v18, %v824_v39  ;;  %v2449_v33 = vmul.f32 %v2176_v18, %v825_v63  ;;  %v2452_v46 = vmul.f32 %v2176_v18, %v826_v24 }
 0x24e   :  { %v930_v50 = vadd.f32 %v2222_v5, %v862_v12  ;;  %v2456_v60 = vmul.f32 %v2176_v18, %v827_v14  ;;  %v2459_v53 = vmul.f32 %v2176_v18, %v828_v15  ;;  %v2462_v56 = vmul.f32 %v2176_v18, %v829_v41 }
 0x24f   :  { %v931_v58 = vadd.f32 %v2222_v5, %v863_v16  ;;  %v2466_v61 = vmul.f32 %v2176_v18, %v830_v34  ;;  %v2469_v39 = vmul.f32 %v2176_v18, %v831_v25  ;;  %v2472_v63 = vmul.f32 %v2176_v18, %v832_v22 }
 0x250   :  { %v932_v24 = vadd.f32 %v2222_v5, %v864_v7  ;;  %v2476_v14 = vmul.f32 %v2176_v18, %v833_v0  ;;  %v2479_v15 = vmul.f32 %v2176_v18, %v834_v52  ;;  %v933_v41 = vadd.f32 %v2222_v5, %v865_v13 }
 0x251   :  { %v1057_v16 = vmul.f32 0.1, %v929_v19  ;;  %v2483_v34 = vmul.f32 %v2176_v18, %v835_v57  ;;  %v934_v17 = vadd.f32 %v2222_v5, %v866_v4  ;;  %vm993_vm5 = vcmp.gt.f32.partialorder %v929_v19, 0.0 }
 0x252   :  { %v1058_v25 = vmul.f32 0.1, %v930_v50  ;;  %v2487_v22 = vmul.f32 %v2176_v18, %v836_v27  ;;  %v935_v2 = vadd.f32 %v2222_v5, %v867_v54  ;;  %vm994_vm6 = vcmp.gt.f32.partialorder %v930_v50, 0.0 }
 0x253   :  { %v1059_v0 = vmul.f32 0.1, %v931_v58  ;;  %v2491_v52 = vmul.f32 %v2176_v18, %v837_v6  ;;  %v936_v30 = vadd.f32 %v2222_v5, %v868_v10  ;;  %vm995_vm7 = vcmp.gt.f32.partialorder %v931_v58, 0.0 }
 0x254   :  { %v1060_v12 = vmul.f32 0.1, %v932_v24  ;;  %v937_v57 = vadd.f32 %v2222_v5, %v869_v47  ;;  %vm996_vm8 = vcmp.gt.f32.partialorder %v932_v24, 0.0  ;;  %v1061_v7 = vmul.f32 0.1, %v933_v41 }
 0x255   :  { %v1121_v13 = vsel %vm993_vm5, %v929_v19, %v1057_v16  ;;  %v938_v4 = vadd.f32 %v2222_v5, %v870_v51  ;;  %vm997_vm9 = vcmp.gt.f32.partialorder %v933_v41, 0.0  ;;  %v1062_v27 = vmul.f32 0.1, %v934_v17 }
 0x256   :  { %v1122_v32 = vsel %vm994_vm6, %v930_v50, %v1058_v25  ;;  %v939_v54 = vadd.f32 %v2222_v5, %v871_v11  ;;  %vm998_vm10 = vcmp.gt.f32.partialorder %v934_v17, 0.0  ;;  %v1063_v62 = vmul.f32 0.1, %v935_v2  ;;  %1185 = vst [vmem:[%s2844_s4 + $0x8] sm:$0xff] %v1121_v13 }
 0x257   :  { %v1123_v18 = vsel %vm995_vm7, %v931_v58, %v1059_v0  ;;  %v940_v6 = vadd.f32 %v2222_v5, %v872_v37  ;;  %vm999_vm11 = vcmp.gt.f32.partialorder %v935_v2, 0.0  ;;  %v1064_v10 = vmul.f32 0.1, %v936_v30  ;;  %1186 = vst [vmem:[%s2844_s4 + $0x10] sm:$0xff] %v1122_v32 }
 0x258   :  { %v1124_v23 = vsel %vm996_vm8, %v932_v24, %v1060_v12  ;;  %v941_v47 = vadd.f32 %v2222_v5, %v2388_v38  ;;  %vm1000_vm12 = vcmp.gt.f32.partialorder %v936_v30, 0.0  ;;  %v1065_v51 = vmul.f32 0.1, %v937_v57  ;;  %1187 = vst [vmem:[%s2844_s4 + $0x18] sm:$0xff] %v1123_v18 }
 0x259   :  { %v1125_v19 = vsel %vm997_vm9, %v933_v41, %v1061_v7  ;;  %v942_v11 = vadd.f32 %v2222_v5, %v2391_v35  ;;  %vm1001_vm13 = vcmp.gt.f32.partialorder %v937_v57, 0.0  ;;  %v1066_v37 = vmul.f32 0.1, %v938_v4  ;;  %1188 = vst [vmem:[%s2844_s4 + $0x20] sm:$0xff] %v1124_v23 }
 0x25a   :  { %v1126_v50 = vsel %vm998_vm10, %v934_v17, %v1062_v27  ;;  %v943_v38 = vadd.f32 %v2222_v5, %v2394_v55  ;;  %vm1002_vm14 = vcmp.gt.f32.partialorder %v938_v4, 0.0  ;;  %v1067_v58 = vmul.f32 0.1, %v939_v54  ;;  %1189 = vst [vmem:[%s2844_s4 + $0x28] sm:$0xff] %v1125_v19 }
 0x25b   :  { %v1127_v24 = vsel %vm999_vm11, %v935_v2, %v1063_v62  ;;  %v944_v32 = vadd.f32 %v2222_v5, %v2397_v28  ;;  %vm1003_vm15 = vcmp.gt.f32.partialorder %v939_v54, 0.0  ;;  %v1068_v35 = vmul.f32 0.1, %v940_v6  ;;  %1190 = vst [vmem:[%s2844_s4 + $0x30] sm:$0xff] %v1126_v50 }
 0x25c   :  { %v1128_v41 = vsel %vm1000_vm12, %v936_v30, %v1064_v10  ;;  %v945_v55 = vadd.f32 %v2222_v5, %v2400_v29  ;;  %vm1004_vm0 = vcmp.gt.f32.partialorder %v940_v6, 0.0  ;;  %v1069_v62 = vmul.f32 0.1, %v941_v47  ;;  %1191 = vst [vmem:[%s2844_s4 + $0x38] sm:$0xff] %v1127_v24 }
 0x25d   :  { %v1129_v16 = vsel %vm1001_vm13, %v937_v57, %v1065_v51  ;;  %v946_v23 = vadd.f32 %v2222_v5, %v2403_v20  ;;  %vm1005_vm1 = vcmp.gt.f32.partialorder %v941_v47, 0.0  ;;  %v1070_v28 = vmul.f32 0.1, %v942_v11  ;;  %1192 = vst [vmem:[%s2844_s4 + $0x40] sm:$0xff] %v1128_v41 }
 0x25e   :  { %v1130_v17 = vsel %vm1002_vm14, %v938_v4, %v1066_v37  ;;  %v947_v29 = vadd.f32 %v2222_v5, %v2406_v43  ;;  %vm1006_vm2 = vcmp.gt.f32.partialorder %v942_v11, 0.0  ;;  %v1071_v25 = vmul.f32 0.1, %v943_v38  ;;  %1193 = vst [vmem:[%s2844_s4 + $0x48] sm:$0xff] %v1129_v16 }
 0x25f   :  { %v1131_v2 = vsel %vm1003_vm15, %v939_v54, %v1067_v58  ;;  %v948_v20 = vadd.f32 %v2222_v5, %v2409_v36  ;;  %vm1007_vm3 = vcmp.gt.f32.partialorder %v943_v38, 0.0  ;;  %v1072_v0 = vmul.f32 0.1, %v944_v32  ;;  %1194 = vst [vmem:[%s2844_s4 + $0x50] sm:$0xff] %v1130_v17 }
 0x260   :  { %v1132_v30 = vsel %vm1004_vm0, %v940_v6, %v1068_v35  ;;  %v949_v43 = vadd.f32 %v2222_v5, %v2412_v42  ;;  %vm1008_vm4 = vcmp.gt.f32.partialorder %v944_v32, 0.0  ;;  %v1073_v12 = vmul.f32 0.1, %v945_v55  ;;  %1195 = vst [vmem:[%s2844_s4 + $0x58] sm:$0xff] %v1131_v2 }
 0x261   :  { %v1133_v57 = vsel %vm1005_vm1, %v941_v47, %v1069_v62  ;;  %v950_v36 = vadd.f32 %v2222_v5, %v2415_v44  ;;  %vm1009_vm5 = vcmp.gt.f32.partialorder %v945_v55, 0.0  ;;  %v1074_v7 = vmul.f32 0.1, %v946_v23  ;;  %1196 = vst [vmem:[%s2844_s4 + $0x60] sm:$0xff] %v1132_v30 }
 0x262   :  { %v1134_v13 = vsel %vm1006_vm2, %v942_v11, %v1070_v28  ;;  %v951_v42 = vadd.f32 %v2222_v5, %v2418_v45  ;;  %vm1010_vm6 = vcmp.gt.f32.partialorder %v946_v23, 0.0  ;;  %v1075_v4 = vmul.f32 0.1, %v947_v29  ;;  %1197 = vst [vmem:[%s2844_s4 + $0x68] sm:$0xff] %v1133_v57 }
 0x263   :  { %v1135_v27 = vsel %vm1007_vm3, %v943_v38, %v1071_v25  ;;  %v952_v44 = vadd.f32 %v2222_v5, %v2421_v31  ;;  %vm1011_vm7 = vcmp.gt.f32.partialorder %v947_v29, 0.0  ;;  %v1076_v54 = vmul.f32 0.1, %v948_v20  ;;  %1198 = vst [vmem:[%s2844_s4 + $0x70] sm:$0xff] %v1134_v13 }
 0x264   :  { %v1136_v18 = vsel %vm1008_vm4, %v944_v32, %v1072_v0  ;;  %v953_v45 = vadd.f32 %v2222_v5, %v2424_v48  ;;  %vm1012_vm8 = vcmp.gt.f32.partialorder %v948_v20, 0.0  ;;  %v1077_v6 = vmul.f32 0.1, %v949_v43  ;;  %1199 = vst [vmem:[%s2844_s4 + $0x78] sm:$0xff] %v1135_v27 }
 0x265   :  { %v1137_v10 = vsel %vm1009_vm5, %v945_v55, %v1073_v12  ;;  %v954_v31 = vadd.f32 %v2222_v5, %v2427_v9  ;;  %vm1013_vm9 = vcmp.gt.f32.partialorder %v949_v43, 0.0  ;;  %v1078_v47 = vmul.f32 0.1, %v950_v36  ;;  %1200 = vst [vmem:[%s2844_s4 + $0x80] sm:$0xff] %v1136_v18 }
 0x266   :  { %v1138_v51 = vsel %vm1010_vm6, %v946_v23, %v1074_v7  ;;  %v955_v48 = vadd.f32 %v2222_v5, %v2430_v8  ;;  %vm1014_vm10 = vcmp.gt.f32.partialorder %v950_v36, 0.0  ;;  %v1079_v19 = vmul.f32 0.1, %v951_v42  ;;  %1201 = vst [vmem:[%s2844_s4 + $0x88] sm:$0xff] %v1137_v10 }
 0x267   :  { %v1139_v11 = vsel %vm1011_vm7, %v947_v29, %v1075_v4  ;;  %v956_v9 = vadd.f32 %v2222_v5, %v2433_v26  ;;  %vm1015_vm11 = vcmp.gt.f32.partialorder %v951_v42, 0.0  ;;  %v1080_v37 = vmul.f32 0.1, %v952_v44  ;;  %1202 = vst [vmem:[%s2844_s4 + $0x90] sm:$0xff] %v1138_v51 }
 0x268   :  { %v1140_v50 = vsel %vm1012_vm8, %v948_v20, %v1076_v54  ;;  %v957_v8 = vadd.f32 %v2222_v5, %v2436_v21  ;;  %vm1016_vm12 = vcmp.gt.f32.partialorder %v952_v44, 0.0  ;;  %v1081_v38 = vmul.f32 0.1, %v953_v45  ;;  %1203 = vst [vmem:[%s2844_s4 + $0x98] sm:$0xff] %v1139_v11 }
 0x269   :  { %v1141_v58 = vsel %vm1013_vm9, %v949_v43, %v1077_v6  ;;  %v958_v26 = vadd.f32 %v2222_v5, %v2439_v3  ;;  %vm1017_vm13 = vcmp.gt.f32.partialorder %v953_v45, 0.0  ;;  %v1082_v24 = vmul.f32 0.1, %v954_v31  ;;  %1204 = vst [vmem:[%s2844_s4 + $0xa0] sm:$0xff] %v1140_v50 }
 0x26a   :  { %v1142_v32 = vsel %vm1014_vm10, %v950_v36, %v1078_v47  ;;  %v959_v21 = vadd.f32 %v2222_v5, %v2442_v49  ;;  %vm1018_vm14 = vcmp.gt.f32.partialorder %v954_v31, 0.0  ;;  %v1083_v35 = vmul.f32 0.1, %v955_v48  ;;  %1205 = vst [vmem:[%s2844_s4 + $0xa8] sm:$0xff] %v1141_v58 }
 0x26b   :  { %v1143_v41 = vsel %vm1015_vm11, %v951_v42, %v1079_v19  ;;  %v960_v3 = vadd.f32 %v2222_v5, %v2446_v40  ;;  %vm1019_vm15 = vcmp.gt.f32.partialorder %v955_v48, 0.0  ;;  %v1084_v55 = vmul.f32 0.1, %v956_v9  ;;  %1206 = vst [vmem:[%s2844_s4 + $0xb0] sm:$0xff] %v1142_v32 }
 0x26c   :  { %v1144_v62 = vsel %vm1016_vm12, %v952_v44, %v1080_v37  ;;  %v961_v49 = vadd.f32 %v2222_v5, %v2449_v33  ;;  %vm1020_vm0 = vcmp.gt.f32.partialorder %v956_v9, 0.0  ;;  %v1085_v16 = vmul.f32 0.1, %v957_v8  ;;  %1207 = vst [vmem:[%s2844_s4 + $0xb8] sm:$0xff] %v1143_v41 }
 0x26d   :  { %v1145_v23 = vsel %vm1017_vm13, %v953_v45, %v1081_v38  ;;  %v962_v40 = vadd.f32 %v2222_v5, %v2452_v46  ;;  %vm1021_vm1 = vcmp.gt.f32.partialorder %v957_v8, 0.0  ;;  %v1086_v28 = vmul.f32 0.1, %v958_v26  ;;  %1208 = vst [vmem:[%s2844_s4 + $0xc0] sm:$0xff] %v1144_v62  ;;  %v2991_v38 = vld [vmem:[#allocation4_spill] sm:$0xff] }
 0x26e   :  { %v1146_v17 = vsel %vm1018_vm14, %v954_v31, %v1082_v24  ;;  %v963_v33 = vadd.f32 %v2222_v5, %v2456_v60  ;;  %vm1022_vm2 = vcmp.gt.f32.partialorder %v958_v26, 0.0  ;;  %v1087_v29 = vmul.f32 0.1, %v959_v21  ;;  %1209 = vst [vmem:[%s2844_s4 + $0xc8] sm:$0xff] %v1145_v23  ;;  %v2992_v24 = vld [vmem:[#allocation8_spill] sm:$0xff] }
 0x26f   :  { %v1147_v25 = vsel %vm1019_vm15, %v955_v48, %v1083_v35  ;;  %v964_v46 = vadd.f32 %v2222_v5, %v2459_v53  ;;  %vm1023_vm3 = vcmp.gt.f32.partialorder %v959_v21, 0.0  ;;  %v1088_v2 = vmul.f32 0.1, %v960_v3  ;;  %1210 = vst [vmem:[%s2844_s4 + $0xd0] sm:$0xff] %v1146_v17  ;;  %v2993_v35 = vld [vmem:[#allocation9_spill] sm:$0xff]  ;;  %v2997_v17 = vld [vmem:[#allocation16_spill] sm:$0xff] }
 0x270   :  { %v1148_v20 = vsel %vm1020_vm0, %v956_v9, %v1084_v55  ;;  %v965_v60 = vadd.f32 %v2222_v5, %v2462_v56  ;;  %vm1024_vm4 = vcmp.gt.f32.partialorder %v960_v3, 0.0  ;;  %v1089_v0 = vmul.f32 0.1, %v961_v49  ;;  %1211 = vst [vmem:[%s2844_s4 + $0xd8] sm:$0xff] %v1147_v25  ;;  %v2994_v55 = vld [vmem:[#allocation10_spill] sm:$0xff]  ;;  %v2998_v25 = vld [vmem:[#allocation17_spill] sm:$0xff] }
 0x271   :  { %v1149_v30 = vsel %vm1021_vm1, %v957_v8, %v1085_v16  ;;  %v966_v53 = vadd.f32 %v2222_v5, %v2466_v61  ;;  %vm1025_vm5 = vcmp.gt.f32.partialorder %v961_v49, 0.0  ;;  %v1090_v43 = vmul.f32 0.1, %v962_v40  ;;  %1212 = vst [vmem:[%s2844_s4 + $0xe0] sm:$0xff] %v1148_v20  ;;  %v2995_v16 = vld [vmem:[#allocation12_spill] sm:$0xff]  ;;  %v2999_v20 = vld [vmem:[#allocation18_spill] sm:$0xff] }
 0x272   :  { %v1150_v12 = vsel %vm1022_vm2, %v958_v26, %v1086_v28  ;;  %v967_v56 = vadd.f32 %v2222_v5, %v2469_v39  ;;  %vm1026_vm6 = vcmp.gt.f32.partialorder %v962_v40, 0.0  ;;  %v1091_v57 = vmul.f32 0.1, %v963_v33  ;;  %1213 = vst [vmem:[%s2844_s4 + $0xe8] sm:$0xff] %v1149_v30  ;;  %v3000_v30 = vld [vmem:[#allocation32_spill] sm:$0xff] }
 0x273   :  { %v1151_v36 = vsel %vm1023_vm3, %v959_v21, %v1087_v29  ;;  %v968_v61 = vadd.f32 %v2222_v5, %v2472_v63  ;;  %vm1027_vm7 = vcmp.gt.f32.partialorder %v963_v33, 0.0  ;;  %v1092_v7 = vmul.f32 0.1, %v964_v46  ;;  %1214 = vst [vmem:[%s2844_s4 + $0xf0] sm:$0xff] %v1150_v12  ;;  %v3001_v12 = vld [vmem:[#allocation33_spill] sm:$0xff] }
 0x274   :  { %v1152_v13 = vsel %vm1024_vm4, %v960_v3, %v1088_v2  ;;  %v969_v39 = vadd.f32 %v2222_v5, %v2476_v14  ;;  %vm1028_vm8 = vcmp.gt.f32.partialorder %v964_v46, 0.0  ;;  %v1093_v42 = vmul.f32 0.1, %v965_v60  ;;  %1215 = vst [vmem:[%s2844_s4 + $0xf8] sm:$0xff] %v1151_v36  ;;  %v3002_v36 = vld [vmem:[#allocation34_spill] sm:$0xff] }
 0x275   :  { %v1153_v4 = vsel %vm1025_vm5, %v961_v49, %v1089_v0  ;;  %v970_v63 = vadd.f32 %v2222_v5, %v2479_v15  ;;  %vm1029_vm9 = vcmp.gt.f32.partialorder %v965_v60, 0.0  ;;  %v1094_v27 = vmul.f32 0.1, %v966_v53  ;;  %1216 = vst [vmem:[%s2844_s4 + $0x100] sm:$0xff] %v1152_v13  ;;  %v3003_v13 = vld [vmem:[#allocation35_spill] sm:$0xff] }
 0x276   :  { %v1154_v44 = vsel %vm1026_vm6, %v962_v40, %v1090_v43  ;;  %v971_v14 = vadd.f32 %v2222_v5, %v2483_v34  ;;  %vm1030_vm10 = vcmp.gt.f32.partialorder %v966_v53, 0.0  ;;  %v1095_v54 = vmul.f32 0.1, %v967_v56  ;;  %1217 = vst [vmem:[%s2844_s4 + $0x108] sm:$0xff] %v1153_v4  ;;  %v2996_v40 = vld [vmem:[#allocation15_spill] sm:$0xff]  ;;  %v3004_v4 = vld [vmem:[#allocation36_spill] sm:$0xff] }
 0x277   :  { %v1155_v18 = vsel %vm1027_vm7, %v963_v33, %v1091_v57  ;;  %v972_v15 = vadd.f32 %v2222_v5, %v2487_v22  ;;  %vm1031_vm11 = vcmp.gt.f32.partialorder %v967_v56, 0.0  ;;  %v1096_v45 = vmul.f32 0.1, %v968_v61  ;;  %1218 = vst [vmem:[%s2844_s4 + $0x110] sm:$0xff] %v1154_v44  ;;  %v3005_v44 = vld [vmem:[#allocation37_spill] sm:$0xff] }
 0x278   :  { %v1156_v6 = vsel %vm1028_vm8, %v964_v46, %v1092_v7  ;;  %v973_v34 = vadd.f32 %v2222_v5, %v2491_v52  ;;  %vm1032_vm12 = vcmp.gt.f32.partialorder %v968_v61, 0.0  ;;  %v1097_v10 = vmul.f32 0.1, %v969_v39  ;;  %1219 = vst [vmem:[%s2844_s4 + $0x118] sm:$0xff] %v1155_v18  ;;  %v3006_v18 = vld [vmem:[#allocation38_spill] sm:$0xff] }
 0x279   :  { %v1157_v31 = vsel %vm1029_vm9, %v965_v60, %v1093_v42  ;;  %vm1033_vm13 = vcmp.gt.f32.partialorder %v969_v39, 0.0  ;;  %v1098_v22 = vmul.f32 0.1, %v970_v63  ;;  %v1158_v47 = vsel %vm1030_vm10, %v966_v53, %v1094_v27  ;;  %1220 = vst [vmem:[%s2844_s4 + $0x120] sm:$0xff] %v1156_v6 }
 0x27a   :  { %vm1034_vm14 = vcmp.gt.f32.partialorder %v970_v63, 0.0  ;;  %v1099_v51 = vmul.f32 0.1, %v971_v14  ;;  %v1159_v48 = vsel %vm1031_vm11, %v967_v56, %v1095_v54  ;;  %vm1035_vm15 = vcmp.gt.f32.partialorder %v971_v14, 0.0  ;;  %1221 = vst [vmem:[%s2844_s4 + $0x128] sm:$0xff] %v1157_v31 }
 0x27b   :  { %v1100_v5 = vmul.f32 0.1, %v972_v15  ;;  %v1160_v52 = vsel %vm1032_vm12, %v968_v61, %v1096_v45  ;;  %vm1036_vm0 = vcmp.gt.f32.partialorder %v972_v15, 0.0  ;;  %v1101_v19 = vmul.f32 0.1, %v973_v34  ;;  %1222 = vst [vmem:[%s2844_s4 + $0x130] sm:$0xff] %v1158_v47 }
 0x27c   :  { %v1161_v11 = vsel %vm1033_vm13, %v969_v39, %v1097_v10  ;;  %vm1037_vm1 = vcmp.gt.f32.partialorder %v973_v34, 0.0  ;;  %v1102_v9 = vmul.f32 0.1, %v2225_v1  ;;  %v1162_v37 = vsel %vm1034_vm14, %v970_v63, %v1098_v22  ;;  %1223 = vst [vmem:[%s2844_s4 + $0x138] sm:$0xff] %v1159_v48 }
 0x27d   :  { %vm1038_vm2 = vcmp.gt.f32.partialorder %v2225_v1, 0.0  ;;  %v1103_v50 = vmul.f32 0.1, %v2228_v59  ;;  %v1163_v8 = vsel %vm1035_vm15, %v971_v14, %v1099_v51  ;;  %1224 = vst [vmem:[%s2844_s4 + $0x140] sm:$0xff] %v1160_v52  ;;  %vm1039_vm3 = vcmp.gt.f32.partialorder %v2228_v59, 0.0 }
 0x27e   :  { %v1104_v58 = vmul.f32 0.1, %v2991_v38  ;;  %v1164_v26 = vsel %vm1036_vm0, %v972_v15, %v1100_v5  ;;  %1225 = vst [vmem:[%s2844_s4 + $0x148] sm:$0xff] %v1161_v11  ;;  %vm1040_vm4 = vcmp.gt.f32.partialorder %v2991_v38, 0.0  ;;  %v1105_v32 = vmul.f32 0.1, %v2992_v24 }
 0x27f   :  { %v1165_v21 = vsel %vm1037_vm1, %v973_v34, %v1101_v19  ;;  %1226 = vst [vmem:[%s2844_s4 + $0x150] sm:$0xff] %v1162_v37  ;;  %vm1041_vm5 = vcmp.gt.f32.partialorder %v2992_v24, 0.0  ;;  %v1106_v41 = vmul.f32 0.1, %v2993_v35  ;;  %v1166_v3 = vsel %vm1038_vm2, %v2225_v1, %v1102_v9 }
 0x280   :  { %1227 = vst [vmem:[%s2844_s4 + $0x158] sm:$0xff] %v1163_v8  ;;  %vm1042_vm6 = vcmp.gt.f32.partialorder %v2993_v35, 0.0  ;;  %v1107_v62 = vmul.f32 0.1, %v2994_v55  ;;  %v1167_v49 = vsel %vm1039_vm3, %v2228_v59, %v1103_v50  ;;  %vm1043_vm7 = vcmp.gt.f32.partialorder %v2994_v55, 0.0 }
 0x281   :  { %1228 = vst [vmem:[%s2844_s4 + $0x160] sm:$0xff] %v1164_v26  ;;  %v1108_v23 = vmul.f32 0.1, %v2995_v16  ;;  %v1168_v1 = vsel %vm1040_vm4, %v2991_v38, %v1104_v58  ;;  %vm1044_vm8 = vcmp.gt.f32.partialorder %v2995_v16, 0.0  ;;  %v1109_v28 = vmul.f32 0.1, %v2996_v40 }
 0x282   :  { %1229 = vst [vmem:[%s2844_s4 + $0x168] sm:$0xff] %v1165_v21  ;;  %v1169_v59 = vsel %vm1041_vm5, %v2992_v24, %v1105_v32  ;;  %vm1045_vm9 = vcmp.gt.f32.partialorder %v2996_v40, 0.0  ;;  %v1110_v33 = vmul.f32 0.1, %v2997_v17  ;;  %v1170_v29 = vsel %vm1042_vm6, %v2993_v35, %v1106_v41 }
 0x283   :  { %1230 = vst [vmem:[%s2844_s4 + $0x170] sm:$0xff] %v1166_v3  ;;  %vm1046_vm10 = vcmp.gt.f32.partialorder %v2997_v17, 0.0  ;;  %v1111_v46 = vmul.f32 0.1, %v2998_v25  ;;  %v1171_v2 = vsel %vm1043_vm7, %v2994_v55, %v1107_v62  ;;  %vm1047_vm11 = vcmp.gt.f32.partialorder %v2998_v25, 0.0 }
 0x284   :  { %1231 = vst [vmem:[%s2844_s4 + $0x178] sm:$0xff] %v1167_v49  ;;  %v1112_v60 = vmul.f32 0.1, %v2999_v20  ;;  %v1172_v0 = vsel %vm1044_vm8, %v2995_v16, %v1108_v23  ;;  %vm1048_vm12 = vcmp.gt.f32.partialorder %v2999_v20, 0.0  ;;  %v1113_v53 = vmul.f32 0.1, %v3000_v30 }
 0x285   :  { %1232 = vst [vmem:[%s2844_s4 + $0x180] sm:$0xff] %v1168_v1  ;;  %v1173_v43 = vsel %vm1045_vm9, %v2996_v40, %v1109_v28  ;;  %vm1049_vm13 = vcmp.gt.f32.partialorder %v3000_v30, 0.0  ;;  %v1114_v56 = vmul.f32 0.1, %v3001_v12  ;;  %v1174_v57 = vsel %vm1046_vm10, %v2997_v17, %v1110_v33 }
 0x286   :  { %1233 = vst [vmem:[%s2844_s4 + $0x188] sm:$0xff] %v1169_v59  ;;  %vm1050_vm14 = vcmp.gt.f32.partialorder %v3001_v12, 0.0  ;;  %v1115_v61 = vmul.f32 0.1, %v3002_v36  ;;  %v1175_v7 = vsel %vm1047_vm11, %v2998_v25, %v1111_v46  ;;  %vm1051_vm15 = vcmp.gt.f32.partialorder %v3002_v36, 0.0 }
 0x287   :  { %1234 = vst [vmem:[%s2844_s4 + $0x190] sm:$0xff] %v1170_v29  ;;  %v1116_v39 = vmul.f32 0.1, %v3003_v13  ;;  %v1176_v42 = vsel %vm1048_vm12, %v2999_v20, %v1112_v60  ;;  %vm1052_vm0 = vcmp.gt.f32.partialorder %v3003_v13, 0.0  ;;  %v1117_v63 = vmul.f32 0.1, %v3004_v4 }
 0x288   :  { %1235 = vst [vmem:[%s2844_s4 + $0x198] sm:$0xff] %v1171_v2  ;;  %v1177_v27 = vsel %vm1049_vm13, %v3000_v30, %v1113_v53  ;;  %vm1053_vm1 = vcmp.gt.f32.partialorder %v3004_v4, 0.0  ;;  %v1118_v14 = vmul.f32 0.1, %v3005_v44  ;;  %v1178_v54 = vsel %vm1050_vm14, %v3001_v12, %v1114_v56 }
 0x289   :  { %1236 = vst [vmem:[%s2844_s4 + $0x1a0] sm:$0xff] %v1172_v0  ;;  %vm1054_vm2 = vcmp.gt.f32.partialorder %v3005_v44, 0.0  ;;  %v1119_v15 = vmul.f32 0.1, %v3006_v18  ;;  %v1179_v45 = vsel %vm1051_vm15, %v3002_v36, %v1115_v61  ;;  %vm1055_vm3 = vcmp.gt.f32.partialorder %v3006_v18, 0.0 }
 0x28a   :  { %1237 = vst [vmem:[%s2844_s4 + $0x1a8] sm:$0xff] %v1173_v43  ;;  %v1180_v6 = vsel %vm1052_vm0, %v3003_v13, %v1116_v39  ;;  %v1181_v34 = vsel %vm1053_vm1, %v3004_v4, %v1117_v63  ;;  %v1182_v10 = vsel %vm1054_vm2, %v3005_v44, %v1118_v14 }
 0x28b   :  { %1238 = vst [vmem:[%s2844_s4 + $0x1b0] sm:$0xff] %v1174_v57  ;;  %v1183_v31 = vsel %vm1055_vm3, %v3006_v18, %v1119_v15 }
 0x28c   :  { %1239 = vst [vmem:[%s2844_s4 + $0x1b8] sm:$0xff] %v1175_v7 }
 0x28d   :  { %1240 = vst [vmem:[%s2844_s4 + $0x1c0] sm:$0xff] %v1176_v42 }
 0x28e   :  { %1241 = vst [vmem:[%s2844_s4 + $0x1c8] sm:$0xff] %v1177_v27 }
 0x28f   :  { %1242 = vst [vmem:[%s2844_s4 + $0x1d0] sm:$0xff] %v1178_v54 }
 0x290   :  { %1243 = vst [vmem:[%s2844_s4 + $0x1d8] sm:$0xff] %v1179_v45 }
 0x291   :  { %1244 = vst [vmem:[%s2844_s4 + $0x1e0] sm:$0xff] %v1180_v6 }
 0x292   :  { %1245 = vst [vmem:[%s2844_s4 + $0x1e8] sm:$0xff] %v1181_v34 }
 0x293   :  { %1246 = vst [vmem:[%s2844_s4 + $0x1f0] sm:$0xff] %v1182_v10 }
 0x294   :  { %1247 = vst [vmem:[%s2844_s4 + $0x1f8] sm:$0xff] %v1183_v31 }

// kernel: forward.10
= control target key start
LH: loop header
LB: loop body
LE: loop exit
PB: predicated region body
PF: predicated region fallthrough
CT: control target
= control target key end

     0   :  { %v523_v37 = vmov 128.0   ;;  %s712_s1 = inlined_call_operand.vmem [shape: bf16[128,128], index: 1, kind: input, shape index: {}]   ;;  %s713_s0 = inlined_call_operand.vmem [shape: bf16[128,128], index: 0, kind: input, shape index: {}]   ;;  %s714_s2 = inlined_call_operand.vmem [shape: f32[1,128], index: 2, kind: input, shape index: {}]   ;;  %s715_s3 = inlined_call_operand.vmem [shape: f32[1,128], index: 3, kind: input, shape index: {}]   ;;  %s716_s4 = inlined_call_operand.vmem [shape: f32[128,128], index: 4, kind: output, shape index: {}]  }
   0x1   :  { %v491_v0 = vld [vmem:[%s712_s1 + $0x38] sm:$0xff]  ;;  %v490_v1 = vld [vmem:[%s712_s1 + $0x30] sm:$0xff]  ;;  %v489_v2 = vld [vmem:[%s712_s1 + $0x28] sm:$0xff]  ;;  %519 = vrcp.f32 %v523_v37 }
   0x2   :  { %145 = vmatpush.bf16.msra.mxu0 %v491_v0  ;;  %492 = vmatpush.bf16.msra.mxu1 %v491_v0  ;;  %v488_v3 = vld [vmem:[%s712_s1 + $0x20] sm:$0xff]  ;;  %v487_v4 = vld [vmem:[%s712_s1 + $0x18] sm:$0xff]  ;;  %v486_v5 = vld [vmem:[%s712_s1 + $0x10] sm:$0xff] }
   0x3   :  { %493 = vmatpush.bf16.msra.mxu2 %v491_v0  ;;  %494 = vmatpush.bf16.msra.mxu3 %v491_v0  ;;  %v485_v6 = vld [vmem:[%s712_s1 + $0x8] sm:$0xff]  ;;  %v484_v7 = vld [vmem:[%s712_s1] sm:$0xff]  ;;  %v478_v9 = vld [vmem:[%s713_s0 + $0x10] sm:$0xff] }
   0x4   :  { %v476_v8 = vld [vmem:[%s713_s0] sm:$0xff]  ;;  %v482_v11 = vld [vmem:[%s713_s0 + $0x30] sm:$0xff]  ;;  %v477_v12 = vld [vmem:[%s713_s0 + $0x8] sm:$0xff] }
   0x5   :  { %v480_v10 = vld [vmem:[%s713_s0 + $0x20] sm:$0xff]  ;;  %v479_v13 = vld [vmem:[%s713_s0 + $0x18] sm:$0xff]  ;;  %v481_v14 = vld [vmem:[%s713_s0 + $0x28] sm:$0xff] }
   0x6   :  { %146 = vmatpush.bf16.msra.mxu0 %v490_v1  ;;  %495 = vmatpush.bf16.msra.mxu1 %v490_v1  ;;  %v483_v15 = vld [vmem:[%s713_s0 + $0x38] sm:$0xff] }
   0x7   :  { %496 = vmatpush.bf16.msra.mxu2 %v490_v1  ;;  %497 = vmatpush.bf16.msra.mxu3 %v490_v1  ;;  %v520_v42 = vpop.eup %519 }
   0x8   :  { %v216_v45 = vmul.f32 128.0, %v520_v42  ;;  %vm220_vm0 = vweird.f32 %v520_v42 }
   0xa   :  { %147 = vmatpush.bf16.msra.mxu0 %v489_v2  ;;  %498 = vmatpush.bf16.msra.mxu1 %v489_v2  ;;  %v217_v49 = vsub.f32 1.0, %v216_v45 }
   0xb   :  { %499 = vmatpush.bf16.msra.mxu2 %v489_v2  ;;  %500 = vmatpush.bf16.msra.mxu3 %v489_v2 }
   0xc   :  { %v218_v52 = vmul.f32 %v520_v42, %v217_v49 }
   0xe   :  { %148 = vmatpush.bf16.msra.mxu0 %v488_v3  ;;  %501 = vmatpush.bf16.msra.mxu1 %v488_v3  ;;  %v219_v55 = vadd.f32 %v520_v42, %v218_v52 }
   0xf   :  { %502 = vmatpush.bf16.msra.mxu2 %v488_v3  ;;  %503 = vmatpush.bf16.msra.mxu3 %v488_v3 }
  0x10   :  { %v221_v58 = vsel %vm220_vm0, %v520_v42, %v219_v55 }
  0x12   :  { %149 = vmatpush.bf16.msra.mxu0 %v487_v4  ;;  %504 = vmatpush.bf16.msra.mxu1 %v487_v4 }
  0x13   :  { %505 = vmatpush.bf16.msra.mxu2 %v487_v4  ;;  %506 = vmatpush.bf16.msra.mxu3 %v487_v4 }
  0x16   :  { %150 = vmatpush.bf16.msra.mxu0 %v486_v5  ;;  %507 = vmatpush.bf16.msra.mxu1 %v486_v5 }
  0x17   :  { %508 = vmatpush.bf16.msra.mxu2 %v486_v5  ;;  %509 = vmatpush.bf16.msra.mxu3 %v486_v5 }
  0x1a   :  { %151 = vmatpush.bf16.msra.mxu0 %v485_v6  ;;  %510 = vmatpush.bf16.msra.mxu1 %v485_v6 }
  0x1b   :  { %511 = vmatpush.bf16.msra.mxu2 %v485_v6  ;;  %512 = vmatpush.bf16.msra.mxu3 %v485_v6 }
  0x1e   :  { %152 = vmatpush.bf16.msra.mxu0 %v484_v7  ;;  %513 = vmatpush.bf16.msra.mxu1 %v484_v7 }
  0x1f   :  { %514 = vmatpush.bf16.msra.mxu2 %v484_v7  ;;  %515 = vmatpush.bf16.msra.mxu3 %v484_v7 }
  0x21   :  { %153 = vmatmul.bf16.vlgmr.msra.gmra.mxu0 %v476_v8  ;;  %163 = vmatmul.bf16.vlgmr.msra.gmra.mxu1 %v478_v9 }
  0x22   :  { %173 = vmatmul.bf16.vlgmr.msra.gmra.mxu2 %v480_v10  ;;  %183 = vmatmul.bf16.vlgmr.msra.gmra.mxu3 %v482_v11 }
  0x31   :  { %158 = vmatmul.bf16.gmra.mxu0 %v477_v12  ;;  %168 = vmatmul.bf16.gmra.mxu1 %v479_v13 }
  0x32   :  { %178 = vmatmul.bf16.gmra.mxu2 %v481_v14  ;;  %188 = vmatmul.bf16.gmra.mxu3 %v483_v15 }
  0x9e   :  { %v154_v16 = vpop.f32.mrf.mxu0  ;;  %v164_v17 = vpop.f32.mrf.mxu1 }
  0xa5   :  { %v174_v19 = vpop.f32.mrf.mxu2  ;;  %v597_v22 = vpop.f32.mrf.mxu3 }
  0xa6   :  { %v156_v18 = vpop.f32.mrf.mxu0  ;;  %v166_v20 = vpop.f32.mrf.mxu1 }
  0xa7   :  { %v194_v24 = vadd.f32 %v156_v18, %v154_v16 }
  0xad   :  { %v176_v23 = vpop.f32.mrf.mxu2  ;;  %v599_v30 = vpop.f32.mrf.mxu3 }
  0xae   :  { %v159_v21 = vpop.f32.mrf.mxu0  ;;  %v169_v25 = vpop.f32.mrf.mxu1 }
  0xaf   :  { %v195_v26 = vadd.f32 %v194_v24, %v159_v21 }
  0xb5   :  { %v179_v32 = vpop.f32.mrf.mxu2  ;;  %v189_v39 = vpop.f32.mrf.mxu3 }
  0xb6   :  { %v161_v27 = vpop.f32.mrf.mxu0  ;;  %v171_v34 = vpop.f32.mrf.mxu1 }
  0xb7   :  { %v196_v28 = vadd.f32 %v195_v26, %v161_v27 }
  0xb9   :  { %v197_v29 = vadd.f32 %v196_v28, %v164_v17 }
  0xbb   :  { %v198_v31 = vadd.f32 %v197_v29, %v166_v20 }
  0xbd   :  { %v199_v33 = vadd.f32 %v198_v31, %v169_v25  ;;  %v181_v41 = vpop.f32.mrf.mxu2  ;;  %v191_v48 = vpop.f32.mrf.mxu3 }
  0xbf   :  { %v200_v35 = vadd.f32 %v199_v33, %v171_v34 }
  0xc1   :  { %v201_v36 = vadd.f32 %v200_v35, %v174_v19 }
  0xc3   :  { %v202_v38 = vadd.f32 %v201_v36, %v176_v23 }
  0xc5   :  { %v203_v40 = vadd.f32 %v202_v38, %v179_v32 }
  0xc7   :  { %v204_v43 = vadd.f32 %v203_v40, %v181_v41 }
  0xc9   :  { %v205_v44 = vadd.f32 %v204_v43, %v597_v22 }
  0xcb   :  { %v206_v46 = vadd.f32 %v205_v44, %v599_v30 }
  0xcd   :  { %v207_v47 = vadd.f32 %v206_v46, %v189_v39 }
  0xcf   :  { %v208_v50 = vadd.f32 %v207_v47, %v191_v48 }
  0xd1   :  { %v209_v51 = vrot.slane %v208_v50, 4 }
  0xd3   :  { %v210_v53 = vadd.f32 %v209_v51, %v208_v50 }
  0xd5   :  { %v211_v54 = vrot.slane %v210_v53, 2 }
  0xd7   :  { %v212_v56 = vadd.f32 %v211_v54, %v210_v53 }
  0xd9   :  { %v213_v57 = vrot.slane %v212_v56, 1 }
  0xdb   :  { %v214_v59 = vadd.f32 %v213_v57, %v212_v56 }
  0xdd   :  { %v222_v60 = vmul.f32 %v221_v58, %v214_v59 }
  0xdf   :  { %v603_v61 = vsub.f32 %v154_v16, %v222_v60  ;;  %v605_v62 = vsub.f32 %v156_v18, %v222_v60  ;;  %v607_v63 = vsub.f32 %v159_v21, %v222_v60  ;;  %v613_v2 = vsub.f32 %v161_v27, %v222_v60 }
  0xe0   :  { %v615_v3 = vsub.f32 %v164_v17, %v222_v60  ;;  %v619_v6 = vsub.f32 %v166_v20, %v222_v60  ;;  %v229_v9 = vsub.f32 %v169_v25, %v222_v60  ;;  %v230_v12 = vsub.f32 %v171_v34, %v222_v60 }
  0xe1   :  { %v239_v0 = vmul.f32 %v603_v61, %v603_v61  ;;  %v240_v1 = vmul.f32 %v605_v62, %v605_v62  ;;  %v241_v4 = vmul.f32 %v607_v63, %v607_v63  ;;  %v242_v7 = vmul.f32 %v613_v2, %v613_v2 }
  0xe2   :  { %v243_v10 = vmul.f32 %v615_v3, %v615_v3  ;;  %v244_v13 = vmul.f32 %v619_v6, %v619_v6  ;;  %v231_v15 = vsub.f32 %v174_v19, %v222_v60  ;;  %v245_v16 = vmul.f32 %v229_v9, %v229_v9 }
  0xe3   :  { %v255_v5 = vadd.f32 %v240_v1, %v239_v0  ;;  %v232_v18 = vsub.f32 %v176_v23, %v222_v60  ;;  %v246_v20 = vmul.f32 %v230_v12, %v230_v12  ;;  %v233_v24 = vsub.f32 %v179_v32, %v222_v60 }
  0xe4   :  { %v247_v26 = vmul.f32 %v231_v15, %v231_v15  ;;  %v234_v28 = vsub.f32 %v181_v41, %v222_v60  ;;  %v235_v31 = vsub.f32 %v597_v22, %v222_v60  ;;  %v236_v35 = vsub.f32 %v599_v30, %v222_v60 }
  0xe5   :  { %v256_v8 = vadd.f32 %v255_v5, %v241_v4  ;;  %v248_v25 = vmul.f32 %v232_v18, %v232_v18  ;;  %v249_v33 = vmul.f32 %v233_v24, %v233_v24  ;;  %v237_v19 = vsub.f32 %v189_v39, %v222_v60 }
  0xe6   :  { %v250_v36 = vmul.f32 %v234_v28, %v234_v28  ;;  %v251_v38 = vmul.f32 %v235_v31, %v235_v31  ;;  %v238_v23 = vsub.f32 %v191_v48, %v222_v60  ;;  %v252_v42 = vmul.f32 %v236_v35, %v236_v35 }
  0xe7   :  { %v257_v11 = vadd.f32 %v256_v8, %v242_v7  ;;  %v253_v32 = vmul.f32 %v237_v19, %v237_v19 }
  0xe8   :  { %v254_v45 = vmul.f32 %v238_v23, %v238_v23 }
  0xe9   :  { %v258_v14 = vadd.f32 %v257_v11, %v243_v10 }
  0xeb   :  { %v259_v17 = vadd.f32 %v258_v14, %v244_v13 }
  0xed   :  { %v260_v21 = vadd.f32 %v259_v17, %v245_v16 }
  0xef   :  { %v261_v27 = vadd.f32 %v260_v21, %v246_v20 }
  0xf1   :  { %v262_v29 = vadd.f32 %v261_v27, %v247_v26 }
  0xf3   :  { %v263_v34 = vadd.f32 %v262_v29, %v248_v25 }
  0xf5   :  { %v264_v37 = vadd.f32 %v263_v34, %v249_v33 }
  0xf7   :  { %v265_v40 = vadd.f32 %v264_v37, %v250_v36 }
  0xf9   :  { %v266_v43 = vadd.f32 %v265_v40, %v251_v38 }
  0xfb   :  { %v267_v44 = vadd.f32 %v266_v43, %v252_v42 }
  0xfd   :  { %v268_v41 = vadd.f32 %v267_v44, %v253_v32 }
  0xff   :  { %v269_v46 = vadd.f32 %v268_v41, %v254_v45 }
 0x101   :  { %v270_v47 = vrot.slane %v269_v46, 4 }
 0x103   :  { %v271_v49 = vadd.f32 %v270_v47, %v269_v46 }
 0x105   :  { %v272_v22 = vrot.slane %v271_v49, 2 }
 0x107   :  { %v273_v50 = vadd.f32 %v272_v22, %v271_v49 }
 0x109   :  { %v274_v51 = vrot.slane %v273_v50, 1 }
 0x10b   :  { %v275_v52 = vadd.f32 %v274_v51, %v273_v50 }
 0x10d   :  { %v276_v30 = vmul.f32 %v275_v52, %v221_v58  ;;  %v517_v58 = vld [vmem:[%s714_s2] ss:$0 sm:$0xff] }
 0x10f   :  { %v277_v53 = vadd.f32 1e-05, %v276_v30 }
 0x111   :  { %521 = vrsqrt.f32 %v277_v53  ;;  %vm284_vm2 = vweird.f32 %v277_v53 }
 0x117   :  { %v522_v39 = vpop.eup %521 }
 0x118   :  { %v279_v54 = vmul.f32 %v522_v39, %v277_v53  ;;  %vm285_vm1 = vweird.f32 %v522_v39 }
 0x119   :  { %vm286_vm3 = vmor %vm284_vm2, %vm285_vm1 }
 0x11a   :  { %v280_v55 = vmul.f32 %v522_v39, %v279_v54 }
 0x11c   :  { %v281_v48 = vmul.f32 0.5, %v280_v55 }
 0x11e   :  { %v282_v56 = vsub.f32 1.5, %v281_v48 }
 0x120   :  { %v283_v57 = vmul.f32 %v522_v39, %v282_v56 }
 0x122   :  { %v287_v59 = vsel %vm286_vm3, %v522_v39, %v283_v57 }
 0x123   :  { %v288_v60 = vmul.f32 %v287_v59, %v603_v61  ;;  %v289_v0 = vmul.f32 %v287_v59, %v605_v62  ;;  %v290_v1 = vmul.f32 %v287_v59, %v607_v63  ;;  %v291_v4 = vmul.f32 %v287_v59, %v613_v2  ;;  %v641_v61 = vld [vmem:[%s715_s3] ss:$0 sm:$0xff] }
 0x124   :  { %v292_v5 = vmul.f32 %v287_v59, %v615_v3  ;;  %v293_v7 = vmul.f32 %v287_v59, %v619_v6  ;;  %v294_v8 = vmul.f32 %v287_v59, %v229_v9  ;;  %v295_v10 = vmul.f32 %v287_v59, %v230_v12 }
 0x125   :  { %v296_v11 = vmul.f32 %v287_v59, %v231_v15  ;;  %v308_v13 = vmul.f32 %v517_v58, %v288_v60  ;;  %v309_v14 = vmul.f32 %v517_v58, %v289_v0  ;;  %v297_v62 = vmul.f32 %v287_v59, %v232_v18 }
 0x126   :  { %v298_v16 = vmul.f32 %v287_v59, %v233_v24  ;;  %v299_v17 = vmul.f32 %v287_v59, %v234_v28  ;;  %v310_v63 = vmul.f32 %v517_v58, %v290_v1  ;;  %v300_v20 = vmul.f32 %v287_v59, %v235_v31 }
 0x127   :  { %v301_v2 = vmul.f32 %v287_v59, %v236_v35  ;;  %v311_v21 = vmul.f32 %v517_v58, %v291_v4  ;;  %v312_v3 = vmul.f32 %v517_v58, %v292_v5  ;;  %v302_v26 = vmul.f32 %v287_v59, %v237_v19 }
 0x128   :  { %v303_v6 = vmul.f32 %v287_v59, %v238_v23  ;;  %v313_v9 = vmul.f32 %v517_v58, %v293_v7  ;;  %v314_v12 = vmul.f32 %v517_v58, %v294_v8  ;;  %v315_v15 = vmul.f32 %v517_v58, %v295_v10 }
 0x129   :  { %v316_v27 = vmul.f32 %v517_v58, %v296_v11  ;;  %v328_v25 = vadd.f32 %v641_v61, %v308_v13  ;;  %v329_v29 = vadd.f32 %v641_v61, %v309_v14  ;;  %v317_v33 = vmul.f32 %v517_v58, %v297_v62 }
 0x12a   :  { %v318_v34 = vmul.f32 %v517_v58, %v298_v16  ;;  %v319_v18 = vmul.f32 %v517_v58, %v299_v17  ;;  %v330_v24 = vadd.f32 %v641_v61, %v310_v63  ;;  %v320_v28 = vmul.f32 %v517_v58, %v300_v20 }
 0x12b   :  { %v321_v31 = vmul.f32 %v517_v58, %v301_v2  ;;  %v331_v35 = vadd.f32 %v641_v61, %v311_v21  ;;  %v332_v36 = vadd.f32 %v641_v61, %v312_v3  ;;  %v322_v37 = vmul.f32 %v517_v58, %v302_v26 }
 0x12c   :  { %v323_v19 = vmul.f32 %v517_v58, %v303_v6  ;;  %v333_v38 = vadd.f32 %v641_v61, %v313_v9  ;;  %v334_v40 = vadd.f32 %v641_v61, %v314_v12  ;;  %v335_v23 = vadd.f32 %v641_v61, %v315_v15 }
 0x12d   :  { %v336_v42 = vadd.f32 %v641_v61, %v316_v27  ;;  %vm344_vm4 = vcmp.gt.f32.partialorder %v328_v25, 0.0  ;;  %vm345_vm5 = vcmp.gt.f32.partialorder %v329_v29, 0.0  ;;  %v337_v43 = vadd.f32 %v641_v61, %v317_v33 }
 0x12e   :  { %v360_v32 = vmul.f32 0.1, %v328_v25  ;;  %v361_v44 = vmul.f32 0.1, %v329_v29  ;;  %v362_v45 = vmul.f32 0.1, %v330_v24  ;;  %v338_v41 = vadd.f32 %v641_v61, %v318_v34 }
 0x12f   :  { %vm346_vm6 = vcmp.gt.f32.partialorder %v330_v24, 0.0  ;;  %v363_v46 = vmul.f32 0.1, %v331_v35  ;;  %v364_v47 = vmul.f32 0.1, %v332_v36  ;;  %vm347_vm7 = vcmp.gt.f32.partialorder %v331_v35, 0.0 }
 0x130   :  { %vm348_vm8 = vcmp.gt.f32.partialorder %v332_v36, 0.0  ;;  %v365_v49 = vmul.f32 0.1, %v333_v38  ;;  %v376_v22 = vsel %vm344_vm4, %v328_v25, %v360_v32  ;;  %v339_v50 = vadd.f32 %v641_v61, %v319_v18 }
 0x131   :  { %vm349_vm9 = vcmp.gt.f32.partialorder %v333_v38, 0.0  ;;  %v366_v51 = vmul.f32 0.1, %v334_v40  ;;  %v377_v52 = vsel %vm345_vm5, %v329_v29, %v361_v44  ;;  %392 = vst [vmem:[%s716_s4] sm:$0xff] %v376_v22  ;;  %v340_v30 = vadd.f32 %v641_v61, %v320_v28 }
 0x132   :  { %vm350_vm10 = vcmp.gt.f32.partialorder %v334_v40, 0.0  ;;  %v367_v53 = vmul.f32 0.1, %v335_v23  ;;  %v378_v39 = vsel %vm346_vm6, %v330_v24, %v362_v45  ;;  %vm351_vm11 = vcmp.gt.f32.partialorder %v335_v23, 0.0  ;;  %393 = vst [vmem:[%s716_s4 + $0x8] sm:$0xff] %v377_v52 }
 0x133   :  { %v368_v54 = vmul.f32 0.1, %v336_v42  ;;  %v379_v55 = vsel %vm347_vm7, %v331_v35, %v363_v46  ;;  %v380_v48 = vsel %vm348_vm8, %v332_v36, %v364_v47  ;;  %v341_v56 = vadd.f32 %v641_v61, %v321_v31  ;;  %394 = vst [vmem:[%s716_s4 + $0x10] sm:$0xff] %v378_v39 }
 0x134   :  { %vm352_vm12 = vcmp.gt.f32.partialorder %v336_v42, 0.0  ;;  %v369_v57 = vmul.f32 0.1, %v337_v43  ;;  %v381_v59 = vsel %vm349_vm9, %v333_v38, %v365_v49  ;;  %v342_v60 = vadd.f32 %v641_v61, %v322_v37  ;;  %395 = vst [vmem:[%s716_s4 + $0x18] sm:$0xff] %v379_v55 }
 0x135   :  { %vm353_vm13 = vcmp.gt.f32.partialorder %v337_v43, 0.0  ;;  %v370_v0 = vmul.f32 0.1, %v338_v41  ;;  %v382_v58 = vsel %vm350_vm10, %v334_v40, %v366_v51  ;;  %v343_v1 = vadd.f32 %v641_v61, %v323_v19  ;;  %396 = vst [vmem:[%s716_s4 + $0x20] sm:$0xff] %v380_v48 }
 0x136   :  { %vm354_vm14 = vcmp.gt.f32.partialorder %v338_v41, 0.0  ;;  %v371_v4 = vmul.f32 0.1, %v339_v50  ;;  %v383_v5 = vsel %vm351_vm11, %v335_v23, %v367_v53  ;;  %vm355_vm15 = vcmp.gt.f32.partialorder %v339_v50, 0.0  ;;  %397 = vst [vmem:[%s716_s4 + $0x28] sm:$0xff] %v381_v59 }
 0x137   :  { %v372_v7 = vmul.f32 0.1, %v340_v30  ;;  %v384_v8 = vsel %vm352_vm12, %v336_v42, %v368_v54  ;;  %vm356_vm0 = vcmp.gt.f32.partialorder %v340_v30, 0.0  ;;  %v373_v10 = vmul.f32 0.1, %v341_v56  ;;  %398 = vst [vmem:[%s716_s4 + $0x30] sm:$0xff] %v382_v58 }
 0x138   :  { %v385_v11 = vsel %vm353_vm13, %v337_v43, %v369_v57  ;;  %vm357_vm1 = vcmp.gt.f32.partialorder %v341_v56, 0.0  ;;  %v374_v13 = vmul.f32 0.1, %v342_v60  ;;  %v386_v14 = vsel %vm354_vm14, %v338_v41, %v370_v0  ;;  %399 = vst [vmem:[%s716_s4 + $0x38] sm:$0xff] %v383_v5 }
 0x139   :  { %vm358_vm2 = vcmp.gt.f32.partialorder %v342_v60, 0.0  ;;  %v375_v61 = vmul.f32 0.1, %v343_v1  ;;  %v387_v62 = vsel %vm355_vm15, %v339_v50, %v371_v4  ;;  %400 = vst [vmem:[%s716_s4 + $0x40] sm:$0xff] %v384_v8  ;;  %vm359_vm3 = vcmp.gt.f32.partialorder %v343_v1, 0.0 }
 0x13a   :  { %v388_v16 = vsel %vm356_vm0, %v340_v30, %v372_v7  ;;  %401 = vst [vmem:[%s716_s4 + $0x48] sm:$0xff] %v385_v11  ;;  %v389_v17 = vsel %vm357_vm1, %v341_v56, %v373_v10  ;;  %v390_v63 = vsel %vm358_vm2, %v342_v60, %v374_v13 }
 0x13b   :  { %402 = vst [vmem:[%s716_s4 + $0x50] sm:$0xff] %v386_v14  ;;  %v391_v20 = vsel %vm359_vm3, %v343_v1, %v375_v61 }
 0x13c   :  { %403 = vst [vmem:[%s716_s4 + $0x58] sm:$0xff] %v387_v62 }
 0x13d   :  { %404 = vst [vmem:[%s716_s4 + $0x60] sm:$0xff] %v388_v16 }
 0x13e   :  { %405 = vst [vmem:[%s716_s4 + $0x68] sm:$0xff] %v389_v17 }
 0x13f   :  { %406 = vst [vmem:[%s716_s4 + $0x70] sm:$0xff] %v390_v63 }
 0x140   :  { %407 = vst [vmem:[%s716_s4 + $0x78] sm:$0xff] %v391_v20 }

// kernel: forward.13
= control target key start
LH: loop header
LB: loop body
LE: loop exit
PB: predicated region body
PF: predicated region fallthrough
CT: control target
= control target key end

     0   :  { %s56_s0 = inlined_call_operand.vmem [shape: f32[16,128], index: 0, kind: input, shape index: {}]   ;;  %s57_s1 = inlined_call_operand.vmem [shape: f32[16,128], index: 1, kind: input, shape index: {}]   ;;  %s58_s2 = inlined_call_operand.vmem [shape: f32[16,128], index: 2, kind: output, shape index: {}]  }
   0x1   :  { %v11_v0 = vld [vmem:[%s56_s0] sm:$0xff]  ;;  %v12_v2 = vld [vmem:[%s56_s0 + $0x8] sm:$0xff] }
   0x2   :  { %v13_v1 = vld [vmem:[%s57_s1] sm:$0xff]  ;;  %v14_v4 = vld [vmem:[%s57_s1 + $0x8] sm:$0xff] }
   0x3   :  { %v15_v3 = vadd.f32 %v13_v1, %v11_v0  ;;  %v16_v5 = vadd.f32 %v14_v4, %v12_v2 }
   0x5   :  { %17 = vst [vmem:[%s58_s2] sm:$0xff] %v15_v3 }
   0x6   :  { %18 = vst [vmem:[%s58_s2 + $0x8] sm:$0xff] %v16_v5 }

// kernel: forward.14
= control target key start
LH: loop header
LB: loop body
LE: loop exit
PB: predicated region body
PF: predicated region fallthrough
CT: control target
= control target key end

     0   :  { %v416_v30 = vmov 32.0   ;;  %s532_s1 = inlined_call_operand.vmem [shape: bf16[256,128], index: 1, kind: input, shape index: {}]   ;;  %s533_s0 = inlined_call_operand.vmem [shape: bf16[32,256], index: 0, kind: input, shape index: {}]   ;;  %s534_s2 = inlined_call_operand.vmem [shape: f32[1,128], index: 2, kind: input, shape index: {}]   ;;  %s535_s3 = inlined_call_operand.vmem [shape: f32[1,128], index: 3, kind: input, shape index: {}]   ;;  %s536_s4 = inlined_call_operand.vmem [shape: f32[32,128], index: 4, kind: output, shape index: {}]  }
   0x1   :  { %v384_v0 = vld [vmem:[%s532_s1 + $0x38] sm:$0xff]  ;;  %v383_v2 = vld [vmem:[%s532_s1 + $0x30] sm:$0xff]  ;;  %v382_v4 = vld [vmem:[%s532_s1 + $0x28] sm:$0xff]  ;;  %412 = vrcp.f32 %v416_v30 }
   0x2   :  { %v392_v1 = vld [vmem:[%s532_s1 + $0x78] sm:$0xff]  ;;  %169 = vmatpush.bf16.msra.mxu0 %v384_v0  ;;  %393 = vmatpush.bf16.msra.mxu2 %v384_v0  ;;  %v391_v3 = vld [vmem:[%s532_s1 + $0x70] sm:$0xff]  ;;  %v390_v5 = vld [vmem:[%s532_s1 + $0x68] sm:$0xff] }
   0x3   :  { %188 = vmatpush.bf16.msra.mxu1 %v392_v1  ;;  %401 = vmatpush.bf16.msra.mxu3 %v392_v1  ;;  %v381_v6 = vld [vmem:[%s532_s1 + $0x20] sm:$0xff]  ;;  %v380_v8 = vld [vmem:[%s532_s1 + $0x18] sm:$0xff]  ;;  %v379_v10 = vld [vmem:[%s532_s1 + $0x10] sm:$0xff] }
   0x4   :  { %v389_v7 = vld [vmem:[%s532_s1 + $0x60] sm:$0xff]  ;;  %v388_v9 = vld [vmem:[%s532_s1 + $0x58] sm:$0xff]  ;;  %v387_v11 = vld [vmem:[%s532_s1 + $0x50] sm:$0xff] }
   0x5   :  { %v378_v12 = vld [vmem:[%s532_s1 + $0x8] sm:$0xff]  ;;  %v377_v14 = vld [vmem:[%s532_s1] sm:$0xff]  ;;  %v303_v18 = vld [vmem:[%s533_s0 + $0x10] sm:$0xf] }
   0x6   :  { %170 = vmatpush.bf16.msra.mxu0 %v383_v2  ;;  %394 = vmatpush.bf16.msra.mxu2 %v383_v2  ;;  %v386_v13 = vld [vmem:[%s532_s1 + $0x48] sm:$0xff]  ;;  %v385_v15 = vld [vmem:[%s532_s1 + $0x40] sm:$0xff]  ;;  %v376_v19 = vld [vmem:[%s533_s0 + $0x14] sm:$0xf0] }
   0x7   :  { %189 = vmatpush.bf16.msra.mxu1 %v391_v3  ;;  %402 = vmatpush.bf16.msra.mxu3 %v391_v3  ;;  %v295_v16 = vld [vmem:[%s533_s0] sm:$0xf]  ;;  %v374_v17 = vld [vmem:[%s533_s0 + $0x4] sm:$0xf0]  ;;  %v373_v20 = vld [vmem:[%s533_s0 + $0x4] sm:$0xf]  ;;  %v304_v25 = vor.u32 %v376_v19, %v303_v18  ;;  %v413_v35 = vpop.eup %412 }
   0x8   :  { %v297_v21 = vld [vmem:[%s533_s0 + $0x8] sm:$0xf0]  ;;  %v375_v22 = vld [vmem:[%s533_s0 + $0x14] sm:$0xf]  ;;  %v305_v23 = vld [vmem:[%s533_s0 + $0x18] sm:$0xf0]  ;;  %v296_v24 = vor.u32 %v374_v17, %v295_v16  ;;  %vm221_vm0 = vweird.f32 %v413_v35 }
   0x9   :  { %v300_v26 = vor.u32 %v373_v20, %v297_v21  ;;  %v308_v27 = vor.u32 %v375_v22, %v305_v23  ;;  %v217_v39 = vmul.f32 32.0, %v413_v35  ;;  %v410_v18 = vld [vmem:[%s534_s2] ss:$0 sm:$0xff] }
   0xa   :  { %171 = vmatpush.bf16.msra.mxu0 %v382_v4  ;;  %395 = vmatpush.bf16.msra.mxu2 %v382_v4 }
   0xb   :  { %190 = vmatpush.bf16.msra.mxu1 %v390_v5  ;;  %403 = vmatpush.bf16.msra.mxu3 %v390_v5  ;;  %v218_v45 = vsub.f32 1.0, %v217_v39 }
   0xd   :  { %v219_v48 = vmul.f32 %v413_v35, %v218_v45 }
   0xe   :  { %172 = vmatpush.bf16.msra.mxu0 %v381_v6  ;;  %396 = vmatpush.bf16.msra.mxu2 %v381_v6 }
   0xf   :  { %191 = vmatpush.bf16.msra.mxu1 %v389_v7  ;;  %404 = vmatpush.bf16.msra.mxu3 %v389_v7  ;;  %v220_v51 = vadd.f32 %v413_v35, %v219_v48 }
  0x11   :  { %v222_v54 = vsel %vm221_vm0, %v413_v35, %v220_v51 }
  0x12   :  { %173 = vmatpush.bf16.msra.mxu0 %v380_v8  ;;  %397 = vmatpush.bf16.msra.mxu2 %v380_v8 }
  0x13   :  { %192 = vmatpush.bf16.msra.mxu1 %v388_v9  ;;  %405 = vmatpush.bf16.msra.mxu3 %v388_v9 }
  0x16   :  { %174 = vmatpush.bf16.msra.mxu0 %v379_v10  ;;  %398 = vmatpush.bf16.msra.mxu2 %v379_v10 }
  0x17   :  { %193 = vmatpush.bf16.msra.mxu1 %v387_v11  ;;  %406 = vmatpush.bf16.msra.mxu3 %v387_v11 }
  0x1a   :  { %175 = vmatpush.bf16.msra.mxu0 %v378_v12  ;;  %399 = vmatpush.bf16.msra.mxu2 %v378_v12 }
  0x1b   :  { %194 = vmatpush.bf16.msra.mxu1 %v386_v13  ;;  %407 = vmatpush.bf16.msra.mxu3 %v386_v13 }
  0x1e   :  { %176 = vmatpush.bf16.msra.mxu0 %v377_v14  ;;  %400 = vmatpush.bf16.msra.mxu2 %v377_v14 }
  0x1f   :  { %195 = vmatpush.bf16.msra.mxu1 %v385_v15  ;;  %408 = vmatpush.bf16.msra.mxu3 %v385_v15 }
  0x21   :  { %177 = vmatmul.bf16.vlgmr.msra.gmra.mxu0 %v296_v24  ;;  %182 = vmatmul.bf16.vlgmr.msra.gmra.mxu2 %v304_v25  ;;  %v411_v24 = vld [vmem:[%s535_s3] ss:$0 sm:$0xff] }
  0x22   :  { %196 = vmatmul.bf16.vlgmr.msra.gmra.mxu1 %v300_v26  ;;  %201 = vmatmul.bf16.vlgmr.msra.gmra.mxu3 %v308_v27 }
  0x9e   :  { %v178_v28 = vpop.f32.mrf.mxu0 }
  0x9f   :  { %v197_v29 = vpop.f32.mrf.mxu1 }
  0xa0   :  { %v198_v36 = vadd.f32 %v197_v29, %v178_v28 }
  0xa4   :  { %v183_v31 = vpop.f32.mrf.mxu2 }
  0xa5   :  { %v202_v32 = vpop.f32.mrf.mxu3 }
  0xa6   :  { %v180_v33 = vpop.f32.mrf.mxu0  ;;  %v203_v40 = vadd.f32 %v202_v32, %v183_v31 }
  0xa7   :  { %v199_v34 = vpop.f32.mrf.mxu1 }
  0xa8   :  { %v200_v37 = vadd.f32 %v199_v34, %v180_v33 }
  0xaa   :  { %v207_v38 = vadd.f32 %v200_v37, %v198_v36 }
  0xac   :  { %v185_v41 = vpop.f32.mrf.mxu2  ;;  %v208_v44 = vadd.f32 %v207_v38, %v203_v40 }
  0xad   :  { %v204_v42 = vpop.f32.mrf.mxu3 }
  0xae   :  { %v205_v43 = vadd.f32 %v204_v42, %v185_v41 }
  0xb0   :  { %v209_v46 = vadd.f32 %v208_v44, %v205_v43 }
  0xb2   :  { %v210_v47 = vrot.slane %v209_v46, 4 }
  0xb4   :  { %v211_v49 = vadd.f32 %v210_v47, %v209_v46 }
  0xb6   :  { %v212_v50 = vrot.slane %v211_v49, 2 }
  0xb8   :  { %v213_v52 = vadd.f32 %v212_v50, %v211_v49 }
  0xba   :  { %v214_v53 = vrot.slane %v213_v52, 1 }
  0xbc   :  { %v215_v55 = vadd.f32 %v214_v53, %v213_v52 }
  0xbe   :  { %v223_v56 = vmul.f32 %v222_v54, %v215_v55 }
  0xc0   :  { %v224_v57 = vsub.f32 %v198_v36, %v223_v56  ;;  %v225_v58 = vsub.f32 %v200_v37, %v223_v56  ;;  %v226_v59 = vsub.f32 %v203_v40, %v223_v56  ;;  %v227_v60 = vsub.f32 %v205_v43, %v223_v56 }
  0xc2   :  { %v228_v61 = vmul.f32 %v224_v57, %v224_v57  ;;  %v229_v62 = vmul.f32 %v225_v58, %v225_v58  ;;  %v230_v63 = vmul.f32 %v226_v59, %v226_v59  ;;  %v231_v1 = vmul.f32 %v227_v60, %v227_v60 }
  0xc4   :  { %v232_v0 = vadd.f32 %v229_v62, %v228_v61 }
  0xc6   :  { %v233_v2 = vadd.f32 %v232_v0, %v230_v63 }
  0xc8   :  { %v234_v3 = vadd.f32 %v233_v2, %v231_v1 }
  0xca   :  { %v235_v4 = vrot.slane %v234_v3, 4 }
  0xcc   :  { %v236_v5 = vadd.f32 %v235_v4, %v234_v3 }
  0xce   :  { %v237_v6 = vrot.slane %v236_v5, 2 }
  0xd0   :  { %v238_v7 = vadd.f32 %v237_v6, %v236_v5 }
  0xd2   :  { %v239_v8 = vrot.slane %v238_v7, 1 }
  0xd4   :  { %v240_v9 = vadd.f32 %v239_v8, %v238_v7 }
  0xd6   :  { %v241_v10 = vmul.f32 %v240_v9, %v222_v54 }
  0xd8   :  { %v242_v11 = vadd.f32 1e-05, %v241_v10 }
  0xda   :  { %414 = vrsqrt.f32 %v242_v11  ;;  %vm249_vm2 = vweird.f32 %v242_v11 }
  0xe0   :  { %v415_v12 = vpop.eup %414 }
  0xe1   :  { %v244_v13 = vmul.f32 %v415_v12, %v242_v11  ;;  %vm250_vm1 = vweird.f32 %v415_v12 }
  0xe2   :  { %vm251_vm3 = vmor %vm249_vm2, %vm250_vm1 }
  0xe3   :  { %v245_v14 = vmul.f32 %v415_v12, %v244_v13 }
  0xe5   :  { %v246_v15 = vmul.f32 0.5, %v245_v14 }
  0xe7   :  { %v247_v16 = vsub.f32 1.5, %v246_v15 }
  0xe9   :  { %v248_v17 = vmul.f32 %v415_v12, %v247_v16 }
  0xeb   :  { %v252_v19 = vsel %vm251_vm3, %v415_v12, %v248_v17 }
  0xec   :  { %v253_v20 = vmul.f32 %v252_v19, %v224_v57  ;;  %v254_v21 = vmul.f32 %v252_v19, %v225_v58  ;;  %v255_v22 = vmul.f32 %v252_v19, %v226_v59  ;;  %v256_v23 = vmul.f32 %v252_v19, %v227_v60 }
  0xee   :  { %v261_v25 = vmul.f32 %v410_v18, %v253_v20  ;;  %v262_v26 = vmul.f32 %v410_v18, %v254_v21  ;;  %v263_v27 = vmul.f32 %v410_v18, %v255_v22  ;;  %v264_v28 = vmul.f32 %v410_v18, %v256_v23 }
  0xf0   :  { %v269_v29 = vadd.f32 %v411_v24, %v261_v25  ;;  %v270_v30 = vadd.f32 %v411_v24, %v262_v26  ;;  %v271_v31 = vadd.f32 %v411_v24, %v263_v27  ;;  %v272_v32 = vadd.f32 %v411_v24, %v264_v28 }
  0xf2   :  { %vm273_vm4 = vcmp.gt.f32.partialorder %v269_v29, 0.0  ;;  %vm274_vm5 = vcmp.gt.f32.partialorder %v270_v30, 0.0  ;;  %vm275_vm6 = vcmp.gt.f32.partialorder %v271_v31, 0.0  ;;  %vm276_vm7 = vcmp.gt.f32.partialorder %v272_v32, 0.0 }
  0xf3   :  { %v277_v33 = vmul.f32 0.1, %v269_v29  ;;  %v278_v34 = vmul.f32 0.1, %v270_v30  ;;  %v279_v35 = vmul.f32 0.1, %v271_v31 }
  0xf4   :  { %v280_v36 = vmul.f32 0.1, %v272_v32 }
  0xf5   :  { %v281_v37 = vsel %vm273_vm4, %v269_v29, %v277_v33  ;;  %v282_v38 = vsel %vm274_vm5, %v270_v30, %v278_v34  ;;  %v283_v39 = vsel %vm275_vm6, %v271_v31, %v279_v35 }
  0xf6   :  { %v284_v40 = vsel %vm276_vm7, %v272_v32, %v280_v36  ;;  %285 = vst [vmem:[%s536_s4] sm:$0xff] %v281_v37 }
  0xf7   :  { %286 = vst [vmem:[%s536_s4 + $0x8] sm:$0xff] %v282_v38 }
  0xf8   :  { %287 = vst [vmem:[%s536_s4 + $0x10] sm:$0xff] %v283_v39 }
  0xf9   :  { %288 = vst [vmem:[%s536_s4 + $0x18] sm:$0xff] %v284_v40 }

// kernel: forward.16
= control target key start
LH: loop header
LB: loop body
LE: loop exit
PB: predicated region body
PF: predicated region fallthrough
CT: control target
= control target key end

     0   :  { %v267_v10 = vmov 32.0   ;;  %s341_s1 = inlined_call_operand.vmem [shape: bf16[128,128], index: 1, kind: input, shape index: {}]   ;;  %s342_s0 = inlined_call_operand.vmem [shape: bf16[32,128], index: 0, kind: input, shape index: {}]   ;;  %s343_s2 = inlined_call_operand.vmem [shape: f32[1,128], index: 2, kind: input, shape index: {}]   ;;  %s344_s3 = inlined_call_operand.vmem [shape: f32[1,128], index: 3, kind: input, shape index: {}]   ;;  %s345_s4 = inlined_call_operand.vmem [shape: f32[32,128], index: 4, kind: output, shape index: {}]  }
   0x1   :  { %v251_v0 = vld [vmem:[%s341_s1 + $0x38] sm:$0xff]  ;;  %v250_v1 = vld [vmem:[%s341_s1 + $0x30] sm:$0xff]  ;;  %v249_v2 = vld [vmem:[%s341_s1 + $0x28] sm:$0xff]  ;;  %263 = vrcp.f32 %v267_v10 }
   0x2   :  { %97 = vmatpush.bf16.msra.mxu0 %v251_v0  ;;  %252 = vmatpush.bf16.msra.mxu1 %v251_v0  ;;  %v248_v3 = vld [vmem:[%s341_s1 + $0x20] sm:$0xff]  ;;  %v247_v4 = vld [vmem:[%s341_s1 + $0x18] sm:$0xff]  ;;  %v246_v5 = vld [vmem:[%s341_s1 + $0x10] sm:$0xff] }
   0x3   :  { %v245_v6 = vld [vmem:[%s341_s1 + $0x8] sm:$0xff]  ;;  %v244_v7 = vld [vmem:[%s341_s1] sm:$0xff] }
   0x4   :  { %v242_v8 = vld [vmem:[%s342_s0] sm:$0xff]  ;;  %v243_v9 = vld [vmem:[%s342_s0 + $0x8] sm:$0xff] }
   0x5   :  { %v261_v56 = vld [vmem:[%s343_s2] ss:$0 sm:$0xff] }
   0x6   :  { %98 = vmatpush.bf16.msra.mxu0 %v250_v1  ;;  %253 = vmatpush.bf16.msra.mxu1 %v250_v1  ;;  %v262_v62 = vld [vmem:[%s344_s3] ss:$0 sm:$0xff] }
   0x7   :  { %v264_v13 = vpop.eup %263 }
   0x8   :  { %v126_v15 = vmul.f32 32.0, %v264_v13  ;;  %vm130_vm0 = vweird.f32 %v264_v13 }
   0xa   :  { %99 = vmatpush.bf16.msra.mxu0 %v249_v2  ;;  %254 = vmatpush.bf16.msra.mxu1 %v249_v2  ;;  %v127_v19 = vsub.f32 1.0, %v126_v15 }
   0xc   :  { %v128_v22 = vmul.f32 %v264_v13, %v127_v19 }
   0xe   :  { %100 = vmatpush.bf16.msra.mxu0 %v248_v3  ;;  %255 = vmatpush.bf16.msra.mxu1 %v248_v3  ;;  %v129_v25 = vadd.f32 %v264_v13, %v128_v22 }
  0x10   :  { %v131_v28 = vsel %vm130_vm0, %v264_v13, %v129_v25 }
  0x12   :  { %101 = vmatpush.bf16.msra.mxu0 %v247_v4  ;;  %256 = vmatpush.bf16.msra.mxu1 %v247_v4 }
  0x16   :  { %102 = vmatpush.bf16.msra.mxu0 %v246_v5  ;;  %257 = vmatpush.bf16.msra.mxu1 %v246_v5 }
  0x1a   :  { %103 = vmatpush.bf16.msra.mxu0 %v245_v6  ;;  %258 = vmatpush.bf16.msra.mxu1 %v245_v6 }
  0x1e   :  { %104 = vmatpush.bf16.msra.mxu0 %v244_v7  ;;  %259 = vmatpush.bf16.msra.mxu1 %v244_v7 }
  0x21   :  { %105 = vmatmul.bf16.vlgmr.msra.gmra.mxu0 %v242_v8  ;;  %110 = vmatmul.bf16.vlgmr.msra.gmra.mxu1 %v243_v9 }
  0x9e   :  { %v106_v11 = vpop.f32.mrf.mxu0  ;;  %v111_v12 = vpop.f32.mrf.mxu1 }
  0xa6   :  { %v108_v14 = vpop.f32.mrf.mxu0  ;;  %v113_v18 = vpop.f32.mrf.mxu1 }
  0xa7   :  { %v116_v16 = vadd.f32 %v108_v14, %v106_v11 }
  0xa9   :  { %v117_v17 = vadd.f32 %v116_v16, %v111_v12 }
  0xab   :  { %v118_v20 = vadd.f32 %v117_v17, %v113_v18 }
  0xad   :  { %v119_v21 = vrot.slane %v118_v20, 4 }
  0xaf   :  { %v120_v23 = vadd.f32 %v119_v21, %v118_v20 }
  0xb1   :  { %v121_v24 = vrot.slane %v120_v23, 2 }
  0xb3   :  { %v122_v26 = vadd.f32 %v121_v24, %v120_v23 }
  0xb5   :  { %v123_v27 = vrot.slane %v122_v26, 1 }
  0xb7   :  { %v124_v29 = vadd.f32 %v123_v27, %v122_v26 }
  0xb9   :  { %v132_v30 = vmul.f32 %v131_v28, %v124_v29 }
  0xbb   :  { %v133_v31 = vsub.f32 %v106_v11, %v132_v30  ;;  %v134_v32 = vsub.f32 %v108_v14, %v132_v30  ;;  %v135_v33 = vsub.f32 %v111_v12, %v132_v30  ;;  %v136_v34 = vsub.f32 %v113_v18, %v132_v30 }
  0xbd   :  { %v137_v35 = vmul.f32 %v133_v31, %v133_v31  ;;  %v138_v36 = vmul.f32 %v134_v32, %v134_v32  ;;  %v139_v37 = vmul.f32 %v135_v33, %v135_v33  ;;  %v140_v39 = vmul.f32 %v136_v34, %v136_v34 }
  0xbf   :  { %v141_v38 = vadd.f32 %v138_v36, %v137_v35 }
  0xc1   :  { %v142_v40 = vadd.f32 %v141_v38, %v139_v37 }
  0xc3   :  { %v143_v41 = vadd.f32 %v142_v40, %v140_v39 }
  0xc5   :  { %v144_v42 = vrot.slane %v143_v41, 4 }
  0xc7   :  { %v145_v43 = vadd.f32 %v144_v42, %v143_v41 }
  0xc9   :  { %v146_v44 = vrot.slane %v145_v43, 2 }
  0xcb   :  { %v147_v45 = vadd.f32 %v146_v44, %v145_v43 }
  0xcd   :  { %v148_v46 = vrot.slane %v147_v45, 1 }
  0xcf   :  { %v149_v47 = vadd.f32 %v148_v46, %v147_v45 }
  0xd1   :  { %v150_v48 = vmul.f32 %v149_v47, %v131_v28 }
  0xd3   :  { %v151_v49 = vadd.f32 1e-05, %v150_v48 }
  0xd5   :  { %265 = vrsqrt.f32 %v151_v49  ;;  %vm158_vm2 = vweird.f32 %v151_v49 }
  0xdb   :  { %v266_v50 = vpop.eup %265 }
  0xdc   :  { %v153_v51 = vmul.f32 %v266_v50, %v151_v49  ;;  %vm159_vm1 = vweird.f32 %v266_v50 }
  0xdd   :  { %vm160_vm3 = vmor %vm158_vm2, %vm159_vm1 }
  0xde   :  { %v154_v52 = vmul.f32 %v266_v50, %v153_v51 }
  0xe0   :  { %v155_v53 = vmul.f32 0.5, %v154_v52 }
  0xe2   :  { %v156_v54 = vsub.f32 1.5, %v155_v53 }
  0xe4   :  { %v157_v55 = vmul.f32 %v266_v50, %v156_v54 }
  0xe6   :  { %v161_v57 = vsel %vm160_vm3, %v266_v50, %v157_v55 }
  0xe7   :  { %v162_v58 = vmul.f32 %v161_v57, %v133_v31  ;;  %v163_v59 = vmul.f32 %v161_v57, %v134_v32  ;;  %v164_v60 = vmul.f32 %v161_v57, %v135_v33  ;;  %v165_v61 = vmul.f32 %v161_v57, %v136_v34 }
  0xe9   :  { %v170_v63 = vmul.f32 %v261_v56, %v162_v58  ;;  %v171_v0 = vmul.f32 %v261_v56, %v163_v59  ;;  %v172_v1 = vmul.f32 %v261_v56, %v164_v60  ;;  %v173_v2 = vmul.f32 %v261_v56, %v165_v61 }
  0xeb   :  { %v178_v3 = vadd.f32 %v262_v62, %v170_v63  ;;  %v179_v4 = vadd.f32 %v262_v62, %v171_v0  ;;  %v180_v5 = vadd.f32 %v262_v62, %v172_v1  ;;  %v181_v6 = vadd.f32 %v262_v62, %v173_v2 }
  0xed   :  { %vm182_vm4 = vcmp.gt.f32.partialorder %v178_v3, 0.0  ;;  %vm183_vm5 = vcmp.gt.f32.partialorder %v179_v4, 0.0  ;;  %vm184_vm6 = vcmp.gt.f32.partialorder %v180_v5, 0.0  ;;  %vm185_vm7 = vcmp.gt.f32.partialorder %v181_v6, 0.0 }
  0xee   :  { %v186_v7 = vmul.f32 0.1, %v178_v3  ;;  %v187_v8 = vmul.f32 0.1, %v179_v4  ;;  %v188_v9 = vmul.f32 0.1, %v180_v5 }
  0xef   :  { %v189_v10 = vmul.f32 0.1, %v181_v6 }
  0xf0   :  { %v190_v11 = vsel %vm182_vm4, %v178_v3, %v186_v7  ;;  %v191_v12 = vsel %vm183_vm5, %v179_v4, %v187_v8  ;;  %v192_v13 = vsel %vm184_vm6, %v180_v5, %v188_v9 }
  0xf1   :  { %v193_v14 = vsel %vm185_vm7, %v181_v6, %v189_v10  ;;  %194 = vst [vmem:[%s345_s4] sm:$0xff] %v190_v11 }
  0xf2   :  { %195 = vst [vmem:[%s345_s4 + $0x8] sm:$0xff] %v191_v12 }
  0xf3   :  { %196 = vst [vmem:[%s345_s4 + $0x10] sm:$0xff] %v192_v13 }
  0xf4   :  { %197 = vst [vmem:[%s345_s4 + $0x18] sm:$0xff] %v193_v14 }

// kernel: forward.17
= control target key start
LH: loop header
LB: loop body
LE: loop exit
PB: predicated region body
PF: predicated region fallthrough
CT: control target
= control target key end

     0   :  { %s1396_s1 = inlined_call_operand.vmem [shape: bf16[128,128], index: 1, kind: input, shape index: {}]   ;;  %s1397_s2 = inlined_call_operand.vmem [shape: f32[1,128], index: 2, kind: input, shape index: {}]   ;;  %s1398_s4 = inlined_call_operand.vmem [shape: f32[1,128], index: 4, kind: input, shape index: {}]   ;;  %s1399_s5 = inlined_call_operand.vmem [shape: f32[1,128], index: 5, kind: input, shape index: {}]   ;;  %s1400_s0 = inlined_call_operand.vmem [shape: bf16[128,128], index: 0, kind: input, shape index: {}]   ;;  %s1401_s3 = inlined_call_operand.vmem [shape: f32[128,128], index: 3, kind: input, shape index: {}]   ;;  %s1402_s6 = inlined_call_operand.vmem [shape: f32[128,128], index: 6, kind: output, shape index: {}]  }
   0x1   :  { %v744_v0 = vld [vmem:[%s1396_s1 + $0x38] sm:$0xff]  ;;  %v743_v1 = vld [vmem:[%s1396_s1 + $0x30] sm:$0xff]  ;;  %v742_v2 = vld [vmem:[%s1396_s1 + $0x28] sm:$0xff] }
   0x2   :  { %155 = vmatpush.bf16.msra.mxu0 %v744_v0  ;;  %745 = vmatpush.bf16.msra.mxu1 %v744_v0  ;;  %v741_v3 = vld [vmem:[%s1396_s1 + $0x20] sm:$0xff]  ;;  %v740_v4 = vld [vmem:[%s1396_s1 + $0x18] sm:$0xff]  ;;  %v739_v5 = vld [vmem:[%s1396_s1 + $0x10] sm:$0xff] }
   0x3   :  { %746 = vmatpush.bf16.msra.mxu2 %v744_v0  ;;  %747 = vmatpush.bf16.msra.mxu3 %v744_v0  ;;  %v738_v6 = vld [vmem:[%s1396_s1 + $0x8] sm:$0xff]  ;;  %v737_v7 = vld [vmem:[%s1396_s1] sm:$0xff]  ;;  %v731_v9 = vld [vmem:[%s1400_s0 + $0x10] sm:$0xff] }
   0x4   :  { %v729_v8 = vld [vmem:[%s1400_s0] sm:$0xff]  ;;  %v735_v11 = vld [vmem:[%s1400_s0 + $0x30] sm:$0xff]  ;;  %v730_v12 = vld [vmem:[%s1400_s0 + $0x8] sm:$0xff] }
   0x5   :  { %v733_v10 = vld [vmem:[%s1400_s0 + $0x20] sm:$0xff]  ;;  %v732_v13 = vld [vmem:[%s1400_s0 + $0x18] sm:$0xff]  ;;  %v734_v14 = vld [vmem:[%s1400_s0 + $0x28] sm:$0xff] }
   0x6   :  { %156 = vmatpush.bf16.msra.mxu0 %v743_v1  ;;  %748 = vmatpush.bf16.msra.mxu1 %v743_v1  ;;  %v736_v15 = vld [vmem:[%s1400_s0 + $0x38] sm:$0xff]  ;;  %v954_v16 = vld [vmem:[%s1397_s2] ss:$0 sm:$0xff] }
   0x7   :  { %749 = vmatpush.bf16.msra.mxu2 %v743_v1  ;;  %750 = vmatpush.bf16.msra.mxu3 %v743_v1  ;;  %v959_v17 = vld [vmem:[%s1399_s5] ss:$0 sm:$0xff] }
   0x8   :  { %vm225_vm0 = vcmp.gt.f32.partialorder %v959_v17, 0.5 }
   0xa   :  { %157 = vmatpush.bf16.msra.mxu0 %v742_v2  ;;  %751 = vmatpush.bf16.msra.mxu1 %v742_v2 }
   0xb   :  { %752 = vmatpush.bf16.msra.mxu2 %v742_v2  ;;  %753 = vmatpush.bf16.msra.mxu3 %v742_v2 }
   0xe   :  { %158 = vmatpush.bf16.msra.mxu0 %v741_v3  ;;  %754 = vmatpush.bf16.msra.mxu1 %v741_v3 }
   0xf   :  { %755 = vmatpush.bf16.msra.mxu2 %v741_v3  ;;  %756 = vmatpush.bf16.msra.mxu3 %v741_v3 }
  0x12   :  { %159 = vmatpush.bf16.msra.mxu0 %v740_v4  ;;  %757 = vmatpush.bf16.msra.mxu1 %v740_v4 }
  0x13   :  { %758 = vmatpush.bf16.msra.mxu2 %v740_v4  ;;  %759 = vmatpush.bf16.msra.mxu3 %v740_v4 }
  0x16   :  { %160 = vmatpush.bf16.msra.mxu0 %v739_v5  ;;  %760 = vmatpush.bf16.msra.mxu1 %v739_v5 }
  0x17   :  { %761 = vmatpush.bf16.msra.mxu2 %v739_v5  ;;  %762 = vmatpush.bf16.msra.mxu3 %v739_v5 }
  0x1a   :  { %161 = vmatpush.bf16.msra.mxu0 %v738_v6  ;;  %763 = vmatpush.bf16.msra.mxu1 %v738_v6 }
  0x1b   :  { %764 = vmatpush.bf16.msra.mxu2 %v738_v6  ;;  %765 = vmatpush.bf16.msra.mxu3 %v738_v6 }
  0x1e   :  { %162 = vmatpush.bf16.msra.mxu0 %v737_v7  ;;  %766 = vmatpush.bf16.msra.mxu1 %v737_v7 }
  0x1f   :  { %767 = vmatpush.bf16.msra.mxu2 %v737_v7  ;;  %768 = vmatpush.bf16.msra.mxu3 %v737_v7 }
  0x21   :  { %163 = vmatmul.bf16.vlgmr.msra.gmra.mxu0 %v729_v8  ;;  %173 = vmatmul.bf16.vlgmr.msra.gmra.mxu1 %v731_v9 }
  0x22   :  { %183 = vmatmul.bf16.vlgmr.msra.gmra.mxu2 %v733_v10  ;;  %193 = vmatmul.bf16.vlgmr.msra.gmra.mxu3 %v735_v11 }
  0x31   :  { %168 = vmatmul.bf16.gmra.mxu0 %v730_v12  ;;  %178 = vmatmul.bf16.gmra.mxu1 %v732_v13 }
  0x32   :  { %188 = vmatmul.bf16.gmra.mxu2 %v734_v14  ;;  %198 = vmatmul.bf16.gmra.mxu3 %v736_v15 }
  0x9e   :  { %v164_v18 = vpop.f32.mrf.mxu0  ;;  %v174_v19 = vpop.f32.mrf.mxu1 }
  0x9f   :  { %v165_v20 = vadd.f32 %v954_v16, %v164_v18  ;;  %v175_v21 = vadd.f32 %v954_v16, %v174_v19 }
  0xa1   :  { %v713_v22 = vmul.f32 -1.442695, %v165_v20  ;;  %v226_v23 = vsel %vm225_vm0, %v165_v20, 0.0  ;;  %v717_v24 = vmul.f32 -1.442695, %v175_v21  ;;  %v230_v25 = vsel %vm225_vm0, %v175_v21, 0.0 }
  0xa2   :  { %v242_v26 = vmul.f32 1.442695, %v226_v23  ;;  %v250_v32 = vmul.f32 1.442695, %v230_v25 }
  0xa3   :  { %772 = vpow2.f32 %v713_v22 }
  0xa4   :  { %774 = vpow2.f32 %v717_v24 }
  0xa5   :  { %v184_v27 = vpop.f32.mrf.mxu2  ;;  %v194_v28 = vpop.f32.mrf.mxu3  ;;  %776 = vpow2.f32 %v242_v26 }
  0xa6   :  { %v185_v29 = vadd.f32 %v954_v16, %v184_v27  ;;  %v195_v30 = vadd.f32 %v954_v16, %v194_v28  ;;  %v166_v31 = vpop.f32.mrf.mxu0  ;;  %v176_v34 = vpop.f32.mrf.mxu1 }
  0xa7   :  { %v167_v33 = vadd.f32 %v954_v16, %v166_v31  ;;  %v177_v42 = vadd.f32 %v954_v16, %v176_v34 }
  0xa8   :  { %v234_v35 = vsel %vm225_vm0, %v185_v29, 0.0  ;;  %v721_v36 = vmul.f32 -1.442695, %v185_v29  ;;  %v238_v39 = vsel %vm225_vm0, %v195_v30, 0.0  ;;  %v725_v41 = vmul.f32 -1.442695, %v195_v30 }
  0xa9   :  { %v773_v37 = vpop.eup %772  ;;  %v258_v38 = vmul.f32 1.442695, %v234_v35  ;;  %v227_v43 = vsel %vm225_vm0, %v167_v33, 0.0  ;;  %v266_v45 = vmul.f32 1.442695, %v238_v39  ;;  %v231_v50 = vsel %vm225_vm0, %v177_v42, 0.0 }
  0xaa   :  { %v975_v40 = vadd.f32 1.0, %v773_v37  ;;  %778 = vpow2.f32 %v721_v36  ;;  %v775_v44 = vpop.eup %774  ;;  %v714_v47 = vmul.f32 -1.442695, %v167_v33  ;;  %v244_v49 = vmul.f32 1.442695, %v227_v43  ;;  %v204_v35 = vld [vmem:[%s1401_s3] sm:$0xff] }
  0xab   :  { %780 = vpow2.f32 %v250_v32  ;;  %v981_v46 = vadd.f32 1.0, %v775_v44  ;;  %v986_v52 = vpop.eup %776  ;;  %v718_v57 = vmul.f32 -1.442695, %v177_v42  ;;  %v252_v61 = vmul.f32 1.442695, %v231_v50  ;;  %v208_v50 = vld [vmem:[%s1401_s3 + $0x20] sm:$0xff] }
  0xac   :  { %782 = vrcp.f32 %v975_v40  ;;  %v347_v53 = vand.u32 2147483647, %v975_v40  ;;  %v349_v56 = vand.u32 2147483648, %v975_v40  ;;  %vm343_vm1 = vweird.f32 %v975_v40 }
  0xad   :  { %784 = vpow2.f32 %v258_v38  ;;  %v186_v48 = vpop.f32.mrf.mxu2  ;;  %v196_v54 = vpop.f32.mrf.mxu3  ;;  %v409_v59 = vand.u32 2147483648, %v981_v46  ;;  %v407_v63 = vand.u32 2147483647, %v981_v46  ;;  %vm403_vm3 = vweird.f32 %v981_v46 }
  0xae   :  { %786 = vpow2.f32 %v725_v41  ;;  %v187_v51 = vadd.f32 %v954_v16, %v186_v48  ;;  %v197_v1 = vadd.f32 %v954_v16, %v196_v54  ;;  %vm1004_vm2 = vcmp.eq.f32.partialorder %v347_v53, 8.507059e+37  ;;  %v169_v19 = vpop.f32.mrf.mxu0  ;;  %v1051_v41 = vld [vmem:[%s1398_s4] ss:$0 sm:$0xff] }
  0xaf   :  { %788 = vrcp.f32 %v981_v46  ;;  %v350_v6 = vor.u32 1.1754944e-38, %v349_v56  ;;  %v410_v10 = vor.u32 1.1754944e-38, %v409_v59  ;;  %vm1015_vm5 = vcmp.eq.f32.partialorder %v407_v63, 8.507059e+37 }
  0xb0   :  { %v779_v55 = vpop.eup %778  ;;  %790 = vpow2.f32 %v266_v45  ;;  %v235_v0 = vsel %vm225_vm0, %v187_v51, 0.0  ;;  %v722_v7 = vmul.f32 -1.442695, %v187_v51  ;;  %v239_v18 = vsel %vm225_vm0, %v197_v1, 0.0 }
  0xb1   :  { %v991_v58 = vpop.eup %780  ;;  %v994_v60 = vadd.f32 1.0, %v779_v55  ;;  %792 = vpow2.f32 %v714_v47  ;;  %v260_v12 = vmul.f32 1.442695, %v235_v0  ;;  %v726_v27 = vmul.f32 -1.442695, %v197_v1 }
  0xb2   :  { %v783_v62 = vpop.eup %782  ;;  %794 = vpow2.f32 %v244_v49  ;;  %v268_v30 = vmul.f32 1.442695, %v239_v18  ;;  %v1030_v31 = vadd.f32 %v954_v16, %v169_v19 }
  0xb3   :  { %v1000_v2 = vpop.eup %784  ;;  %v339_v3 = vmul.f32 %v783_v62, %v975_v40  ;;  %796 = vrcp.f32 %v994_v60  ;;  %vm344_vm4 = vweird.f32 %v783_v62  ;;  %v467_v22 = vand.u32 2147483647, %v994_v60 }
  0xb4   :  { %v787_v5 = vpop.eup %786  ;;  %798 = vpow2.f32 %v718_v57  ;;  %v469_v23 = vand.u32 2147483648, %v994_v60  ;;  %vm463_vm6 = vweird.f32 %v994_v60  ;;  %vm345_vm7 = vmor %vm343_vm1, %vm344_vm4 }
  0xb5   :  { %v789_v8 = vpop.eup %788  ;;  %v340_v9 = vsub.f32 1.0, %v339_v3  ;;  %v1010_v11 = vadd.f32 1.0, %v787_v5  ;;  %800 = vpow2.f32 %v252_v61  ;;  %vm1039_vm9 = vcmp.eq.f32.partialorder %v467_v22, 8.507059e+37 }
  0xb6   :  { %v1012_v13 = vpop.eup %790  ;;  %v399_v14 = vmul.f32 %v789_v8, %v981_v46  ;;  %vm404_vm8 = vweird.f32 %v789_v8  ;;  %v470_v38 = vor.u32 1.1754944e-38, %v469_v23  ;;  %v228_v3 = vsel %vm225_vm0, %v1030_v31, 0.0 }
  0xb7   :  { %v793_v20 = vpop.eup %792  ;;  %v341_v21 = vmul.f32 %v783_v62, %v340_v9  ;;  %802 = vrcp.f32 %v1010_v11  ;;  %v527_v44 = vand.u32 2147483647, %v1010_v11  ;;  %vm405_vm10 = vmor %vm403_vm3, %vm404_vm8  ;;  %vm523_vm12 = vweird.f32 %v1010_v11 }
  0xb8   :  { %v1024_v24 = vpop.eup %794  ;;  %v400_v25 = vsub.f32 1.0, %v399_v14  ;;  %v1027_v26 = vadd.f32 1.0, %v793_v20  ;;  %804 = vpow2.f32 %v260_v12  ;;  %v529_v46 = vand.u32 2147483648, %v1010_v11 }
  0xb9   :  { %v797_v28 = vpop.eup %796  ;;  %v342_v29 = vadd.f32 %v783_v62, %v341_v21  ;;  %806 = vpow2.f32 %v722_v7  ;;  %vm1080_vm14 = vcmp.eq.f32.partialorder %v527_v44, 8.507059e+37 }
  0xba   :  { %v799_v32 = vpop.eup %798  ;;  %v401_v33 = vmul.f32 %v789_v8, %v400_v25  ;;  %v459_v34 = vmul.f32 %v797_v28, %v994_v60  ;;  %808 = vrcp.f32 %v1027_v26  ;;  %vm464_vm11 = vweird.f32 %v797_v28 }
  0xbb   :  { %v346_v36 = vsel %vm345_vm7, %v783_v62, %v342_v29  ;;  %v1044_v39 = vpop.eup %800  ;;  %v1060_v48 = vadd.f32 1.0, %v799_v32  ;;  %810 = vpow2.f32 %v726_v27  ;;  %vm465_vm13 = vmor %vm463_vm6, %vm464_vm11  ;;  %v530_v9 = vor.u32 1.1754944e-38, %v529_v46 }
  0xbc   :  { %v351_v40 = vsel %vm1004_vm2, %v350_v6, %v346_v36  ;;  %v402_v42 = vadd.f32 %v789_v8, %v401_v33  ;;  %v460_v43 = vsub.f32 1.0, %v459_v34  ;;  %vm358_vm1 = vweird.f32 %v1027_v26 }
  0xbd   :  { %v803_v45 = vpop.eup %802  ;;  %v578_v47 = vsel %vm225_vm0, %v986_v52, %v351_v40  ;;  %812 = vrcp.f32 %v1060_v48  ;;  %v362_v20 = vand.u32 2147483647, %v1027_v26  ;;  %v364_v21 = vand.u32 2147483648, %v1027_v26 }
  0xbe   :  { %v594_v49 = vadd.f32 %v578_v47, %v204_v35  ;;  %v406_v51 = vsel %vm405_vm10, %v789_v8, %v402_v42  ;;  %v461_v53 = vmul.f32 %v797_v28, %v460_v43  ;;  %v519_v54 = vmul.f32 %v803_v45, %v1010_v11  ;;  %v1066_v55 = vpop.eup %804  ;;  %v179_v43 = vpop.f32.mrf.mxu1 }
  0xbf   :  { %v411_v52 = vsel %vm1015_vm5, %v410_v10, %v406_v51  ;;  %v807_v56 = vpop.eup %806  ;;  %814 = vpow2.f32 %v268_v30  ;;  %vm524_vm15 = vweird.f32 %v803_v45  ;;  %v422_v30 = vand.u32 2147483647, %v1060_v48  ;;  %v189_v47 = vpop.f32.mrf.mxu2 }
  0xc0   :  { %v613_v57 = vmul.f32 %v1051_v41, %v594_v49  ;;  %v582_v59 = vsel %vm225_vm0, %v991_v58, %v411_v52  ;;  %v462_v61 = vadd.f32 %v797_v28, %v461_v53  ;;  %v520_v62 = vsub.f32 1.0, %v519_v54  ;;  %v809_v63 = vpop.eup %808  ;;  %v212_v58 = vld [vmem:[%s1401_s3 + $0x40] sm:$0xff]  ;;  %vm525_vm2 = vmor %vm523_vm12, %vm524_vm15 }
  0xc1   :  { %v598_v0 = vadd.f32 %v582_v59, %v208_v50  ;;  %v354_v5 = vmul.f32 %v809_v63, %v1027_v26  ;;  %v811_v6 = vpop.eup %810  ;;  %v1101_v15 = vadd.f32 1.0, %v807_v56  ;;  %vm359_vm3 = vweird.f32 %v809_v63 }
  0xc2   :  { %629 = vst [vmem:[%s1402_s6] sm:$0xff] %v613_v57  ;;  %v466_v4 = vsel %vm465_vm13, %v797_v28, %v462_v61  ;;  %v521_v60 = vmul.f32 %v803_v45, %v520_v62  ;;  %v1110_v22 = vadd.f32 1.0, %v811_v6  ;;  %v424_v35 = vand.u32 2147483648, %v1060_v48  ;;  %vm360_vm4 = vmor %vm358_vm1, %vm359_vm3 }
  0xc3   :  { %v617_v7 = vmul.f32 %v1051_v41, %v598_v0  ;;  %v471_v8 = vsel %vm1039_vm9, %v470_v38, %v466_v4  ;;  %v355_v14 = vsub.f32 1.0, %v354_v5  ;;  %v813_v18 = vpop.eup %812  ;;  %816 = vrcp.f32 %v1101_v15  ;;  %v199_v4 = vpop.f32.mrf.mxu3 }
  0xc4   :  { %v586_v10 = vsel %vm225_vm0, %v1000_v2, %v471_v8  ;;  %v522_v12 = vadd.f32 %v803_v45, %v521_v60  ;;  %v216_v2 = vld [vmem:[%s1401_s3 + $0x60] sm:$0xff]  ;;  %v414_v27 = vmul.f32 %v813_v18, %v1060_v48  ;;  %v365_v37 = vor.u32 1.1754944e-38, %v364_v21 }
  0xc5   :  { %633 = vst [vmem:[%s1402_s6 + $0x20] sm:$0xff] %v617_v7  ;;  %v602_v19 = vadd.f32 %v586_v10, %v212_v58  ;;  %v356_v25 = vmul.f32 %v809_v63, %v355_v14  ;;  %v1116_v28 = vpop.eup %814  ;;  %818 = vrcp.f32 %v1110_v22  ;;  %v715_v38 = vmul.f32 -1.442695, %v1030_v31 }
  0xc6   :  { %v526_v23 = vsel %vm525_vm2, %v803_v45, %v522_v12  ;;  %v415_v34 = vsub.f32 1.0, %v414_v27  ;;  %vm363_vm5 = vcmp.eq.f32.partialorder %v362_v20, 8.507059e+37  ;;  %vm419_vm6 = vweird.f32 %v813_v18 }
  0xc7   :  { %v621_v11 = vmul.f32 %v1051_v41, %v602_v19  ;;  %v531_v29 = vsel %vm1080_vm14, %v530_v9, %v526_v23  ;;  %v357_v33 = vadd.f32 %v809_v63, %v356_v25  ;;  %vm418_vm7 = vweird.f32 %v1060_v48 }
  0xc8   :  { %v590_v32 = vsel %vm225_vm0, %v1012_v13, %v531_v29  ;;  %v205_v13 = vld [vmem:[%s1401_s3 + $0x8] sm:$0xff]  ;;  %v416_v42 = vmul.f32 %v813_v18, %v415_v34  ;;  %vm1139_vm8 = vcmp.eq.f32.partialorder %v422_v30, 8.507059e+37  ;;  %v425_v50 = vor.u32 1.1754944e-38, %v424_v35  ;;  %vm420_vm9 = vmor %vm418_vm7, %vm419_vm6 }
  0xc9   :  { %637 = vst [vmem:[%s1402_s6 + $0x40] sm:$0xff] %v621_v11  ;;  %v606_v36 = vadd.f32 %v590_v32, %v216_v2  ;;  %v361_v40 = vsel %vm360_vm4, %v809_v63, %v357_v33  ;;  %v1146_v51 = vmul.f32 1.442695, %v228_v3  ;;  %v817_v53 = vpop.eup %816  ;;  %v482_v48 = vand.u32 2147483647, %v1101_v15  ;;  %v171_v2 = vpop.f32.mrf.mxu0  ;;  %v213_v11 = vld [vmem:[%s1401_s3 + $0x48] sm:$0xff] }
  0xca   :  { %v366_v45 = vsel %vm363_vm5, %v365_v37, %v361_v40  ;;  %v417_v49 = vadd.f32 %v813_v18, %v416_v42  ;;  %820 = vpow2.f32 %v715_v38  ;;  %v180_v52 = vadd.f32 %v954_v16, %v179_v43  ;;  %v217_v38 = vld [vmem:[%s1401_s3 + $0x68] sm:$0xff] }
  0xcb   :  { %v625_v44 = vmul.f32 %v1051_v41, %v606_v36  ;;  %v579_v31 = vsel %vm225_vm0, %v1024_v24, %v366_v45  ;;  %v209_v24 = vld [vmem:[%s1401_s3 + $0x28] sm:$0xff]  ;;  %v474_v56 = vmul.f32 %v817_v53, %v1101_v15  ;;  %vm478_vm10 = vweird.f32 %v1101_v15  ;;  %v819_v59 = vpop.eup %818 }
  0xcc   :  { %v595_v54 = vadd.f32 %v579_v31, %v205_v13  ;;  %v421_v46 = vsel %vm420_vm9, %v813_v18, %v417_v49  ;;  %v190_v57 = vadd.f32 %v954_v16, %v189_v47  ;;  %v484_v63 = vand.u32 2147483648, %v1101_v15 }
  0xcd   :  { %641 = vst [vmem:[%s1402_s6 + $0x60] sm:$0xff] %v625_v44  ;;  %v426_v62 = vsel %vm1139_vm8, %v425_v50, %v421_v46  ;;  %v719_v0 = vmul.f32 -1.442695, %v180_v52  ;;  %v475_v3 = vsub.f32 1.0, %v474_v56  ;;  %v534_v58 = vmul.f32 %v819_v59, %v1110_v22 }
  0xce   :  { %v614_v61 = vmul.f32 %v1051_v41, %v595_v54  ;;  %v583_v1 = vsel %vm225_vm0, %v1044_v39, %v426_v62  ;;  %vm538_vm11 = vweird.f32 %v1110_v22  ;;  %vm1171_vm12 = vcmp.eq.f32.partialorder %v482_v48, 8.507059e+37  ;;  %v181_v54 = vpop.f32.mrf.mxu1 }
  0xcf   :  { %v599_v60 = vadd.f32 %v583_v1, %v209_v24  ;;  %v542_v6 = vand.u32 2147483647, %v1110_v22  ;;  %822 = vpow2.f32 %v719_v0  ;;  %v476_v7 = vmul.f32 %v817_v53, %v475_v3 }
  0xd0   :  { %630 = vst [vmem:[%s1402_s6 + $0x8] sm:$0xff] %v614_v61  ;;  %vm479_vm13 = vweird.f32 %v817_v53  ;;  %v535_v39 = vsub.f32 1.0, %v534_v58  ;;  %v723_v8 = vmul.f32 -1.442695, %v190_v57  ;;  %v821_v9 = vpop.eup %820  ;;  %v544_v12 = vand.u32 2147483648, %v1110_v22 }
  0xd1   :  { %v618_v10 = vmul.f32 %v1051_v41, %v599_v60  ;;  %v232_v14 = vsel %vm225_vm0, %v180_v52, 0.0  ;;  %v200_v18 = vadd.f32 %v954_v16, %v199_v4  ;;  %v477_v19 = vadd.f32 %v817_v53, %v476_v7  ;;  %vm480_vm15 = vmor %vm478_vm10, %vm479_vm13 }
  0xd2   :  { %v536_v20 = vmul.f32 %v819_v59, %v535_v39  ;;  %vm539_vm14 = vweird.f32 %v819_v59  ;;  %v1181_v21 = vadd.f32 1.0, %v821_v9  ;;  %v485_v23 = vor.u32 1.1754944e-38, %v484_v63 }
  0xd3   :  { %634 = vst [vmem:[%s1402_s6 + $0x28] sm:$0xff] %v618_v10  ;;  %vm1188_vm1 = vcmp.eq.f32.partialorder %v542_v6, 8.507059e+37  ;;  %824 = vpow2.f32 %v723_v8  ;;  %v727_v27 = vmul.f32 -1.442695, %v200_v18  ;;  %v481_v29 = vsel %vm480_vm15, %v817_v53, %v477_v19  ;;  %vm540_vm2 = vmor %vm538_vm11, %vm539_vm14 }
  0xd4   :  { %v537_v30 = vadd.f32 %v819_v59, %v536_v20  ;;  %826 = vrcp.f32 %v1181_v21  ;;  %v236_v32 = vsel %vm225_vm0, %v190_v57, 0.0  ;;  %v486_v33 = vsel %vm1171_vm12, %v485_v23, %v481_v29  ;;  %v191_v57 = vpop.f32.mrf.mxu2  ;;  %v201_v29 = vpop.f32.mrf.mxu3 }
  0xd5   :  { %v823_v15 = vpop.eup %822  ;;  %v545_v34 = vor.u32 1.1754944e-38, %v544_v12  ;;  %v254_v35 = vmul.f32 1.442695, %v232_v14  ;;  %v172_v36 = vadd.f32 %v954_v16, %v171_v2  ;;  %v587_v37 = vsel %vm225_vm0, %v1066_v55, %v486_v33 }
  0xd6   :  { %v541_v13 = vsel %vm540_vm2, %v819_v59, %v537_v30  ;;  %v1210_v40 = vadd.f32 1.0, %v823_v15  ;;  %828 = vpow2.f32 %v727_v27  ;;  %v603_v42 = vadd.f32 %v587_v37, %v213_v11 }
  0xd7   :  { %v546_v22 = vsel %vm1188_vm1, %v545_v34, %v541_v13  ;;  %v262_v43 = vmul.f32 1.442695, %v236_v32  ;;  %v240_v49 = vsel %vm225_vm0, %v200_v18, 0.0  ;;  %v716_v50 = vmul.f32 -1.442695, %v172_v36  ;;  %v206_v18 = vld [vmem:[%s1401_s3 + $0x10] sm:$0xff] }
  0xd8   :  { %v591_v44 = vsel %vm225_vm0, %v1116_v28, %v546_v22  ;;  %830 = vrcp.f32 %v1210_v40  ;;  %v622_v45 = vmul.f32 %v1051_v41, %v603_v42  ;;  %v379_v52 = vand.u32 2147483648, %v1181_v21 }
  0xd9   :  { %v825_v55 = vpop.eup %824  ;;  %v607_v26 = vadd.f32 %v591_v44, %v217_v38  ;;  %832 = vpow2.f32 %v1146_v51  ;;  %v377_v51 = vand.u32 2147483647, %v1181_v21  ;;  %vm373_vm3 = vweird.f32 %v1181_v21  ;;  %v210_v38 = vld [vmem:[%s1401_s3 + $0x30] sm:$0xff] }
  0xda   :  { %v827_v47 = vpop.eup %826  ;;  %834 = vpow2.f32 %v254_v35  ;;  %v1220_v31 = vadd.f32 1.0, %v825_v55  ;;  %638 = vst [vmem:[%s1402_s6 + $0x48] sm:$0xff] %v622_v45  ;;  %v270_v46 = vmul.f32 1.442695, %v240_v49  ;;  %v437_v61 = vand.u32 2147483647, %v1210_v40 }
  0xdb   :  { %v626_v28 = vmul.f32 %v1051_v41, %v607_v26  ;;  %v369_v53 = vmul.f32 %v827_v47, %v1181_v21  ;;  %836 = vpow2.f32 %v262_v43  ;;  %v439_v62 = vand.u32 2147483648, %v1210_v40 }
  0xdc   :  { %v829_v48 = vpop.eup %828  ;;  %838 = vrcp.f32 %v1220_v31  ;;  %v1241_v63 = vadd.f32 %v954_v16, %v181_v54  ;;  %vm374_vm4 = vweird.f32 %v827_v47  ;;  %vm1245_vm5 = vcmp.eq.f32.partialorder %v377_v51, 8.507059e+37 }
  0xdd   :  { %642 = vst [vmem:[%s1402_s6 + $0x68] sm:$0xff] %v626_v28  ;;  %v370_v24 = vsub.f32 1.0, %v369_v53  ;;  %v1236_v56 = vadd.f32 1.0, %v829_v48  ;;  %840 = vpow2.f32 %v716_v50  ;;  %v380_v60 = vor.u32 1.1754944e-38, %v379_v52  ;;  %vm375_vm7 = vmor %vm373_vm3, %vm374_vm4  ;;  %v214_v28 = vld [vmem:[%s1401_s3 + $0x50] sm:$0xff] }
  0xde   :  { %v831_v59 = vpop.eup %830  ;;  %v229_v5 = vsel %vm225_vm0, %v172_v36, 0.0  ;;  %v1252_v6 = vadd.f32 %v954_v16, %v191_v57  ;;  %vm433_vm6 = vweird.f32 %v1210_v40  ;;  %vm1259_vm8 = vcmp.eq.f32.partialorder %v437_v61, 8.507059e+37 }
  0xdf   :  { %v833_v0 = vpop.eup %832  ;;  %v371_v1 = vmul.f32 %v827_v47, %v370_v24  ;;  %v429_v3 = vmul.f32 %v831_v59, %v1210_v40  ;;  %842 = vrcp.f32 %v1236_v56  ;;  %v440_v12 = vor.u32 1.1754944e-38, %v439_v62 }
  0xe0   :  { %v835_v58 = vpop.eup %834  ;;  %844 = vpow2.f32 %v270_v46  ;;  %vm493_vm9 = vweird.f32 %v1220_v31  ;;  %v720_v14 = vmul.f32 -1.442695, %v1241_v63  ;;  %vm434_vm10 = vweird.f32 %v831_v59 }
  0xe1   :  { %v1254_v7 = vpop.eup %836  ;;  %v372_v39 = vadd.f32 %v827_v47, %v371_v1  ;;  %v430_v8 = vsub.f32 1.0, %v429_v3  ;;  %v497_v25 = vand.u32 2147483647, %v1220_v31  ;;  %v499_v27 = vand.u32 2147483648, %v1220_v31  ;;  %vm435_vm11 = vmor %vm433_vm6, %vm434_vm10 }
  0xe2   :  { %v839_v9 = vpop.eup %838  ;;  %v724_v11 = vmul.f32 -1.442695, %v1252_v6  ;;  %846 = vpow2.f32 %v720_v14  ;;  %v1286_v22 = vadd.f32 %v954_v16, %v201_v29  ;;  %v559_v49 = vand.u32 2147483648, %v1236_v56 }
  0xe3   :  { %v376_v19 = vsel %vm375_vm7, %v827_v47, %v372_v39  ;;  %v431_v20 = vmul.f32 %v831_v59, %v430_v8  ;;  %v489_v2 = vmul.f32 %v839_v9, %v1220_v31  ;;  %v841_v21 = vpop.eup %840  ;;  %vm494_vm12 = vweird.f32 %v839_v9 }
  0xe4   :  { %v381_v23 = vsel %vm1245_vm5, %v380_v60, %v376_v19  ;;  %v1276_v34 = vadd.f32 1.0, %v841_v21  ;;  %v500_v44 = vor.u32 1.1754944e-38, %v499_v27  ;;  %v557_v47 = vand.u32 2147483647, %v1236_v56  ;;  %vm495_vm13 = vmor %vm493_vm9, %vm494_vm12 }
  0xe5   :  { %v843_v30 = vpop.eup %842  ;;  %v580_v32 = vsel %vm225_vm0, %v833_v0, %v381_v23  ;;  %v432_v15 = vadd.f32 %v831_v59, %v431_v20  ;;  %v490_v33 = vsub.f32 1.0, %v489_v2  ;;  %vm498_vm15 = vcmp.eq.f32.partialorder %v497_v25, 8.507059e+37  ;;  %v218_v0 = vld [vmem:[%s1401_s3 + $0x70] sm:$0xff]  ;;  %v207_v25 = vld [vmem:[%s1401_s3 + $0x18] sm:$0xff] }
  0xe6   :  { %v596_v35 = vadd.f32 %v580_v32, %v206_v18  ;;  %v549_v36 = vmul.f32 %v843_v30, %v1236_v56  ;;  %v845_v37 = vpop.eup %844  ;;  %848 = vrcp.f32 %v1276_v34  ;;  %vm554_vm14 = vweird.f32 %v843_v30 }
  0xe7   :  { %v436_v13 = vsel %vm435_vm11, %v831_v59, %v432_v15  ;;  %v491_v42 = vmul.f32 %v839_v9, %v490_v33  ;;  %850 = vpow2.f32 %v724_v11  ;;  %v248_v54 = vmul.f32 1.442695, %v229_v5 }
  0xe8   :  { %v615_v43 = vmul.f32 %v1051_v41, %v596_v35  ;;  %v441_v40 = vsel %vm1259_vm8, %v440_v12, %v436_v13  ;;  %v550_v55 = vsub.f32 1.0, %v549_v36  ;;  %v728_v48 = vmul.f32 -1.442695, %v1286_v22  ;;  %v847_v51 = vpop.eup %846 }
  0xe9   :  { %v584_v45 = vsel %vm225_vm0, %v835_v58, %v441_v40  ;;  %v492_v26 = vadd.f32 %v839_v9, %v491_v42  ;;  %vm553_vm1 = vweird.f32 %v1236_v56  ;;  %v560_v59 = vor.u32 1.1754944e-38, %v559_v49 }
  0xea   :  { %631 = vst [vmem:[%s1402_s6 + $0x10] sm:$0xff] %v615_v43  ;;  %v600_v16 = vadd.f32 %v584_v45, %v210_v38  ;;  %v551_v50 = vmul.f32 %v843_v30, %v550_v55  ;;  %vm555_vm2 = vmor %vm553_vm1, %vm554_vm14  ;;  %v1310_v61 = vadd.f32 1.0, %v847_v51  ;;  %852 = vpow2.f32 %v728_v48 }
  0xeb   :  { %v496_v53 = vsel %vm495_vm13, %v839_v9, %v492_v26  ;;  %vm558_vm3 = vcmp.eq.f32.partialorder %v557_v47, 8.507059e+37  ;;  %v394_v39 = vand.u32 2147483648, %v1276_v34  ;;  %v392_v10 = vand.u32 2147483647, %v1276_v34  ;;  %v211_v47 = vld [vmem:[%s1401_s3 + $0x38] sm:$0xff] }
  0xec   :  { %v619_v52 = vmul.f32 %v1051_v41, %v600_v16  ;;  %v501_v24 = vsel %vm498_vm15, %v500_v44, %v496_v53  ;;  %v552_v46 = vadd.f32 %v843_v30, %v551_v50  ;;  %v849_v31 = vpop.eup %848  ;;  %854 = vrcp.f32 %v1310_v61 }
  0xed   :  { %v588_v57 = vsel %vm225_vm0, %v1254_v7, %v501_v24  ;;  %v384_v1 = vmul.f32 %v849_v31, %v1276_v34  ;;  %v851_v58 = vpop.eup %850  ;;  %856 = vpow2.f32 %v248_v54  ;;  %vm389_vm4 = vweird.f32 %v849_v31 }
  0xee   :  { %635 = vst [vmem:[%s1402_s6 + $0x30] sm:$0xff] %v619_v52  ;;  %v604_v62 = vadd.f32 %v588_v57, %v214_v28  ;;  %v556_v56 = vsel %vm555_vm2, %v843_v30, %v552_v46  ;;  %v1324_v8 = vadd.f32 1.0, %v851_v58  ;;  %v233_v12 = vsel %vm225_vm0, %v1241_v63, 0.0  ;;  %v215_v57 = vld [vmem:[%s1401_s3 + $0x58] sm:$0xff] }
  0xef   :  { %v561_v3 = vsel %vm558_vm3, %v560_v59, %v556_v56  ;;  %v385_v5 = vsub.f32 1.0, %v384_v1  ;;  %vm388_vm5 = vweird.f32 %v1276_v34  ;;  %v395_v21 = vor.u32 1.1754944e-38, %v394_v39 }
  0xf0   :  { %v623_v4 = vmul.f32 %v1051_v41, %v604_v62  ;;  %v592_v60 = vsel %vm225_vm0, %v845_v37, %v561_v3  ;;  %v853_v14 = vpop.eup %852  ;;  %858 = vrcp.f32 %v1324_v8  ;;  %vm390_vm6 = vmor %vm388_vm5, %vm389_vm4  ;;  %v256_v23 = vmul.f32 1.442695, %v233_v12 }
  0xf1   :  { %v608_v7 = vadd.f32 %v592_v60, %v218_v0  ;;  %v386_v9 = vmul.f32 %v849_v31, %v385_v5  ;;  %v1336_v20 = vadd.f32 1.0, %v853_v14  ;;  %v237_v63 = vsel %vm225_vm0, %v1252_v6, 0.0  ;;  %v219_v5 = vld [vmem:[%s1401_s3 + $0x78] sm:$0xff] }
  0xf2   :  { %639 = vst [vmem:[%s1402_s6 + $0x50] sm:$0xff] %v623_v4  ;;  %v855_v2 = vpop.eup %854  ;;  %vm393_vm7 = vcmp.eq.f32.partialorder %v392_v10, 8.507059e+37  ;;  %v264_v33 = vmul.f32 1.442695, %v237_v63  ;;  %v241_v6 = vsel %vm225_vm0, %v1286_v22, 0.0  ;;  %v454_v37 = vand.u32 2147483648, %v1310_v61 }
  0xf3   :  { %v627_v18 = vmul.f32 %v1051_v41, %v608_v7  ;;  %v387_v19 = vadd.f32 %v849_v31, %v386_v9  ;;  %v444_v11 = vmul.f32 %v855_v2, %v1310_v61  ;;  %v857_v29 = vpop.eup %856  ;;  %860 = vrcp.f32 %v1336_v20 }
  0xf4   :  { %862 = vpow2.f32 %v256_v23  ;;  %v452_v36 = vand.u32 2147483647, %v1310_v61  ;;  %vm449_vm8 = vweird.f32 %v855_v2  ;;  %v272_v43 = vmul.f32 1.442695, %v241_v6 }
  0xf5   :  { %643 = vst [vmem:[%s1402_s6 + $0x70] sm:$0xff] %v627_v18  ;;  %v391_v27 = vsel %vm390_vm6, %v849_v31, %v387_v19  ;;  %v445_v15 = vsub.f32 1.0, %v444_v11  ;;  %vm448_vm9 = vweird.f32 %v1310_v61  ;;  %864 = vpow2.f32 %v264_v33 }
  0xf6   :  { %v396_v30 = vsel %vm393_vm7, %v395_v21, %v391_v27  ;;  %v859_v34 = vpop.eup %858  ;;  %vm450_vm10 = vmor %vm448_vm9, %vm449_vm8  ;;  %vm453_vm11 = vcmp.eq.f32.partialorder %v452_v36, 8.507059e+37  ;;  %v455_v55 = vor.u32 1.1754944e-38, %v454_v37  ;;  %v512_v45 = vand.u32 2147483647, %v1324_v8 }
  0xf7   :  { %v581_v32 = vsel %vm225_vm0, %v857_v29, %v396_v30  ;;  %v446_v38 = vmul.f32 %v855_v2, %v445_v15  ;;  %v504_v13 = vmul.f32 %v859_v34, %v1324_v8  ;;  %v514_v26 = vand.u32 2147483648, %v1324_v8 }
  0xf8   :  { %v597_v35 = vadd.f32 %v581_v32, %v207_v25  ;;  %vm509_vm12 = vweird.f32 %v859_v34  ;;  %866 = vpow2.f32 %v272_v43  ;;  %vm508_vm13 = vweird.f32 %v1324_v8 }
  0xf9   :  { %v447_v40 = vadd.f32 %v855_v2, %v446_v38  ;;  %v505_v44 = vsub.f32 1.0, %v504_v13  ;;  %v861_v22 = vpop.eup %860  ;;  %vm510_vm14 = vmor %vm508_vm13, %vm509_vm12  ;;  %vm513_vm15 = vcmp.eq.f32.partialorder %v512_v45, 8.507059e+37  ;;  %v515_v24 = vor.u32 1.1754944e-38, %v514_v26 }
  0xfa   :  { %v616_v42 = vmul.f32 %v1051_v41, %v597_v35  ;;  %v564_v50 = vmul.f32 %v861_v22, %v1336_v20  ;;  %v863_v28 = vpop.eup %862  ;;  %v574_v46 = vand.u32 2147483648, %v1336_v20  ;;  %vm569_vm1 = vweird.f32 %v861_v22 }
  0xfb   :  { %v451_v49 = vsel %vm450_vm10, %v855_v2, %v447_v40  ;;  %v506_v16 = vmul.f32 %v859_v34, %v505_v44  ;;  %v865_v31 = vpop.eup %864  ;;  %v572_v62 = vand.u32 2147483647, %v1336_v20  ;;  %vm568_vm2 = vweird.f32 %v1336_v20 }
  0xfc   :  { %632 = vst [vmem:[%s1402_s6 + $0x18] sm:$0xff] %v616_v42  ;;  %v456_v53 = vsel %vm453_vm11, %v455_v55, %v451_v49  ;;  %v565_v51 = vsub.f32 1.0, %v564_v50  ;;  %vm570_vm3 = vmor %vm568_vm2, %vm569_vm1  ;;  %v575_v60 = vor.u32 1.1754944e-38, %v574_v46 }
  0xfd   :  { %v585_v54 = vsel %vm225_vm0, %v863_v28, %v456_v53  ;;  %v507_v48 = vadd.f32 %v859_v34, %v506_v16  ;;  %vm573_vm4 = vcmp.eq.f32.partialorder %v572_v62, 8.507059e+37 }
  0xfe   :  { %v601_v52 = vadd.f32 %v585_v54, %v211_v47  ;;  %v566_v61 = vmul.f32 %v861_v22, %v565_v51  ;;  %v867_v58 = vpop.eup %866 }
  0xff   :  { %v511_v59 = vsel %vm510_vm14, %v859_v34, %v507_v48 }
 0x100   :  { %v620_v0 = vmul.f32 %v1051_v41, %v601_v52  ;;  %v516_v56 = vsel %vm513_vm15, %v515_v24, %v511_v59  ;;  %v567_v3 = vadd.f32 %v861_v22, %v566_v61 }
 0x101   :  { %v589_v1 = vsel %vm225_vm0, %v865_v31, %v516_v56 }
 0x102   :  { %636 = vst [vmem:[%s1402_s6 + $0x38] sm:$0xff] %v620_v0  ;;  %v605_v4 = vadd.f32 %v589_v1, %v215_v57  ;;  %v571_v7 = vsel %vm570_vm3, %v861_v22, %v567_v3 }
 0x103   :  { %v576_v8 = vsel %vm573_vm4, %v575_v60, %v571_v7 }
 0x104   :  { %v624_v39 = vmul.f32 %v1051_v41, %v605_v4  ;;  %v593_v9 = vsel %vm225_vm0, %v867_v58, %v576_v8 }
 0x105   :  { %v609_v10 = vadd.f32 %v593_v9, %v219_v5 }
 0x106   :  { %640 = vst [vmem:[%s1402_s6 + $0x58] sm:$0xff] %v624_v39 }
 0x107   :  { %v628_v12 = vmul.f32 %v1051_v41, %v609_v10 }
 0x109   :  { %644 = vst [vmem:[%s1402_s6 + $0x78] sm:$0xff] %v628_v12 }

// kernel: forward.15
= control target key start
LH: loop header
LB: loop body
LE: loop exit
PB: predicated region body
PF: predicated region fallthrough
CT: control target
= control target key end

     0   :  { %s467_s1 = inlined_call_operand.vmem [shape: bf16[128,128], index: 1, kind: input, shape index: {}]   ;;  %s468_s2 = inlined_call_operand.vmem [shape: f32[1,128], index: 2, kind: input, shape index: {}]   ;;  %s469_s4 = inlined_call_operand.vmem [shape: f32[1,128], index: 4, kind: input, shape index: {}]   ;;  %s470_s5 = inlined_call_operand.vmem [shape: f32[1,128], index: 5, kind: input, shape index: {}]   ;;  %s471_s0 = inlined_call_operand.vmem [shape: bf16[32,128], index: 0, kind: input, shape index: {}]   ;;  %s472_s3 = inlined_call_operand.vmem [shape: f32[32,128], index: 3, kind: input, shape index: {}]   ;;  %s473_s6 = inlined_call_operand.vmem [shape: f32[32,128], index: 6, kind: output, shape index: {}]  }
   0x1   :  { %v300_v0 = vld [vmem:[%s467_s1 + $0x38] sm:$0xff]  ;;  %v299_v1 = vld [vmem:[%s467_s1 + $0x30] sm:$0xff]  ;;  %v298_v2 = vld [vmem:[%s467_s1 + $0x28] sm:$0xff] }
   0x2   :  { %107 = vmatpush.bf16.msra.mxu0 %v300_v0  ;;  %301 = vmatpush.bf16.msra.mxu1 %v300_v0  ;;  %v297_v3 = vld [vmem:[%s467_s1 + $0x20] sm:$0xff]  ;;  %v296_v4 = vld [vmem:[%s467_s1 + $0x18] sm:$0xff]  ;;  %v295_v5 = vld [vmem:[%s467_s1 + $0x10] sm:$0xff] }
   0x3   :  { %v294_v6 = vld [vmem:[%s467_s1 + $0x8] sm:$0xff]  ;;  %v293_v7 = vld [vmem:[%s467_s1] sm:$0xff] }
   0x4   :  { %v291_v8 = vld [vmem:[%s471_s0] sm:$0xff]  ;;  %v292_v9 = vld [vmem:[%s471_s0 + $0x8] sm:$0xff] }
   0x5   :  { %v309_v10 = vld [vmem:[%s468_s2] ss:$0 sm:$0xff] }
   0x6   :  { %108 = vmatpush.bf16.msra.mxu0 %v299_v1  ;;  %302 = vmatpush.bf16.msra.mxu1 %v299_v1  ;;  %v407_v20 = vld [vmem:[%s470_s5] ss:$0 sm:$0xff] }
   0x7   :  { %vm135_vm0 = vcmp.gt.f32.partialorder %v407_v20, 0.5  ;;  %v126_v54 = vld [vmem:[%s472_s3] sm:$0xff] }
   0x8   :  { %v311_v59 = vld [vmem:[%s469_s4] ss:$0 sm:$0xff] }
   0xa   :  { %109 = vmatpush.bf16.msra.mxu0 %v298_v2  ;;  %303 = vmatpush.bf16.msra.mxu1 %v298_v2 }
   0xe   :  { %110 = vmatpush.bf16.msra.mxu0 %v297_v3  ;;  %304 = vmatpush.bf16.msra.mxu1 %v297_v3  ;;  %v128_v3 = vld [vmem:[%s472_s3 + $0x10] sm:$0xff] }
  0x12   :  { %111 = vmatpush.bf16.msra.mxu0 %v296_v4  ;;  %305 = vmatpush.bf16.msra.mxu1 %v296_v4 }
  0x16   :  { %112 = vmatpush.bf16.msra.mxu0 %v295_v5  ;;  %306 = vmatpush.bf16.msra.mxu1 %v295_v5 }
  0x1a   :  { %113 = vmatpush.bf16.msra.mxu0 %v294_v6  ;;  %307 = vmatpush.bf16.msra.mxu1 %v294_v6 }
  0x1e   :  { %114 = vmatpush.bf16.msra.mxu0 %v293_v7  ;;  %308 = vmatpush.bf16.msra.mxu1 %v293_v7 }
  0x21   :  { %115 = vmatmul.bf16.vlgmr.msra.gmra.mxu0 %v291_v8  ;;  %120 = vmatmul.bf16.vlgmr.msra.gmra.mxu1 %v292_v9 }
  0x9e   :  { %v116_v11 = vpop.f32.mrf.mxu0  ;;  %v121_v12 = vpop.f32.mrf.mxu1 }
  0x9f   :  { %v117_v13 = vadd.f32 %v309_v10, %v116_v11  ;;  %v122_v14 = vadd.f32 %v309_v10, %v121_v12 }
  0xa1   :  { %v287_v15 = vmul.f32 -1.442695, %v117_v13  ;;  %v289_v16 = vmul.f32 -1.442695, %v122_v14  ;;  %v136_v28 = vsel %vm135_vm0, %v117_v13, 0.0  ;;  %v138_v30 = vsel %vm135_vm0, %v122_v14, 0.0 }
  0xa2   :  { %v140_v32 = vmul.f32 1.442695, %v136_v28  ;;  %v144_v35 = vmul.f32 1.442695, %v138_v30 }
  0xa3   :  { %312 = vpow2.f32 %v287_v15 }
  0xa4   :  { %314 = vpow2.f32 %v289_v16 }
  0xa6   :  { %v118_v17 = vpop.f32.mrf.mxu0  ;;  %v123_v18 = vpop.f32.mrf.mxu1 }
  0xa7   :  { %v119_v19 = vadd.f32 %v309_v10, %v118_v17  ;;  %v124_v21 = vadd.f32 %v309_v10, %v123_v18 }
  0xa9   :  { %v313_v22 = vpop.eup %312  ;;  %v288_v23 = vmul.f32 -1.442695, %v119_v19  ;;  %v290_v26 = vmul.f32 -1.442695, %v124_v21  ;;  %v137_v38 = vsel %vm135_vm0, %v119_v19, 0.0  ;;  %v139_v47 = vsel %vm135_vm0, %v124_v21, 0.0 }
  0xaa   :  { %v160_v24 = vadd.f32 1.0, %v313_v22  ;;  %v315_v25 = vpop.eup %314  ;;  %v142_v46 = vmul.f32 1.442695, %v137_v38  ;;  %v146_v61 = vmul.f32 1.442695, %v139_v47  ;;  %v127_v19 = vld [vmem:[%s472_s3 + $0x8] sm:$0xff] }
  0xab   :  { %316 = vpow2.f32 %v288_v23  ;;  %v162_v27 = vadd.f32 1.0, %v315_v25 }
  0xac   :  { %318 = vrcp.f32 %v160_v24  ;;  %v175_v40 = vand.u32 2147483648, %v160_v24  ;;  %v173_v43 = vand.u32 2147483647, %v160_v24  ;;  %vm169_vm2 = vweird.f32 %v160_v24 }
  0xad   :  { %320 = vrcp.f32 %v162_v27  ;;  %v205_v49 = vand.u32 2147483648, %v162_v27  ;;  %v203_v53 = vand.u32 2147483647, %v162_v27  ;;  %vm199_vm6 = vweird.f32 %v162_v27 }
  0xae   :  { %322 = vpow2.f32 %v290_v26  ;;  %v176_v51 = vor.u32 1.1754944e-38, %v175_v40  ;;  %vm174_vm5 = vcmp.eq.f32.partialorder %v173_v43, 8.507059e+37 }
  0xaf   :  { %v206_v63 = vor.u32 1.1754944e-38, %v205_v49  ;;  %vm204_vm8 = vcmp.eq.f32.partialorder %v203_v53, 8.507059e+37 }
  0xb1   :  { %v317_v29 = vpop.eup %316 }
  0xb2   :  { %v319_v31 = vpop.eup %318  ;;  %v414_v33 = vadd.f32 1.0, %v317_v29 }
  0xb3   :  { %v165_v34 = vmul.f32 %v319_v31, %v160_v24  ;;  %v321_v36 = vpop.eup %320  ;;  %vm170_vm1 = vweird.f32 %v319_v31 }
  0xb4   :  { %324 = vrcp.f32 %v414_v33  ;;  %v323_v39 = vpop.eup %322  ;;  %v195_v41 = vmul.f32 %v321_v36, %v162_v27  ;;  %vm171_vm3 = vmor %vm169_vm2, %vm170_vm1  ;;  %vm200_vm4 = vweird.f32 %v321_v36  ;;  %v190_v5 = vand.u32 2147483648, %v414_v33 }
  0xb5   :  { %v166_v37 = vsub.f32 1.0, %v165_v34  ;;  %326 = vpow2.f32 %v140_v32  ;;  %v419_v44 = vadd.f32 1.0, %v323_v39  ;;  %vm201_vm7 = vmor %vm199_vm6, %vm200_vm4  ;;  %v188_v9 = vand.u32 2147483647, %v414_v33  ;;  %v129_v32 = vld [vmem:[%s472_s3 + $0x18] sm:$0xff] }
  0xb6   :  { %328 = vpow2.f32 %v144_v35  ;;  %v196_v45 = vsub.f32 1.0, %v195_v41  ;;  %vm184_vm10 = vweird.f32 %v414_v33  ;;  %v191_v15 = vor.u32 1.1754944e-38, %v190_v5 }
  0xb7   :  { %v167_v42 = vmul.f32 %v319_v31, %v166_v37  ;;  %330 = vrcp.f32 %v419_v44  ;;  %vm189_vm12 = vcmp.eq.f32.partialorder %v188_v9, 8.507059e+37  ;;  %v220_v22 = vand.u32 2147483648, %v419_v44 }
  0xb8   :  { %v197_v52 = vmul.f32 %v321_v36, %v196_v45  ;;  %332 = vpow2.f32 %v142_v46  ;;  %v218_v25 = vand.u32 2147483647, %v419_v44  ;;  %vm214_vm14 = vweird.f32 %v419_v44 }
  0xb9   :  { %v168_v48 = vadd.f32 %v319_v31, %v167_v42  ;;  %334 = vpow2.f32 %v146_v61  ;;  %v221_v29 = vor.u32 1.1754944e-38, %v220_v22 }
  0xba   :  { %v325_v50 = vpop.eup %324  ;;  %v198_v60 = vadd.f32 %v321_v36, %v197_v52  ;;  %vm219_vm1 = vcmp.eq.f32.partialorder %v218_v25, 8.507059e+37 }
  0xbb   :  { %v172_v55 = vsel %vm171_vm3, %v319_v31, %v168_v48  ;;  %v180_v56 = vmul.f32 %v325_v50, %v414_v33  ;;  %v327_v57 = vpop.eup %326  ;;  %vm185_vm9 = vweird.f32 %v325_v50 }
  0xbc   :  { %v177_v58 = vsel %vm174_vm5, %v176_v51, %v172_v55  ;;  %v329_v1 = vpop.eup %328  ;;  %v202_v4 = vsel %vm201_vm7, %v321_v36, %v198_v60  ;;  %vm186_vm11 = vmor %vm184_vm10, %vm185_vm9 }
  0xbd   :  { %v224_v62 = vsel %vm135_vm0, %v327_v57, %v177_v58  ;;  %v181_v0 = vsub.f32 1.0, %v180_v56  ;;  %v331_v6 = vpop.eup %330  ;;  %v207_v7 = vsel %vm204_vm8, %v206_v63, %v202_v4 }
  0xbe   :  { %v228_v2 = vadd.f32 %v224_v62, %v126_v54  ;;  %v226_v11 = vsel %vm135_vm0, %v329_v1, %v207_v7  ;;  %v210_v12 = vmul.f32 %v331_v6, %v419_v44  ;;  %v333_v17 = vpop.eup %332  ;;  %vm215_vm13 = vweird.f32 %v331_v6 }
  0xbf   :  { %v182_v8 = vmul.f32 %v325_v50, %v181_v0  ;;  %v230_v13 = vadd.f32 %v226_v11, %v128_v3  ;;  %vm216_vm15 = vmor %vm214_vm14, %vm215_vm13  ;;  %v335_v30 = vpop.eup %334 }
  0xc0   :  { %v235_v10 = vmul.f32 %v311_v59, %v228_v2  ;;  %v211_v16 = vsub.f32 1.0, %v210_v12 }
  0xc1   :  { %v183_v14 = vadd.f32 %v325_v50, %v182_v8  ;;  %v237_v18 = vmul.f32 %v311_v59, %v230_v13 }
  0xc2   :  { %239 = vst [vmem:[%s473_s6] sm:$0xff] %v235_v10  ;;  %v212_v24 = vmul.f32 %v331_v6, %v211_v16 }
  0xc3   :  { %v187_v21 = vsel %vm186_vm11, %v325_v50, %v183_v14  ;;  %241 = vst [vmem:[%s473_s6 + $0x10] sm:$0xff] %v237_v18 }
  0xc4   :  { %v192_v23 = vsel %vm189_vm12, %v191_v15, %v187_v21  ;;  %v213_v28 = vadd.f32 %v331_v6, %v212_v24 }
  0xc5   :  { %v225_v26 = vsel %vm135_vm0, %v333_v17, %v192_v23 }
  0xc6   :  { %v229_v27 = vadd.f32 %v225_v26, %v127_v19  ;;  %v217_v33 = vsel %vm216_vm15, %v331_v6, %v213_v28 }
  0xc7   :  { %v222_v34 = vsel %vm219_vm1, %v221_v29, %v217_v33 }
  0xc8   :  { %v236_v31 = vmul.f32 %v311_v59, %v229_v27  ;;  %v227_v35 = vsel %vm135_vm0, %v335_v30, %v222_v34 }
  0xc9   :  { %v231_v36 = vadd.f32 %v227_v35, %v129_v32 }
  0xca   :  { %240 = vst [vmem:[%s473_s6 + $0x8] sm:$0xff] %v236_v31 }
  0xcb   :  { %v238_v37 = vmul.f32 %v311_v59, %v231_v36 }
  0xcd   :  { %242 = vst [vmem:[%s473_s6 + $0x18] sm:$0xff] %v238_v37 }

</bundles_post_ra>
